<compile_context>
chip_gen: v7x
topology: tpu7x:2x2x1
jax: 0.10.0
libtpu: 0.0.40
codegen_flags: <defaults>
</compile_context>

<pallas_src>
import functools
import math

import jax
import jax.numpy as jnp
from jax.experimental import pallas as pl
from jax.experimental.pallas import tpu as pltpu

# ----------------------------- small config ---------------------------------
EMB_DIM = 16
IMAGE_SIZE = 16
PATCH_SIZE = 8
VISION_WIDTH = 32
VISION_BLOCKS = 2
VISION_HEADS = 4
MAX_LENGTH = 8
VOCAB_SIZE = 64
TEXT_WIDTH = 32
TEXT_BLOCKS = 2
TEXT_HEADS = 4
INIT_TEMP = 0.07
MAX_TEMP = 100.0
BATCH = 2
CHANNELS = 3
LN_EPS = 1e-5


# --------------------------- in-kernel helpers --------------------------------
def _ln(x, g, b):
    """LayerNorm over the last (lane) axis of a 2-D value."""
    mean = jnp.mean(x, axis=-1, keepdims=True)
    xc = x - mean
    var = jnp.mean(xc * xc, axis=-1, keepdims=True)
    return xc * jax.lax.rsqrt(var + LN_EPS) * g + b


def _attention_mask(m, seq_pad, seq_real, batch, causal):
    """Block-diagonal (same image / same sentence) mask, optionally causal.

    Rows are laid out in per-batch blocks of `seq_pad`; only the first `seq_real`
    columns of each block are real tokens (the rest are padding and are masked out)."""
    ri = jax.lax.broadcasted_iota(jnp.int32, (m, m), 0)
    ci = jax.lax.broadcasted_iota(jnp.int32, (m, m), 1)
    allow = None
    for b in range(batch):
        lo = b * seq_pad
        blk = jnp.logical_and(
            jnp.logical_and(ri >= lo, ri < lo + seq_pad),
            jnp.logical_and(ci >= lo, ci < lo + seq_real))
        allow = blk if allow is None else jnp.logical_or(allow, blk)
    if causal:
        allow = jnp.logical_and(allow, ci <= ri)
    return allow


def _transformer_stack(x, attn_w_ref, mlp_w1_ref, mlp_w2_ref, vecs_ref, mlp_b1_ref,
                       *, n_heads, seq_pad, seq_real, batch, causal):
    """Run every residual block on x: (batch*seq_pad, width) f32, fully in VMEM/registers."""
    m, width = x.shape
    dh = width // n_heads
    scale = 1.0 / math.sqrt(dh)
    n_blocks = vecs_ref.shape[0]
    allow = _attention_mask(m, seq_pad, seq_real, batch, causal)  # computed once

    for blk in range(n_blocks):
        vecs = vecs_ref[blk]                        # (9, W) stacked per-block vectors
        ln1_g, ln1_b = vecs[0:1, :], vecs[1:2, :]
        b_q, b_k, b_v = vecs[2:3, :], vecs[3:4, :], vecs[4:5, :]
        b_out = vecs[5:6, :]
        ln2_g, ln2_b = vecs[6:7, :], vecs[7:8, :]
        mlp_b2 = vecs[8:9, :]
        mlp_b1 = mlp_b1_ref[blk]                    # (1, 4W)

        # ---- multi-head self-attention (separate q/k/v projections) ----
        h = _ln(x, ln1_g, ln1_b)
        q = jnp.dot(h, attn_w_ref[4 * blk + 0], preferred_element_type=jnp.float32) + b_q
        k = jnp.dot(h, attn_w_ref[4 * blk + 1], preferred_element_type=jnp.float32) + b_k
        v = jnp.dot(h, attn_w_ref[4 * blk + 2], preferred_element_type=jnp.float32) + b_v
        kt = k.T                                    # one transpose per block
        heads = []
        for hh in range(n_heads):
            lo = hh * dh
            s = jnp.dot(q[:, lo:lo + dh], kt[lo:lo + dh, :],
                        preferred_element_type=jnp.float32) * scale
            s = jnp.where(allow, s, -1e30)
            s = s - jnp.max(s, axis=-1, keepdims=True)
            e = jnp.exp(s)
            p = e * pl.reciprocal(jnp.sum(e, axis=-1, keepdims=True), approx=True)
            heads.append(jnp.dot(p, v[:, lo:lo + dh],
                                 preferred_element_type=jnp.float32))       # (m, dh)
        attn = jnp.concatenate(heads, axis=-1)      # (m, W) -> single out-proj matmul
        # TODO(synk): dropout(p=0.5) in the reference module is treated as identity (eval).
        x = x + jnp.dot(attn, attn_w_ref[4 * blk + 3],
                        preferred_element_type=jnp.float32) + b_out

        # ---- MLP ----
        h = _ln(x, ln2_g, ln2_b)
        h = jnp.dot(h, mlp_w1_ref[blk], preferred_element_type=jnp.float32) + mlp_b1
        # TODO(synk): torch nn.GELU default is exact (erf) GELU; tanh approximation here.
        h = jax.nn.gelu(h, approximate=True)
        x = x + jnp.dot(h, mlp_w2_ref[blk], preferred_element_type=jnp.float32) + mlp_b2
    return x


# ------------------------------- fused kernel ----------------------------------
def _clip_kernel(
        # vision operands
        patches_ref, conv_w_ref, vis_cls_ref, vis_pos_ref, vis_ln_pre_ref,
        vis_ln_post_ref, vis_proj_ref, vis_attn_w_ref, vis_mlp_w1_ref,
        vis_mlp_w2_ref, vis_vecs_ref, vis_mlp_b1_ref,
        # text operands
        txt_ids_ref, tok_emb_ref, txt_pos_ref, txt_ln_f_ref, txt_proj_ref,
        txt_attn_w_ref, txt_mlp_w1_ref, txt_mlp_w2_ref, txt_vecs_ref,
        txt_mlp_b1_ref,
        # SMEM scalars
        eot_ref, ls_ref,
        # output
        out_ref, *, batch):
    # ============================ vision encoder ============================
    pos_v = vis_pos_ref[...]                       # (S_real, W)
    s_real = pos_v.shape[0]
    n_patch = s_real - 1
    s_pad = ((s_real + 7) // 8) * 8                # pad tokens/image -> sublane aligned
    m_v = batch * s_pad

    # patch embedding == Conv2d(C, width, kernel=patch, stride=patch, bias=False)
    pe = jnp.dot(patches_ref[...], conv_w_ref[...],
                 preferred_element_type=jnp.float32)            # (batch*n_patch, W)

    # assemble [cls ; patches ; 0-pad] + pos as a VALUE (iota scatter matmuls, no scratch)
    ri = jax.lax.broadcasted_iota(jnp.int32, (m_v, batch * n_patch), 0)
    ci = jax.lax.broadcasted_iota(jnp.int32, (m_v, batch * n_patch), 1)
    sel_pe = None
    for b in range(batch):
        lo = b * s_pad + 1
        cond = jnp.logical_and(jnp.logical_and(ri >= lo, ri < lo + n_patch),
                               ci == ri - (lo - b * n_patch))
        sel_pe = cond if sel_pe is None else jnp.logical_or(sel_pe, cond)
    x_patch = jnp.dot(jnp.where(sel_pe, 1.0, 0.0), pe,
                      preferred_element_type=jnp.float32)       # (m_v, W)

    rcol = jax.lax.broadcasted_iota(jnp.int32, (m_v, 1), 0)
    is_cls = None
    for b in range(batch):
        c = rcol == b * s_pad
        is_cls = c if is_cls is None else jnp.logical_or(is_cls, c)
    x_cls = jnp.where(is_cls, 1.0, 0.0) * vis_cls_ref[...]      # (m_v, W)

    rp = jax.lax.broadcasted_iota(jnp.int32, (m_v, s_real), 0)
    cp = jax.lax.broadcasted_iota(jnp.int32, (m_v, s_real), 1)
    sel_pos = None
    for b in range(batch):
        lo = b * s_pad
        cond = jnp.logical_and(jnp.logical_and(rp >= lo, rp < lo + s_real),
                               cp == rp - lo)
        sel_pos = cond if sel_pos is None else jnp.logical_or(sel_pos, cond)
    pos_tiled = jnp.dot(jnp.where(sel_pos, 1.0, 0.0), pos_v,
                        preferred_element_type=jnp.float32)

    xv = x_cls + x_patch + pos_tiled
    ln_pre = vis_ln_pre_ref[...]
    xv = _ln(xv, ln_pre[0:1, :], ln_pre[1:2, :])
    xv = _transformer_stack(xv, vis_attn_w_ref, vis_mlp_w1_ref, vis_mlp_w2_ref,
                            vis_vecs_ref, vis_mlp_b1_ref,
                            n_heads=VISION_HEADS, seq_pad=s_pad, seq_real=s_real,
                            batch=batch, causal=False)

    # cls token of each image via a one-hot matmul (no strided gather)
    rb = jax.lax.broadcasted_iota(jnp.int32, (batch, m_v), 0)
    cb = jax.lax.broadcasted_iota(jnp.int32, (batch, m_v), 1)
    sel_cls = jnp.where(cb == rb * s_pad, 1.0, 0.0)
    cls_tok = jnp.dot(sel_cls, xv, preferred_element_type=jnp.float32)      # (B, W)
    ln_post = vis_ln_post_ref[...]
    cls_tok = _ln(cls_tok, ln_post[0:1, :], ln_post[1:2, :])
    img_feat = jnp.dot(cls_tok, vis_proj_ref[...],
                       preferred_element_type=jnp.float32)                  # (B, E)

    # ============================= text encoder =============================
    tok_emb = tok_emb_ref[...]                     # (V, W)
    vocab = tok_emb.shape[0]
    pos_t = txt_pos_ref[...]                       # (S_t, W), S_t = 8 (sublane aligned)
    s_t = pos_t.shape[0]
    m_t = batch * s_t

    ids = txt_ids_ref[...]                         # (m_t, 1) int32 token ids
    viota = jax.lax.broadcasted_iota(jnp.int32, (m_t, vocab), 1)
    onehot = jnp.where(viota == ids, 1.0, 0.0)
    xt = jnp.dot(onehot, tok_emb, preferred_element_type=jnp.float32)
    xt = xt + jnp.concatenate([pos_t] * batch, axis=0)
    xt = _transformer_stack(xt, txt_attn_w_ref, txt_mlp_w1_ref, txt_mlp_w2_ref,
                            txt_vecs_ref, txt_mlp_b1_ref,
                            n_heads=TEXT_HEADS, seq_pad=s_t, seq_real=s_t,
                            batch=batch, causal=True)

    # EOT token feature via one-hot matmul (flat EOT indices live in SMEM)
    ce = jax.lax.broadcasted_iota(jnp.int32, (1, m_t), 1)
    sel_eot = jnp.concatenate(
        [jnp.where(ce == eot_ref[b], 1.0, 0.0) for b in range(batch)], axis=0)
    eot_tok = jnp.dot(sel_eot, xt, preferred_element_type=jnp.float32)      # (B, W)
    ln_f = txt_ln_f_ref[...]
    eot_tok = _ln(eot_tok, ln_f[0:1, :], ln_f[1:2, :])
    txt_feat = jnp.dot(eot_tok, txt_proj_ref[...],
                       preferred_element_type=jnp.float32)                  # (B, E)

    # ============================== logit head ==============================
    # TODO(synk): PyTorch .norm() has no epsilon; kept faithful (all-zero row would NaN).
    img_n = img_feat * jax.lax.rsqrt(jnp.sum(img_feat * img_feat, axis=-1, keepdims=True))
    txt_n = txt_feat * jax.lax.rsqrt(jnp.sum(txt_feat * txt_feat, axis=-1, keepdims=True))
    ls = jnp.full((batch, batch), ls_ref[0], dtype=jnp.float32)
    scale = jnp.minimum(jnp.exp(ls), MAX_TEMP)
    out_ref[...] = scale * jax.lax.dot_general(
        img_n, txt_n, (((1,), (1,)), ((), ())), preferred_element_type=jnp.float32)


# ------------------------------ JAX wrapper -----------------------------------
def clip_forward(params, image, text):
    """image: (B, C, H, W) f32 NCHW; text: (B, S) int32 token ids.  ONE pallas_call."""
    B = image.shape[0]
    p = PATCH_SIZE
    gh = IMAGE_SIZE // p
    n_patch = gh * gh
    patches = image.reshape(B, CHANNELS, gh, p, gh, p)
    patches = patches.transpose(0, 2, 4, 1, 3, 5).reshape(B * n_patch,
                                                          CHANNELS * p * p)
    s_t = text.shape[1]
    ids = text.reshape(B * s_t, 1).astype(jnp.int32)
    # EOT token = highest vocab id (CLIP convention); flat row index into (B*S, W)
    eot_flat = (jnp.arange(B, dtype=jnp.int32) * s_t
                + jnp.argmax(text, axis=-1).astype(jnp.int32))

    V, T = params["vision"], params["text"]
    inputs = [patches, V["conv_w"], V["cls"], V["pos"], V["ln_pre"], V["ln_post"],
              V["proj"], V["attn_w"], V["mlp_w1"], V["mlp_w2"], V["vecs"], V["mlp_b1"],
              ids, T["tok_emb"], T["pos"], T["ln_f"], T["proj"],
              T["attn_w"], T["mlp_w1"], T["mlp_w2"], T["vecs"], T["mlp_b1"],
              eot_flat, params["logit_scale"]]

    vmem = pl.BlockSpec(memory_space=pltpu.MemorySpace.VMEM)
    smem = pl.BlockSpec(memory_space=pltpu.MemorySpace.SMEM)
    logits_per_image = pl.pallas_call(
        functools.partial(_clip_kernel, batch=B),
        out_shape=jax.ShapeDtypeStruct((B, B), jnp.float32),
        in_specs=[vmem] * 22 + [smem, smem],
        out_specs=pl.BlockSpec(memory_space=pltpu.MemorySpace.VMEM),
    )(*inputs)
    # logits_per_text == logits_per_image.T exactly; transpose in JAX.
    return logits_per_image, logits_per_image.T


# ----------------------------- parameter init --------------------------------
def _init(key, shape, scale=0.02):
    return scale * jax.random.normal(key, shape, dtype=jnp.float32)


def _init_block_stack(key, width, n_blocks):
    """Per-block params packed into a few stacked arrays (kernel-friendly layout)."""
    ks = jax.random.split(key, 6 * n_blocks)
    attn_w, mlp_w1, mlp_w2 = [], [], []
    for i in range(n_blocks):
        k_q, k_k, k_v, k_o, k_1, k_2 = ks[6 * i:6 * i + 6]
        attn_w += [_init(k_q, (width, width)), _init(k_k, (width, width)),
                   _init(k_v, (width, width)), _init(k_o, (width, width))]
        mlp_w1.append(_init(k_1, (width, 4 * width)))
        mlp_w2.append(_init(k_2, (4 * width, width)))
    # rows: ln1_g, ln1_b, b_q, b_k, b_v, b_out, ln2_g, ln2_b, mlp_b2
    vecs = jnp.zeros((n_blocks, 9, width), jnp.float32)
    vecs = vecs.at[:, 0, :].set(1.0).at[:, 6, :].set(1.0)
    return dict(
        attn_w=jnp.stack(attn_w, axis=0),                       # (4*n_blocks, W, W)
        mlp_w1=jnp.stack(mlp_w1, axis=0),                       # (n_blocks, W, 4W)
        mlp_w2=jnp.stack(mlp_w2, axis=0),                       # (n_blocks, 4W, W)
        vecs=vecs,                                              # (n_blocks, 9, W)
        mlp_b1=jnp.zeros((n_blocks, 1, 4 * width), jnp.float32),
    )


def _ln_pair(width):
    return jnp.stack([jnp.ones((width,), jnp.float32),
                      jnp.zeros((width,), jnp.float32)], axis=0)   # (2, W): [gamma; beta]


def init_params(key):
    kv, kt = jax.random.split(key)
    gh = IMAGE_SIZE // PATCH_SIZE
    s_img = gh * gh + 1
    kvs = jax.random.split(kv, 5)
    vision = dict(
        conv_w=_init(kvs[0], (CHANNELS * PATCH_SIZE * PATCH_SIZE, VISION_WIDTH)),
        cls=_init(kvs[1], (1, VISION_WIDTH)),
        pos=_init(kvs[2], (s_img, VISION_WIDTH)),
        ln_pre=_ln_pair(VISION_WIDTH),
        ln_post=_ln_pair(VISION_WIDTH),
        proj=_init(kvs[3], (VISION_WIDTH, EMB_DIM)),
        **_init_block_stack(kvs[4], VISION_WIDTH, VISION_BLOCKS),
    )
    kts = jax.random.split(kt, 4)
    text = dict(
        tok_emb=_init(kts[0], (VOCAB_SIZE, TEXT_WIDTH)),
        pos=_init(kts[1], (MAX_LENGTH, TEXT_WIDTH)),
        ln_f=_ln_pair(TEXT_WIDTH),
        proj=_init(kts[2], (TEXT_WIDTH, EMB_DIM)),
        **_init_block_stack(kts[3], TEXT_WIDTH, TEXT_BLOCKS),
    )
    logit_scale = jnp.array([math.log(1.0 / INIT_TEMP)], dtype=jnp.float32)
    return dict(vision=vision, text=text, logit_scale=logit_scale)


# --------------------------------- main ---------------------------------------
if __name__ == "__main__":
    key = jax.random.PRNGKey(0)
    kp, ki, kt = jax.random.split(key, 3)

    params = init_params(kp)

    image = jax.random.normal(ki, (BATCH, CHANNELS, IMAGE_SIZE, IMAGE_SIZE),
                              dtype=jnp.float32)
    text = jax.random.randint(kt, (BATCH, MAX_LENGTH), 1, VOCAB_SIZE - 1,
                              dtype=jnp.int32)
    # place an "EOT" (highest id) token at the last position so argmax picks it
    text = text.at[:, -1].set(VOCAB_SIZE - 1)

    logits_per_image, logits_per_text = jax.jit(clip_forward)(params, image, text)
    jax.block_until_ready((logits_per_image, logits_per_text))

    assert logits_per_image.shape == (BATCH, BATCH)
    assert logits_per_text.shape == (BATCH, BATCH)
    assert jnp.allclose(logits_per_image, logits_per_text.T, atol=1e-5)
    assert bool(jnp.all(jnp.isfinite(logits_per_image)))

    print("KERNEL_OK")
</pallas_src>

<mosaic_0001>
module attributes {stable_mosaic.version = 11 : i64} {
  func.func @_clip_kernel(%arg0: memref<8x192xf32, #tpu.memory_space<vmem>>, %arg1: memref<192x32xf32, #tpu.memory_space<vmem>>, %arg2: memref<1x32xf32, #tpu.memory_space<vmem>>, %arg3: memref<5x32xf32, #tpu.memory_space<vmem>>, %arg4: memref<2x32xf32, #tpu.memory_space<vmem>>, %arg5: memref<2x32xf32, #tpu.memory_space<vmem>>, %arg6: memref<32x16xf32, #tpu.memory_space<vmem>>, %arg7: memref<8x32x32xf32, #tpu.memory_space<vmem>>, %arg8: memref<2x32x128xf32, #tpu.memory_space<vmem>>, %arg9: memref<2x128x32xf32, #tpu.memory_space<vmem>>, %arg10: memref<2x9x32xf32, #tpu.memory_space<vmem>>, %arg11: memref<2x1x128xf32, #tpu.memory_space<vmem>>, %arg12: memref<16x1xi32, #tpu.memory_space<vmem>>, %arg13: memref<64x32xf32, #tpu.memory_space<vmem>>, %arg14: memref<8x32xf32, #tpu.memory_space<vmem>>, %arg15: memref<2x32xf32, #tpu.memory_space<vmem>>, %arg16: memref<32x16xf32, #tpu.memory_space<vmem>>, %arg17: memref<8x32x32xf32, #tpu.memory_space<vmem>>, %arg18: memref<2x32x128xf32, #tpu.memory_space<vmem>>, %arg19: memref<2x128x32xf32, #tpu.memory_space<vmem>>, %arg20: memref<2x9x32xf32, #tpu.memory_space<vmem>>, %arg21: memref<2x1x128xf32, #tpu.memory_space<vmem>>, %arg22: memref<2xi32, #tpu.memory_space<smem>>, %arg23: memref<1xf32, #tpu.memory_space<smem>>, %arg24: memref<2x2xf32, #tpu.memory_space<vmem>>) attributes {dimension_semantics = [], scalar_prefetch = 0 : i64, scratch_operands = 0 : i64, tpu.core_type = #tpu.core_type<tc>} {
    %c0 = arith.constant 0 : index
    %c0_0 = arith.constant 0 : index
    %0 = vector.load %arg3[%c0, %c0_0] : memref<5x32xf32, #tpu.memory_space<vmem>>, vector<5x32xf32>
    %c0_1 = arith.constant 0 : index
    %c0_2 = arith.constant 0 : index
    %1 = vector.load %arg0[%c0_1, %c0_2] : memref<8x192xf32, #tpu.memory_space<vmem>>, vector<8x192xf32>
    %c0_3 = arith.constant 0 : index
    %c0_4 = arith.constant 0 : index
    %2 = vector.load %arg1[%c0_3, %c0_4] : memref<192x32xf32, #tpu.memory_space<vmem>>, vector<192x32xf32>
    %cst = arith.constant dense<0.000000e+00> : vector<8x32xf32>
    %3 = tpu.matmul %1, %2, %cst {dimension_numbers = #tpu.dot_dimension_numbers<[1], [0], [0], [1], [0, 0, 1, 1], [], []>} : vector<8x192xf32>, vector<192x32xf32>, vector<8x32xf32> -> vector<8x32xf32>
    %4 = tpu.iota {dimensions = array<i32: 0>} : vector<16x8xi32>
    %5 = tpu.iota {dimensions = array<i32: 1>} : vector<16x8xi32>
    %c1_i32 = arith.constant 1 : i32
    %6 = vector.broadcast %c1_i32 : i32 to vector<16x8xi32>
    %7 = arith.cmpi sge, %4, %6 : vector<16x8xi32>
    %c5_i32 = arith.constant 5 : i32
    %8 = vector.broadcast %c5_i32 : i32 to vector<16x8xi32>
    %9 = arith.cmpi slt, %4, %8 : vector<16x8xi32>
    %10 = arith.andi %7, %9 : vector<16x8xi1>
    %c1_i32_5 = arith.constant 1 : i32
    %11 = vector.broadcast %c1_i32_5 : i32 to vector<16x8xi32>
    %12 = arith.subi %4, %11 : vector<16x8xi32>
    %13 = arith.cmpi eq, %5, %12 : vector<16x8xi32>
    %14 = arith.andi %10, %13 : vector<16x8xi1>
    %c9_i32 = arith.constant 9 : i32
    %15 = vector.broadcast %c9_i32 : i32 to vector<16x8xi32>
    %16 = arith.cmpi sge, %4, %15 : vector<16x8xi32>
    %c13_i32 = arith.constant 13 : i32
    %17 = vector.broadcast %c13_i32 : i32 to vector<16x8xi32>
    %18 = arith.cmpi slt, %4, %17 : vector<16x8xi32>
    %19 = arith.andi %16, %18 : vector<16x8xi1>
    %c5_i32_6 = arith.constant 5 : i32
    %20 = vector.broadcast %c5_i32_6 : i32 to vector<16x8xi32>
    %21 = arith.subi %4, %20 : vector<16x8xi32>
    %22 = arith.cmpi eq, %5, %21 : vector<16x8xi32>
    %23 = arith.andi %19, %22 : vector<16x8xi1>
    %24 = arith.ori %14, %23 : vector<16x8xi1>
    %cst_7 = arith.constant 1.000000e+00 : f32
    %cst_8 = arith.constant 0.000000e+00 : f32
    %25 = vector.broadcast %cst_7 : f32 to vector<16x8xf32>
    %26 = vector.broadcast %cst_8 : f32 to vector<16x8xf32>
    %27 = arith.select %24, %25, %26 : vector<16x8xi1>, vector<16x8xf32>
    %cst_9 = arith.constant dense<0.000000e+00> : vector<16x32xf32>
    %28 = tpu.matmul %27, %3, %cst_9 {dimension_numbers = #tpu.dot_dimension_numbers<[1], [0], [0], [1], [0, 0, 1, 1], [], []>} : vector<16x8xf32>, vector<8x32xf32>, vector<16x32xf32> -> vector<16x32xf32>
    %29 = tpu.iota {dimensions = array<i32: 0>} : vector<16x1xi32>
    %c0_i32 = arith.constant 0 : i32
    %30 = vector.broadcast %c0_i32 : i32 to vector<16x1xi32>
    %31 = arith.cmpi eq, %29, %30 : vector<16x1xi32>
    %c8_i32 = arith.constant 8 : i32
    %32 = vector.broadcast %c8_i32 : i32 to vector<16x1xi32>
    %33 = arith.cmpi eq, %29, %32 : vector<16x1xi32>
    %34 = arith.ori %31, %33 : vector<16x1xi1>
    %cst_10 = arith.constant 1.000000e+00 : f32
    %cst_11 = arith.constant 0.000000e+00 : f32
    %35 = vector.broadcast %cst_10 : f32 to vector<16x1xf32>
    %36 = vector.broadcast %cst_11 : f32 to vector<16x1xf32>
    %37 = arith.select %34, %35, %36 : vector<16x1xi1>, vector<16x1xf32>
    %c0_12 = arith.constant 0 : index
    %c0_13 = arith.constant 0 : index
    %38 = vector.load %arg2[%c0_12, %c0_13] : memref<1x32xf32, #tpu.memory_space<vmem>>, vector<1x32xf32>
    %39 = vector.broadcast %37 : vector<16x1xf32> to vector<16x32xf32>
    %40 = vector.broadcast %38 : vector<1x32xf32> to vector<16x32xf32>
    %41 = arith.mulf %39, %40 : vector<16x32xf32>
    %42 = tpu.iota {dimensions = array<i32: 0>} : vector<16x5xi32>
    %43 = tpu.iota {dimensions = array<i32: 1>} : vector<16x5xi32>
    %c0_i32_14 = arith.constant 0 : i32
    %44 = vector.broadcast %c0_i32_14 : i32 to vector<16x5xi32>
    %45 = arith.cmpi sge, %42, %44 : vector<16x5xi32>
    %c5_i32_15 = arith.constant 5 : i32
    %46 = vector.broadcast %c5_i32_15 : i32 to vector<16x5xi32>
    %47 = arith.cmpi slt, %42, %46 : vector<16x5xi32>
    %48 = arith.andi %45, %47 : vector<16x5xi1>
    %c0_i32_16 = arith.constant 0 : i32
    %49 = vector.broadcast %c0_i32_16 : i32 to vector<16x5xi32>
    %50 = arith.subi %42, %49 : vector<16x5xi32>
    %51 = arith.cmpi eq, %43, %50 : vector<16x5xi32>
    %52 = arith.andi %48, %51 : vector<16x5xi1>
    %c8_i32_17 = arith.constant 8 : i32
    %53 = vector.broadcast %c8_i32_17 : i32 to vector<16x5xi32>
    %54 = arith.cmpi sge, %42, %53 : vector<16x5xi32>
    %c13_i32_18 = arith.constant 13 : i32
    %55 = vector.broadcast %c13_i32_18 : i32 to vector<16x5xi32>
    %56 = arith.cmpi slt, %42, %55 : vector<16x5xi32>
    %57 = arith.andi %54, %56 : vector<16x5xi1>
    %c8_i32_19 = arith.constant 8 : i32
    %58 = vector.broadcast %c8_i32_19 : i32 to vector<16x5xi32>
    %59 = arith.subi %42, %58 : vector<16x5xi32>
    %60 = arith.cmpi eq, %43, %59 : vector<16x5xi32>
    %61 = arith.andi %57, %60 : vector<16x5xi1>
    %62 = arith.ori %52, %61 : vector<16x5xi1>
    %cst_20 = arith.constant 1.000000e+00 : f32
    %cst_21 = arith.constant 0.000000e+00 : f32
    %63 = vector.broadcast %cst_20 : f32 to vector<16x5xf32>
    %64 = vector.broadcast %cst_21 : f32 to vector<16x5xf32>
    %65 = arith.select %62, %63, %64 : vector<16x5xi1>, vector<16x5xf32>
    %cst_22 = arith.constant dense<0.000000e+00> : vector<16x32xf32>
    %66 = tpu.matmul %65, %0, %cst_22 {dimension_numbers = #tpu.dot_dimension_numbers<[1], [0], [0], [1], [0, 0, 1, 1], [], []>} : vector<16x5xf32>, vector<5x32xf32>, vector<16x32xf32> -> vector<16x32xf32>
    %67 = arith.addf %41, %28 : vector<16x32xf32>
    %68 = arith.addf %67, %66 : vector<16x32xf32>
    %c0_23 = arith.constant 0 : index
    %c0_24 = arith.constant 0 : index
    %69 = vector.load %arg4[%c0_23, %c0_24] : memref<2x32xf32, #tpu.memory_space<vmem>>, vector<2x32xf32>
    %70 = vector.extract_strided_slice %69 {offsets = [0, 0], sizes = [1, 32], strides = [1, 1]} : vector<2x32xf32> to vector<1x32xf32>
    %71 = vector.extract_strided_slice %69 {offsets = [1, 0], sizes = [1, 32], strides = [1, 1]} : vector<2x32xf32> to vector<1x32xf32>
    %cst_25 = arith.constant dense<0.000000e+00> : vector<16xf32>
    %72 = vector.multi_reduction <add>, %68, %cst_25 [1] : vector<16x32xf32> to vector<16xf32>
    %73 = vector.shape_cast %72 : vector<16xf32> to vector<16x1xf32>
    %cst_26 = arith.constant 3.200000e+01 : f32
    %74 = vector.broadcast %cst_26 : f32 to vector<16x1xf32>
    %75 = arith.divf %73, %74 : vector<16x1xf32>
    %76 = vector.broadcast %75 : vector<16x1xf32> to vector<16x32xf32>
    %77 = arith.subf %68, %76 : vector<16x32xf32>
    %78 = arith.mulf %77, %77 : vector<16x32xf32>
    %cst_27 = arith.constant dense<0.000000e+00> : vector<16xf32>
    %79 = vector.multi_reduction <add>, %78, %cst_27 [1] : vector<16x32xf32> to vector<16xf32>
    %80 = vector.shape_cast %79 : vector<16xf32> to vector<16x1xf32>
    %cst_28 = arith.constant 3.200000e+01 : f32
    %81 = vector.broadcast %cst_28 : f32 to vector<16x1xf32>
    %82 = arith.divf %80, %81 : vector<16x1xf32>
    %cst_29 = arith.constant 9.99999974E-6 : f32
    %83 = vector.broadcast %cst_29 : f32 to vector<16x1xf32>
    %84 = arith.addf %82, %83 : vector<16x1xf32>
    %85 = math.rsqrt %84 : vector<16x1xf32>
    %86 = vector.broadcast %85 : vector<16x1xf32> to vector<16x32xf32>
    %87 = arith.mulf %77, %86 : vector<16x32xf32>
    %88 = vector.broadcast %70 : vector<1x32xf32> to vector<16x32xf32>
    %89 = arith.mulf %87, %88 : vector<16x32xf32>
    %90 = vector.broadcast %71 : vector<1x32xf32> to vector<16x32xf32>
    %91 = arith.addf %89, %90 : vector<16x32xf32>
    %92 = tpu.iota {dimensions = array<i32: 0>} : vector<16x16xi32>
    %93 = tpu.iota {dimensions = array<i32: 1>} : vector<16x16xi32>
    %c0_i32_30 = arith.constant 0 : i32
    %94 = vector.broadcast %c0_i32_30 : i32 to vector<16x16xi32>
    %95 = arith.cmpi sge, %92, %94 : vector<16x16xi32>
    %c8_i32_31 = arith.constant 8 : i32
    %96 = vector.broadcast %c8_i32_31 : i32 to vector<16x16xi32>
    %97 = arith.cmpi slt, %92, %96 : vector<16x16xi32>
    %98 = arith.andi %95, %97 : vector<16x16xi1>
    %c0_i32_32 = arith.constant 0 : i32
    %99 = vector.broadcast %c0_i32_32 : i32 to vector<16x16xi32>
    %100 = arith.cmpi sge, %93, %99 : vector<16x16xi32>
    %c5_i32_33 = arith.constant 5 : i32
    %101 = vector.broadcast %c5_i32_33 : i32 to vector<16x16xi32>
    %102 = arith.cmpi slt, %93, %101 : vector<16x16xi32>
    %103 = arith.andi %100, %102 : vector<16x16xi1>
    %104 = arith.andi %98, %103 : vector<16x16xi1>
    %c8_i32_34 = arith.constant 8 : i32
    %105 = vector.broadcast %c8_i32_34 : i32 to vector<16x16xi32>
    %106 = arith.cmpi sge, %92, %105 : vector<16x16xi32>
    %c16_i32 = arith.constant 16 : i32
    %107 = vector.broadcast %c16_i32 : i32 to vector<16x16xi32>
    %108 = arith.cmpi slt, %92, %107 : vector<16x16xi32>
    %109 = arith.andi %106, %108 : vector<16x16xi1>
    %c8_i32_35 = arith.constant 8 : i32
    %110 = vector.broadcast %c8_i32_35 : i32 to vector<16x16xi32>
    %111 = arith.cmpi sge, %93, %110 : vector<16x16xi32>
    %c13_i32_36 = arith.constant 13 : i32
    %112 = vector.broadcast %c13_i32_36 : i32 to vector<16x16xi32>
    %113 = arith.cmpi slt, %93, %112 : vector<16x16xi32>
    %114 = arith.andi %111, %113 : vector<16x16xi1>
    %115 = arith.andi %109, %114 : vector<16x16xi1>
    %116 = arith.ori %104, %115 : vector<16x16xi1>
    %c0_37 = arith.constant 0 : index
    %c0_38 = arith.constant 0 : index
    %c0_39 = arith.constant 0 : index
    %117 = vector.load %arg10[%c0_37, %c0_38, %c0_39] : memref<2x9x32xf32, #tpu.memory_space<vmem>>, vector<1x9x32xf32>
    %118 = vector.shape_cast %117 : vector<1x9x32xf32> to vector<9x32xf32>
    %119 = vector.extract_strided_slice %118 {offsets = [0, 0], sizes = [1, 32], strides = [1, 1]} : vector<9x32xf32> to vector<1x32xf32>
    %120 = vector.extract_strided_slice %118 {offsets = [1, 0], sizes = [1, 32], strides = [1, 1]} : vector<9x32xf32> to vector<1x32xf32>
    %121 = vector.extract_strided_slice %118 {offsets = [2, 0], sizes = [1, 32], strides = [1, 1]} : vector<9x32xf32> to vector<1x32xf32>
    %122 = vector.extract_strided_slice %118 {offsets = [3, 0], sizes = [1, 32], strides = [1, 1]} : vector<9x32xf32> to vector<1x32xf32>
    %123 = vector.extract_strided_slice %118 {offsets = [4, 0], sizes = [1, 32], strides = [1, 1]} : vector<9x32xf32> to vector<1x32xf32>
    %124 = vector.extract_strided_slice %118 {offsets = [5, 0], sizes = [1, 32], strides = [1, 1]} : vector<9x32xf32> to vector<1x32xf32>
    %125 = vector.extract_strided_slice %118 {offsets = [6, 0], sizes = [1, 32], strides = [1, 1]} : vector<9x32xf32> to vector<1x32xf32>
    %126 = vector.extract_strided_slice %118 {offsets = [7, 0], sizes = [1, 32], strides = [1, 1]} : vector<9x32xf32> to vector<1x32xf32>
    %127 = vector.extract_strided_slice %118 {offsets = [8, 0], sizes = [1, 32], strides = [1, 1]} : vector<9x32xf32> to vector<1x32xf32>
    %c0_40 = arith.constant 0 : index
    %c0_41 = arith.constant 0 : index
    %c0_42 = arith.constant 0 : index
    %128 = vector.load %arg11[%c0_40, %c0_41, %c0_42] : memref<2x1x128xf32, #tpu.memory_space<vmem>>, vector<1x1x128xf32>
    %129 = vector.shape_cast %128 : vector<1x1x128xf32> to vector<1x128xf32>
    %cst_43 = arith.constant dense<0.000000e+00> : vector<16xf32>
    %130 = vector.multi_reduction <add>, %91, %cst_43 [1] : vector<16x32xf32> to vector<16xf32>
    %131 = vector.shape_cast %130 : vector<16xf32> to vector<16x1xf32>
    %cst_44 = arith.constant 3.200000e+01 : f32
    %132 = vector.broadcast %cst_44 : f32 to vector<16x1xf32>
    %133 = arith.divf %131, %132 : vector<16x1xf32>
    %134 = vector.broadcast %133 : vector<16x1xf32> to vector<16x32xf32>
    %135 = arith.subf %91, %134 : vector<16x32xf32>
    %136 = arith.mulf %135, %135 : vector<16x32xf32>
    %cst_45 = arith.constant dense<0.000000e+00> : vector<16xf32>
    %137 = vector.multi_reduction <add>, %136, %cst_45 [1] : vector<16x32xf32> to vector<16xf32>
    %138 = vector.shape_cast %137 : vector<16xf32> to vector<16x1xf32>
    %cst_46 = arith.constant 3.200000e+01 : f32
    %139 = vector.broadcast %cst_46 : f32 to vector<16x1xf32>
    %140 = arith.divf %138, %139 : vector<16x1xf32>
    %cst_47 = arith.constant 9.99999974E-6 : f32
    %141 = vector.broadcast %cst_47 : f32 to vector<16x1xf32>
    %142 = arith.addf %140, %141 : vector<16x1xf32>
    %143 = math.rsqrt %142 : vector<16x1xf32>
    %144 = vector.broadcast %143 : vector<16x1xf32> to vector<16x32xf32>
    %145 = arith.mulf %135, %144 : vector<16x32xf32>
    %146 = vector.broadcast %119 : vector<1x32xf32> to vector<16x32xf32>
    %147 = arith.mulf %145, %146 : vector<16x32xf32>
    %148 = vector.broadcast %120 : vector<1x32xf32> to vector<16x32xf32>
    %149 = arith.addf %147, %148 : vector<16x32xf32>
    %c0_48 = arith.constant 0 : index
    %c0_49 = arith.constant 0 : index
    %c0_50 = arith.constant 0 : index
    %150 = vector.load %arg7[%c0_48, %c0_49, %c0_50] : memref<8x32x32xf32, #tpu.memory_space<vmem>>, vector<1x32x32xf32>
    %151 = vector.shape_cast %150 : vector<1x32x32xf32> to vector<32x32xf32>
    %cst_51 = arith.constant dense<0.000000e+00> : vector<16x32xf32>
    %152 = tpu.matmul %149, %151, %cst_51 {dimension_numbers = #tpu.dot_dimension_numbers<[1], [0], [0], [1], [0, 0, 1, 1], [], []>} : vector<16x32xf32>, vector<32x32xf32>, vector<16x32xf32> -> vector<16x32xf32>
    %153 = vector.broadcast %121 : vector<1x32xf32> to vector<16x32xf32>
    %154 = arith.addf %152, %153 : vector<16x32xf32>
    %c1 = arith.constant 1 : index
    %c0_52 = arith.constant 0 : index
    %c0_53 = arith.constant 0 : index
    %155 = vector.load %arg7[%c1, %c0_52, %c0_53] : memref<8x32x32xf32, #tpu.memory_space<vmem>>, vector<1x32x32xf32>
    %156 = vector.shape_cast %155 : vector<1x32x32xf32> to vector<32x32xf32>
    %cst_54 = arith.constant dense<0.000000e+00> : vector<16x32xf32>
    %157 = tpu.matmul %149, %156, %cst_54 {dimension_numbers = #tpu.dot_dimension_numbers<[1], [0], [0], [1], [0, 0, 1, 1], [], []>} : vector<16x32xf32>, vector<32x32xf32>, vector<16x32xf32> -> vector<16x32xf32>
    %158 = vector.broadcast %122 : vector<1x32xf32> to vector<16x32xf32>
    %159 = arith.addf %157, %158 : vector<16x32xf32>
    %c2 = arith.constant 2 : index
    %c0_55 = arith.constant 0 : index
    %c0_56 = arith.constant 0 : index
    %160 = vector.load %arg7[%c2, %c0_55, %c0_56] : memref<8x32x32xf32, #tpu.memory_space<vmem>>, vector<1x32x32xf32>
    %161 = vector.shape_cast %160 : vector<1x32x32xf32> to vector<32x32xf32>
    %cst_57 = arith.constant dense<0.000000e+00> : vector<16x32xf32>
    %162 = tpu.matmul %149, %161, %cst_57 {dimension_numbers = #tpu.dot_dimension_numbers<[1], [0], [0], [1], [0, 0, 1, 1], [], []>} : vector<16x32xf32>, vector<32x32xf32>, vector<16x32xf32> -> vector<16x32xf32>
    %163 = vector.broadcast %123 : vector<1x32xf32> to vector<16x32xf32>
    %164 = arith.addf %162, %163 : vector<16x32xf32>
    %165 = tpu.transpose %159, [1, 0] : vector<16x32xf32> -> vector<32x16xf32>
    %166 = vector.extract_strided_slice %154 {offsets = [0, 0], sizes = [16, 8], strides = [1, 1]} : vector<16x32xf32> to vector<16x8xf32>
    %167 = vector.extract_strided_slice %165 {offsets = [0, 0], sizes = [8, 16], strides = [1, 1]} : vector<32x16xf32> to vector<8x16xf32>
    %cst_58 = arith.constant dense<0.000000e+00> : vector<16x16xf32>
    %168 = tpu.matmul %166, %167, %cst_58 {dimension_numbers = #tpu.dot_dimension_numbers<[1], [0], [0], [1], [0, 0, 1, 1], [], []>} : vector<16x8xf32>, vector<8x16xf32>, vector<16x16xf32> -> vector<16x16xf32>
    %cst_59 = arith.constant 0.353553385 : f32
    %169 = vector.broadcast %cst_59 : f32 to vector<16x16xf32>
    %170 = arith.mulf %168, %169 : vector<16x16xf32>
    %cst_60 = arith.constant -1.000000e+30 : f32
    %171 = vector.broadcast %cst_60 : f32 to vector<16x16xf32>
    %172 = arith.select %116, %170, %171 : vector<16x16xi1>, vector<16x16xf32>
    %cst_61 = arith.constant dense<0xFF800000> : vector<16xf32>
    %173 = vector.multi_reduction <maximumf>, %172, %cst_61 [1] : vector<16x16xf32> to vector<16xf32>
    %174 = vector.shape_cast %173 : vector<16xf32> to vector<16x1xf32>
    %175 = vector.broadcast %174 : vector<16x1xf32> to vector<16x16xf32>
    %176 = arith.subf %172, %175 : vector<16x16xf32>
    %177 = math.exp %176 : vector<16x16xf32>
    %cst_62 = arith.constant dense<0.000000e+00> : vector<16xf32>
    %178 = vector.multi_reduction <add>, %177, %cst_62 [1] : vector<16x16xf32> to vector<16xf32>
    %179 = vector.shape_cast %178 : vector<16xf32> to vector<16x1xf32>
    %180 = tpu.reciprocal %179 {approx = true} : vector<16x1xf32> -> vector<16x1xf32>
    %181 = vector.broadcast %180 : vector<16x1xf32> to vector<16x16xf32>
    %182 = arith.mulf %177, %181 : vector<16x16xf32>
    %183 = vector.extract_strided_slice %164 {offsets = [0, 0], sizes = [16, 8], strides = [1, 1]} : vector<16x32xf32> to vector<16x8xf32>
    %cst_63 = arith.constant dense<0.000000e+00> : vector<16x8xf32>
    %184 = tpu.matmul %182, %183, %cst_63 {dimension_numbers = #tpu.dot_dimension_numbers<[1], [0], [0], [1], [0, 0, 1, 1], [], []>} : vector<16x16xf32>, vector<16x8xf32>, vector<16x8xf32> -> vector<16x8xf32>
    %185 = vector.extract_strided_slice %154 {offsets = [0, 8], sizes = [16, 8], strides = [1, 1]} : vector<16x32xf32> to vector<16x8xf32>
    %186 = vector.extract_strided_slice %165 {offsets = [8, 0], sizes = [8, 16], strides = [1, 1]} : vector<32x16xf32> to vector<8x16xf32>
    %cst_64 = arith.constant dense<0.000000e+00> : vector<16x16xf32>
    %187 = tpu.matmul %185, %186, %cst_64 {dimension_numbers = #tpu.dot_dimension_numbers<[1], [0], [0], [1], [0, 0, 1, 1], [], []>} : vector<16x8xf32>, vector<8x16xf32>, vector<16x16xf32> -> vector<16x16xf32>
    %cst_65 = arith.constant 0.353553385 : f32
    %188 = vector.broadcast %cst_65 : f32 to vector<16x16xf32>
    %189 = arith.mulf %187, %188 : vector<16x16xf32>
    %cst_66 = arith.constant -1.000000e+30 : f32
    %190 = vector.broadcast %cst_66 : f32 to vector<16x16xf32>
    %191 = arith.select %116, %189, %190 : vector<16x16xi1>, vector<16x16xf32>
    %cst_67 = arith.constant dense<0xFF800000> : vector<16xf32>
    %192 = vector.multi_reduction <maximumf>, %191, %cst_67 [1] : vector<16x16xf32> to vector<16xf32>
    %193 = vector.shape_cast %192 : vector<16xf32> to vector<16x1xf32>
    %194 = vector.broadcast %193 : vector<16x1xf32> to vector<16x16xf32>
    %195 = arith.subf %191, %194 : vector<16x16xf32>
    %196 = math.exp %195 : vector<16x16xf32>
    %cst_68 = arith.constant dense<0.000000e+00> : vector<16xf32>
    %197 = vector.multi_reduction <add>, %196, %cst_68 [1] : vector<16x16xf32> to vector<16xf32>
    %198 = vector.shape_cast %197 : vector<16xf32> to vector<16x1xf32>
    %199 = tpu.reciprocal %198 {approx = true} : vector<16x1xf32> -> vector<16x1xf32>
    %200 = vector.broadcast %199 : vector<16x1xf32> to vector<16x16xf32>
    %201 = arith.mulf %196, %200 : vector<16x16xf32>
    %202 = vector.extract_strided_slice %164 {offsets = [0, 8], sizes = [16, 8], strides = [1, 1]} : vector<16x32xf32> to vector<16x8xf32>
    %cst_69 = arith.constant dense<0.000000e+00> : vector<16x8xf32>
    %203 = tpu.matmul %201, %202, %cst_69 {dimension_numbers = #tpu.dot_dimension_numbers<[1], [0], [0], [1], [0, 0, 1, 1], [], []>} : vector<16x16xf32>, vector<16x8xf32>, vector<16x8xf32> -> vector<16x8xf32>
    %204 = vector.extract_strided_slice %154 {offsets = [0, 16], sizes = [16, 8], strides = [1, 1]} : vector<16x32xf32> to vector<16x8xf32>
    %205 = vector.extract_strided_slice %165 {offsets = [16, 0], sizes = [8, 16], strides = [1, 1]} : vector<32x16xf32> to vector<8x16xf32>
    %cst_70 = arith.constant dense<0.000000e+00> : vector<16x16xf32>
    %206 = tpu.matmul %204, %205, %cst_70 {dimension_numbers = #tpu.dot_dimension_numbers<[1], [0], [0], [1], [0, 0, 1, 1], [], []>} : vector<16x8xf32>, vector<8x16xf32>, vector<16x16xf32> -> vector<16x16xf32>
    %cst_71 = arith.constant 0.353553385 : f32
    %207 = vector.broadcast %cst_71 : f32 to vector<16x16xf32>
    %208 = arith.mulf %206, %207 : vector<16x16xf32>
    %cst_72 = arith.constant -1.000000e+30 : f32
    %209 = vector.broadcast %cst_72 : f32 to vector<16x16xf32>
    %210 = arith.select %116, %208, %209 : vector<16x16xi1>, vector<16x16xf32>
    %cst_73 = arith.constant dense<0xFF800000> : vector<16xf32>
    %211 = vector.multi_reduction <maximumf>, %210, %cst_73 [1] : vector<16x16xf32> to vector<16xf32>
    %212 = vector.shape_cast %211 : vector<16xf32> to vector<16x1xf32>
    %213 = vector.broadcast %212 : vector<16x1xf32> to vector<16x16xf32>
    %214 = arith.subf %210, %213 : vector<16x16xf32>
    %215 = math.exp %214 : vector<16x16xf32>
    %cst_74 = arith.constant dense<0.000000e+00> : vector<16xf32>
    %216 = vector.multi_reduction <add>, %215, %cst_74 [1] : vector<16x16xf32> to vector<16xf32>
    %217 = vector.shape_cast %216 : vector<16xf32> to vector<16x1xf32>
    %218 = tpu.reciprocal %217 {approx = true} : vector<16x1xf32> -> vector<16x1xf32>
    %219 = vector.broadcast %218 : vector<16x1xf32> to vector<16x16xf32>
    %220 = arith.mulf %215, %219 : vector<16x16xf32>
    %221 = vector.extract_strided_slice %164 {offsets = [0, 16], sizes = [16, 8], strides = [1, 1]} : vector<16x32xf32> to vector<16x8xf32>
    %cst_75 = arith.constant dense<0.000000e+00> : vector<16x8xf32>
    %222 = tpu.matmul %220, %221, %cst_75 {dimension_numbers = #tpu.dot_dimension_numbers<[1], [0], [0], [1], [0, 0, 1, 1], [], []>} : vector<16x16xf32>, vector<16x8xf32>, vector<16x8xf32> -> vector<16x8xf32>
    %223 = vector.extract_strided_slice %154 {offsets = [0, 24], sizes = [16, 8], strides = [1, 1]} : vector<16x32xf32> to vector<16x8xf32>
    %224 = vector.extract_strided_slice %165 {offsets = [24, 0], sizes = [8, 16], strides = [1, 1]} : vector<32x16xf32> to vector<8x16xf32>
    %cst_76 = arith.constant dense<0.000000e+00> : vector<16x16xf32>
    %225 = tpu.matmul %223, %224, %cst_76 {dimension_numbers = #tpu.dot_dimension_numbers<[1], [0], [0], [1], [0, 0, 1, 1], [], []>} : vector<16x8xf32>, vector<8x16xf32>, vector<16x16xf32> -> vector<16x16xf32>
    %cst_77 = arith.constant 0.353553385 : f32
    %226 = vector.broadcast %cst_77 : f32 to vector<16x16xf32>
    %227 = arith.mulf %225, %226 : vector<16x16xf32>
    %cst_78 = arith.constant -1.000000e+30 : f32
    %228 = vector.broadcast %cst_78 : f32 to vector<16x16xf32>
    %229 = arith.select %116, %227, %228 : vector<16x16xi1>, vector<16x16xf32>
    %cst_79 = arith.constant dense<0xFF800000> : vector<16xf32>
    %230 = vector.multi_reduction <maximumf>, %229, %cst_79 [1] : vector<16x16xf32> to vector<16xf32>
    %231 = vector.shape_cast %230 : vector<16xf32> to vector<16x1xf32>
    %232 = vector.broadcast %231 : vector<16x1xf32> to vector<16x16xf32>
    %233 = arith.subf %229, %232 : vector<16x16xf32>
    %234 = math.exp %233 : vector<16x16xf32>
    %cst_80 = arith.constant dense<0.000000e+00> : vector<16xf32>
    %235 = vector.multi_reduction <add>, %234, %cst_80 [1] : vector<16x16xf32> to vector<16xf32>
    %236 = vector.shape_cast %235 : vector<16xf32> to vector<16x1xf32>
    %237 = tpu.reciprocal %236 {approx = true} : vector<16x1xf32> -> vector<16x1xf32>
    %238 = vector.broadcast %237 : vector<16x1xf32> to vector<16x16xf32>
    %239 = arith.mulf %234, %238 : vector<16x16xf32>
    %240 = vector.extract_strided_slice %164 {offsets = [0, 24], sizes = [16, 8], strides = [1, 1]} : vector<16x32xf32> to vector<16x8xf32>
    %cst_81 = arith.constant dense<0.000000e+00> : vector<16x8xf32>
    %241 = tpu.matmul %239, %240, %cst_81 {dimension_numbers = #tpu.dot_dimension_numbers<[1], [0], [0], [1], [0, 0, 1, 1], [], []>} : vector<16x16xf32>, vector<16x8xf32>, vector<16x8xf32> -> vector<16x8xf32>
    %242 = tpu.concatenate %184, %203, %222, %241 in 1 : vector<16x8xf32>, vector<16x8xf32>, vector<16x8xf32>, vector<16x8xf32> -> vector<16x32xf32>
    %c3 = arith.constant 3 : index
    %c0_82 = arith.constant 0 : index
    %c0_83 = arith.constant 0 : index
    %243 = vector.load %arg7[%c3, %c0_82, %c0_83] : memref<8x32x32xf32, #tpu.memory_space<vmem>>, vector<1x32x32xf32>
    %244 = vector.shape_cast %243 : vector<1x32x32xf32> to vector<32x32xf32>
    %cst_84 = arith.constant dense<0.000000e+00> : vector<16x32xf32>
    %245 = tpu.matmul %242, %244, %cst_84 {dimension_numbers = #tpu.dot_dimension_numbers<[1], [0], [0], [1], [0, 0, 1, 1], [], []>} : vector<16x32xf32>, vector<32x32xf32>, vector<16x32xf32> -> vector<16x32xf32>
    %246 = arith.addf %91, %245 : vector<16x32xf32>
    %247 = vector.broadcast %124 : vector<1x32xf32> to vector<16x32xf32>
    %248 = arith.addf %246, %247 : vector<16x32xf32>
    %cst_85 = arith.constant dense<0.000000e+00> : vector<16xf32>
    %249 = vector.multi_reduction <add>, %248, %cst_85 [1] : vector<16x32xf32> to vector<16xf32>
    %250 = vector.shape_cast %249 : vector<16xf32> to vector<16x1xf32>
    %cst_86 = arith.constant 3.200000e+01 : f32
    %251 = vector.broadcast %cst_86 : f32 to vector<16x1xf32>
    %252 = arith.divf %250, %251 : vector<16x1xf32>
    %253 = vector.broadcast %252 : vector<16x1xf32> to vector<16x32xf32>
    %254 = arith.subf %248, %253 : vector<16x32xf32>
    %255 = arith.mulf %254, %254 : vector<16x32xf32>
    %cst_87 = arith.constant dense<0.000000e+00> : vector<16xf32>
    %256 = vector.multi_reduction <add>, %255, %cst_87 [1] : vector<16x32xf32> to vector<16xf32>
    %257 = vector.shape_cast %256 : vector<16xf32> to vector<16x1xf32>
    %cst_88 = arith.constant 3.200000e+01 : f32
    %258 = vector.broadcast %cst_88 : f32 to vector<16x1xf32>
    %259 = arith.divf %257, %258 : vector<16x1xf32>
    %cst_89 = arith.constant 9.99999974E-6 : f32
    %260 = vector.broadcast %cst_89 : f32 to vector<16x1xf32>
    %261 = arith.addf %259, %260 : vector<16x1xf32>
    %262 = math.rsqrt %261 : vector<16x1xf32>
    %263 = vector.broadcast %262 : vector<16x1xf32> to vector<16x32xf32>
    %264 = arith.mulf %254, %263 : vector<16x32xf32>
    %265 = vector.broadcast %125 : vector<1x32xf32> to vector<16x32xf32>
    %266 = arith.mulf %264, %265 : vector<16x32xf32>
    %267 = vector.broadcast %126 : vector<1x32xf32> to vector<16x32xf32>
    %268 = arith.addf %266, %267 : vector<16x32xf32>
    %c0_90 = arith.constant 0 : index
    %c0_91 = arith.constant 0 : index
    %c0_92 = arith.constant 0 : index
    %269 = vector.load %arg8[%c0_90, %c0_91, %c0_92] : memref<2x32x128xf32, #tpu.memory_space<vmem>>, vector<1x32x128xf32>
    %270 = vector.shape_cast %269 : vector<1x32x128xf32> to vector<32x128xf32>
    %cst_93 = arith.constant dense<0.000000e+00> : vector<16x128xf32>
    %271 = tpu.matmul %268, %270, %cst_93 {dimension_numbers = #tpu.dot_dimension_numbers<[1], [0], [0], [1], [0, 0, 1, 1], [], []>} : vector<16x32xf32>, vector<32x128xf32>, vector<16x128xf32> -> vector<16x128xf32>
    %272 = vector.broadcast %129 : vector<1x128xf32> to vector<16x128xf32>
    %273 = arith.addf %271, %272 : vector<16x128xf32>
    %274 = arith.mulf %273, %273 : vector<16x128xf32>
    %275 = arith.mulf %273, %274 : vector<16x128xf32>
    %cst_94 = arith.constant 4.471500e-02 : f32
    %276 = vector.broadcast %cst_94 : f32 to vector<16x128xf32>
    %277 = arith.mulf %276, %275 : vector<16x128xf32>
    %278 = arith.addf %273, %277 : vector<16x128xf32>
    %cst_95 = arith.constant 0.797884583 : f32
    %279 = vector.broadcast %cst_95 : f32 to vector<16x128xf32>
    %280 = arith.mulf %279, %278 : vector<16x128xf32>
    %281 = math.tanh %280 : vector<16x128xf32>
    %cst_96 = arith.constant 1.000000e+00 : f32
    %282 = vector.broadcast %cst_96 : f32 to vector<16x128xf32>
    %283 = arith.addf %282, %281 : vector<16x128xf32>
    %cst_97 = arith.constant 5.000000e-01 : f32
    %284 = vector.broadcast %cst_97 : f32 to vector<16x128xf32>
    %285 = arith.mulf %284, %283 : vector<16x128xf32>
    %286 = arith.mulf %273, %285 : vector<16x128xf32>
    %c0_98 = arith.constant 0 : index
    %c0_99 = arith.constant 0 : index
    %c0_100 = arith.constant 0 : index
    %287 = vector.load %arg9[%c0_98, %c0_99, %c0_100] : memref<2x128x32xf32, #tpu.memory_space<vmem>>, vector<1x128x32xf32>
    %288 = vector.shape_cast %287 : vector<1x128x32xf32> to vector<128x32xf32>
    %cst_101 = arith.constant dense<0.000000e+00> : vector<16x32xf32>
    %289 = tpu.matmul %286, %288, %cst_101 {dimension_numbers = #tpu.dot_dimension_numbers<[1], [0], [0], [1], [0, 0, 1, 1], [], []>} : vector<16x128xf32>, vector<128x32xf32>, vector<16x32xf32> -> vector<16x32xf32>
    %290 = arith.addf %248, %289 : vector<16x32xf32>
    %291 = vector.broadcast %127 : vector<1x32xf32> to vector<16x32xf32>
    %292 = arith.addf %290, %291 : vector<16x32xf32>
    %c1_102 = arith.constant 1 : index
    %c0_103 = arith.constant 0 : index
    %c0_104 = arith.constant 0 : index
    %293 = vector.load %arg10[%c1_102, %c0_103, %c0_104] : memref<2x9x32xf32, #tpu.memory_space<vmem>>, vector<1x9x32xf32>
    %294 = vector.shape_cast %293 : vector<1x9x32xf32> to vector<9x32xf32>
    %295 = vector.extract_strided_slice %294 {offsets = [0, 0], sizes = [1, 32], strides = [1, 1]} : vector<9x32xf32> to vector<1x32xf32>
    %296 = vector.extract_strided_slice %294 {offsets = [1, 0], sizes = [1, 32], strides = [1, 1]} : vector<9x32xf32> to vector<1x32xf32>
    %297 = vector.extract_strided_slice %294 {offsets = [2, 0], sizes = [1, 32], strides = [1, 1]} : vector<9x32xf32> to vector<1x32xf32>
    %298 = vector.extract_strided_slice %294 {offsets = [3, 0], sizes = [1, 32], strides = [1, 1]} : vector<9x32xf32> to vector<1x32xf32>
    %299 = vector.extract_strided_slice %294 {offsets = [4, 0], sizes = [1, 32], strides = [1, 1]} : vector<9x32xf32> to vector<1x32xf32>
    %300 = vector.extract_strided_slice %294 {offsets = [5, 0], sizes = [1, 32], strides = [1, 1]} : vector<9x32xf32> to vector<1x32xf32>
    %301 = vector.extract_strided_slice %294 {offsets = [6, 0], sizes = [1, 32], strides = [1, 1]} : vector<9x32xf32> to vector<1x32xf32>
    %302 = vector.extract_strided_slice %294 {offsets = [7, 0], sizes = [1, 32], strides = [1, 1]} : vector<9x32xf32> to vector<1x32xf32>
    %303 = vector.extract_strided_slice %294 {offsets = [8, 0], sizes = [1, 32], strides = [1, 1]} : vector<9x32xf32> to vector<1x32xf32>
    %c1_105 = arith.constant 1 : index
    %c0_106 = arith.constant 0 : index
    %c0_107 = arith.constant 0 : index
    %304 = vector.load %arg11[%c1_105, %c0_106, %c0_107] : memref<2x1x128xf32, #tpu.memory_space<vmem>>, vector<1x1x128xf32>
    %305 = vector.shape_cast %304 : vector<1x1x128xf32> to vector<1x128xf32>
    %cst_108 = arith.constant dense<0.000000e+00> : vector<16xf32>
    %306 = vector.multi_reduction <add>, %292, %cst_108 [1] : vector<16x32xf32> to vector<16xf32>
    %307 = vector.shape_cast %306 : vector<16xf32> to vector<16x1xf32>
    %cst_109 = arith.constant 3.200000e+01 : f32
    %308 = vector.broadcast %cst_109 : f32 to vector<16x1xf32>
    %309 = arith.divf %307, %308 : vector<16x1xf32>
    %310 = vector.broadcast %309 : vector<16x1xf32> to vector<16x32xf32>
    %311 = arith.subf %292, %310 : vector<16x32xf32>
    %312 = arith.mulf %311, %311 : vector<16x32xf32>
    %cst_110 = arith.constant dense<0.000000e+00> : vector<16xf32>
    %313 = vector.multi_reduction <add>, %312, %cst_110 [1] : vector<16x32xf32> to vector<16xf32>
    %314 = vector.shape_cast %313 : vector<16xf32> to vector<16x1xf32>
    %cst_111 = arith.constant 3.200000e+01 : f32
    %315 = vector.broadcast %cst_111 : f32 to vector<16x1xf32>
    %316 = arith.divf %314, %315 : vector<16x1xf32>
    %cst_112 = arith.constant 9.99999974E-6 : f32
    %317 = vector.broadcast %cst_112 : f32 to vector<16x1xf32>
    %318 = arith.addf %316, %317 : vector<16x1xf32>
    %319 = math.rsqrt %318 : vector<16x1xf32>
    %320 = vector.broadcast %319 : vector<16x1xf32> to vector<16x32xf32>
    %321 = arith.mulf %311, %320 : vector<16x32xf32>
    %322 = vector.broadcast %295 : vector<1x32xf32> to vector<16x32xf32>
    %323 = arith.mulf %321, %322 : vector<16x32xf32>
    %324 = vector.broadcast %296 : vector<1x32xf32> to vector<16x32xf32>
    %325 = arith.addf %323, %324 : vector<16x32xf32>
    %c4 = arith.constant 4 : index
    %c0_113 = arith.constant 0 : index
    %c0_114 = arith.constant 0 : index
    %326 = vector.load %arg7[%c4, %c0_113, %c0_114] : memref<8x32x32xf32, #tpu.memory_space<vmem>>, vector<1x32x32xf32>
    %327 = vector.shape_cast %326 : vector<1x32x32xf32> to vector<32x32xf32>
    %cst_115 = arith.constant dense<0.000000e+00> : vector<16x32xf32>
    %328 = tpu.matmul %325, %327, %cst_115 {dimension_numbers = #tpu.dot_dimension_numbers<[1], [0], [0], [1], [0, 0, 1, 1], [], []>} : vector<16x32xf32>, vector<32x32xf32>, vector<16x32xf32> -> vector<16x32xf32>
    %329 = vector.broadcast %297 : vector<1x32xf32> to vector<16x32xf32>
    %330 = arith.addf %328, %329 : vector<16x32xf32>
    %c5 = arith.constant 5 : index
    %c0_116 = arith.constant 0 : index
    %c0_117 = arith.constant 0 : index
    %331 = vector.load %arg7[%c5, %c0_116, %c0_117] : memref<8x32x32xf32, #tpu.memory_space<vmem>>, vector<1x32x32xf32>
    %332 = vector.shape_cast %331 : vector<1x32x32xf32> to vector<32x32xf32>
    %cst_118 = arith.constant dense<0.000000e+00> : vector<16x32xf32>
    %333 = tpu.matmul %325, %332, %cst_118 {dimension_numbers = #tpu.dot_dimension_numbers<[1], [0], [0], [1], [0, 0, 1, 1], [], []>} : vector<16x32xf32>, vector<32x32xf32>, vector<16x32xf32> -> vector<16x32xf32>
    %334 = vector.broadcast %298 : vector<1x32xf32> to vector<16x32xf32>
    %335 = arith.addf %333, %334 : vector<16x32xf32>
    %c6 = arith.constant 6 : index
    %c0_119 = arith.constant 0 : index
    %c0_120 = arith.constant 0 : index
    %336 = vector.load %arg7[%c6, %c0_119, %c0_120] : memref<8x32x32xf32, #tpu.memory_space<vmem>>, vector<1x32x32xf32>
    %337 = vector.shape_cast %336 : vector<1x32x32xf32> to vector<32x32xf32>
    %cst_121 = arith.constant dense<0.000000e+00> : vector<16x32xf32>
    %338 = tpu.matmul %325, %337, %cst_121 {dimension_numbers = #tpu.dot_dimension_numbers<[1], [0], [0], [1], [0, 0, 1, 1], [], []>} : vector<16x32xf32>, vector<32x32xf32>, vector<16x32xf32> -> vector<16x32xf32>
    %339 = vector.broadcast %299 : vector<1x32xf32> to vector<16x32xf32>
    %340 = arith.addf %338, %339 : vector<16x32xf32>
    %341 = tpu.transpose %335, [1, 0] : vector<16x32xf32> -> vector<32x16xf32>
    %342 = vector.extract_strided_slice %330 {offsets = [0, 0], sizes = [16, 8], strides = [1, 1]} : vector<16x32xf32> to vector<16x8xf32>
    %343 = vector.extract_strided_slice %341 {offsets = [0, 0], sizes = [8, 16], strides = [1, 1]} : vector<32x16xf32> to vector<8x16xf32>
    %cst_122 = arith.constant dense<0.000000e+00> : vector<16x16xf32>
    %344 = tpu.matmul %342, %343, %cst_122 {dimension_numbers = #tpu.dot_dimension_numbers<[1], [0], [0], [1], [0, 0, 1, 1], [], []>} : vector<16x8xf32>, vector<8x16xf32>, vector<16x16xf32> -> vector<16x16xf32>
    %cst_123 = arith.constant 0.353553385 : f32
    %345 = vector.broadcast %cst_123 : f32 to vector<16x16xf32>
    %346 = arith.mulf %344, %345 : vector<16x16xf32>
    %cst_124 = arith.constant -1.000000e+30 : f32
    %347 = vector.broadcast %cst_124 : f32 to vector<16x16xf32>
    %348 = arith.select %116, %346, %347 : vector<16x16xi1>, vector<16x16xf32>
    %cst_125 = arith.constant dense<0xFF800000> : vector<16xf32>
    %349 = vector.multi_reduction <maximumf>, %348, %cst_125 [1] : vector<16x16xf32> to vector<16xf32>
    %350 = vector.shape_cast %349 : vector<16xf32> to vector<16x1xf32>
    %351 = vector.broadcast %350 : vector<16x1xf32> to vector<16x16xf32>
    %352 = arith.subf %348, %351 : vector<16x16xf32>
    %353 = math.exp %352 : vector<16x16xf32>
    %cst_126 = arith.constant dense<0.000000e+00> : vector<16xf32>
    %354 = vector.multi_reduction <add>, %353, %cst_126 [1] : vector<16x16xf32> to vector<16xf32>
    %355 = vector.shape_cast %354 : vector<16xf32> to vector<16x1xf32>
    %356 = tpu.reciprocal %355 {approx = true} : vector<16x1xf32> -> vector<16x1xf32>
    %357 = vector.broadcast %356 : vector<16x1xf32> to vector<16x16xf32>
    %358 = arith.mulf %353, %357 : vector<16x16xf32>
    %359 = vector.extract_strided_slice %340 {offsets = [0, 0], sizes = [16, 8], strides = [1, 1]} : vector<16x32xf32> to vector<16x8xf32>
    %cst_127 = arith.constant dense<0.000000e+00> : vector<16x8xf32>
    %360 = tpu.matmul %358, %359, %cst_127 {dimension_numbers = #tpu.dot_dimension_numbers<[1], [0], [0], [1], [0, 0, 1, 1], [], []>} : vector<16x16xf32>, vector<16x8xf32>, vector<16x8xf32> -> vector<16x8xf32>
    %361 = vector.extract_strided_slice %330 {offsets = [0, 8], sizes = [16, 8], strides = [1, 1]} : vector<16x32xf32> to vector<16x8xf32>
    %362 = vector.extract_strided_slice %341 {offsets = [8, 0], sizes = [8, 16], strides = [1, 1]} : vector<32x16xf32> to vector<8x16xf32>
    %cst_128 = arith.constant dense<0.000000e+00> : vector<16x16xf32>
    %363 = tpu.matmul %361, %362, %cst_128 {dimension_numbers = #tpu.dot_dimension_numbers<[1], [0], [0], [1], [0, 0, 1, 1], [], []>} : vector<16x8xf32>, vector<8x16xf32>, vector<16x16xf32> -> vector<16x16xf32>
    %cst_129 = arith.constant 0.353553385 : f32
    %364 = vector.broadcast %cst_129 : f32 to vector<16x16xf32>
    %365 = arith.mulf %363, %364 : vector<16x16xf32>
    %cst_130 = arith.constant -1.000000e+30 : f32
    %366 = vector.broadcast %cst_130 : f32 to vector<16x16xf32>
    %367 = arith.select %116, %365, %366 : vector<16x16xi1>, vector<16x16xf32>
    %cst_131 = arith.constant dense<0xFF800000> : vector<16xf32>
    %368 = vector.multi_reduction <maximumf>, %367, %cst_131 [1] : vector<16x16xf32> to vector<16xf32>
    %369 = vector.shape_cast %368 : vector<16xf32> to vector<16x1xf32>
    %370 = vector.broadcast %369 : vector<16x1xf32> to vector<16x16xf32>
    %371 = arith.subf %367, %370 : vector<16x16xf32>
    %372 = math.exp %371 : vector<16x16xf32>
    %cst_132 = arith.constant dense<0.000000e+00> : vector<16xf32>
    %373 = vector.multi_reduction <add>, %372, %cst_132 [1] : vector<16x16xf32> to vector<16xf32>
    %374 = vector.shape_cast %373 : vector<16xf32> to vector<16x1xf32>
    %375 = tpu.reciprocal %374 {approx = true} : vector<16x1xf32> -> vector<16x1xf32>
    %376 = vector.broadcast %375 : vector<16x1xf32> to vector<16x16xf32>
    %377 = arith.mulf %372, %376 : vector<16x16xf32>
    %378 = vector.extract_strided_slice %340 {offsets = [0, 8], sizes = [16, 8], strides = [1, 1]} : vector<16x32xf32> to vector<16x8xf32>
    %cst_133 = arith.constant dense<0.000000e+00> : vector<16x8xf32>
    %379 = tpu.matmul %377, %378, %cst_133 {dimension_numbers = #tpu.dot_dimension_numbers<[1], [0], [0], [1], [0, 0, 1, 1], [], []>} : vector<16x16xf32>, vector<16x8xf32>, vector<16x8xf32> -> vector<16x8xf32>
    %380 = vector.extract_strided_slice %330 {offsets = [0, 16], sizes = [16, 8], strides = [1, 1]} : vector<16x32xf32> to vector<16x8xf32>
    %381 = vector.extract_strided_slice %341 {offsets = [16, 0], sizes = [8, 16], strides = [1, 1]} : vector<32x16xf32> to vector<8x16xf32>
    %cst_134 = arith.constant dense<0.000000e+00> : vector<16x16xf32>
    %382 = tpu.matmul %380, %381, %cst_134 {dimension_numbers = #tpu.dot_dimension_numbers<[1], [0], [0], [1], [0, 0, 1, 1], [], []>} : vector<16x8xf32>, vector<8x16xf32>, vector<16x16xf32> -> vector<16x16xf32>
    %cst_135 = arith.constant 0.353553385 : f32
    %383 = vector.broadcast %cst_135 : f32 to vector<16x16xf32>
    %384 = arith.mulf %382, %383 : vector<16x16xf32>
    %cst_136 = arith.constant -1.000000e+30 : f32
    %385 = vector.broadcast %cst_136 : f32 to vector<16x16xf32>
    %386 = arith.select %116, %384, %385 : vector<16x16xi1>, vector<16x16xf32>
    %cst_137 = arith.constant dense<0xFF800000> : vector<16xf32>
    %387 = vector.multi_reduction <maximumf>, %386, %cst_137 [1] : vector<16x16xf32> to vector<16xf32>
    %388 = vector.shape_cast %387 : vector<16xf32> to vector<16x1xf32>
    %389 = vector.broadcast %388 : vector<16x1xf32> to vector<16x16xf32>
    %390 = arith.subf %386, %389 : vector<16x16xf32>
    %391 = math.exp %390 : vector<16x16xf32>
    %cst_138 = arith.constant dense<0.000000e+00> : vector<16xf32>
    %392 = vector.multi_reduction <add>, %391, %cst_138 [1] : vector<16x16xf32> to vector<16xf32>
    %393 = vector.shape_cast %392 : vector<16xf32> to vector<16x1xf32>
    %394 = tpu.reciprocal %393 {approx = true} : vector<16x1xf32> -> vector<16x1xf32>
    %395 = vector.broadcast %394 : vector<16x1xf32> to vector<16x16xf32>
    %396 = arith.mulf %391, %395 : vector<16x16xf32>
    %397 = vector.extract_strided_slice %340 {offsets = [0, 16], sizes = [16, 8], strides = [1, 1]} : vector<16x32xf32> to vector<16x8xf32>
    %cst_139 = arith.constant dense<0.000000e+00> : vector<16x8xf32>
    %398 = tpu.matmul %396, %397, %cst_139 {dimension_numbers = #tpu.dot_dimension_numbers<[1], [0], [0], [1], [0, 0, 1, 1], [], []>} : vector<16x16xf32>, vector<16x8xf32>, vector<16x8xf32> -> vector<16x8xf32>
    %399 = vector.extract_strided_slice %330 {offsets = [0, 24], sizes = [16, 8], strides = [1, 1]} : vector<16x32xf32> to vector<16x8xf32>
    %400 = vector.extract_strided_slice %341 {offsets = [24, 0], sizes = [8, 16], strides = [1, 1]} : vector<32x16xf32> to vector<8x16xf32>
    %cst_140 = arith.constant dense<0.000000e+00> : vector<16x16xf32>
    %401 = tpu.matmul %399, %400, %cst_140 {dimension_numbers = #tpu.dot_dimension_numbers<[1], [0], [0], [1], [0, 0, 1, 1], [], []>} : vector<16x8xf32>, vector<8x16xf32>, vector<16x16xf32> -> vector<16x16xf32>
    %cst_141 = arith.constant 0.353553385 : f32
    %402 = vector.broadcast %cst_141 : f32 to vector<16x16xf32>
    %403 = arith.mulf %401, %402 : vector<16x16xf32>
    %cst_142 = arith.constant -1.000000e+30 : f32
    %404 = vector.broadcast %cst_142 : f32 to vector<16x16xf32>
    %405 = arith.select %116, %403, %404 : vector<16x16xi1>, vector<16x16xf32>
    %cst_143 = arith.constant dense<0xFF800000> : vector<16xf32>
    %406 = vector.multi_reduction <maximumf>, %405, %cst_143 [1] : vector<16x16xf32> to vector<16xf32>
    %407 = vector.shape_cast %406 : vector<16xf32> to vector<16x1xf32>
    %408 = vector.broadcast %407 : vector<16x1xf32> to vector<16x16xf32>
    %409 = arith.subf %405, %408 : vector<16x16xf32>
    %410 = math.exp %409 : vector<16x16xf32>
    %cst_144 = arith.constant dense<0.000000e+00> : vector<16xf32>
    %411 = vector.multi_reduction <add>, %410, %cst_144 [1] : vector<16x16xf32> to vector<16xf32>
    %412 = vector.shape_cast %411 : vector<16xf32> to vector<16x1xf32>
    %413 = tpu.reciprocal %412 {approx = true} : vector<16x1xf32> -> vector<16x1xf32>
    %414 = vector.broadcast %413 : vector<16x1xf32> to vector<16x16xf32>
    %415 = arith.mulf %410, %414 : vector<16x16xf32>
    %416 = vector.extract_strided_slice %340 {offsets = [0, 24], sizes = [16, 8], strides = [1, 1]} : vector<16x32xf32> to vector<16x8xf32>
    %cst_145 = arith.constant dense<0.000000e+00> : vector<16x8xf32>
    %417 = tpu.matmul %415, %416, %cst_145 {dimension_numbers = #tpu.dot_dimension_numbers<[1], [0], [0], [1], [0, 0, 1, 1], [], []>} : vector<16x16xf32>, vector<16x8xf32>, vector<16x8xf32> -> vector<16x8xf32>
    %418 = tpu.concatenate %360, %379, %398, %417 in 1 : vector<16x8xf32>, vector<16x8xf32>, vector<16x8xf32>, vector<16x8xf32> -> vector<16x32xf32>
    %c7 = arith.constant 7 : index
    %c0_146 = arith.constant 0 : index
    %c0_147 = arith.constant 0 : index
    %419 = vector.load %arg7[%c7, %c0_146, %c0_147] : memref<8x32x32xf32, #tpu.memory_space<vmem>>, vector<1x32x32xf32>
    %420 = vector.shape_cast %419 : vector<1x32x32xf32> to vector<32x32xf32>
    %cst_148 = arith.constant dense<0.000000e+00> : vector<16x32xf32>
    %421 = tpu.matmul %418, %420, %cst_148 {dimension_numbers = #tpu.dot_dimension_numbers<[1], [0], [0], [1], [0, 0, 1, 1], [], []>} : vector<16x32xf32>, vector<32x32xf32>, vector<16x32xf32> -> vector<16x32xf32>
    %422 = arith.addf %292, %421 : vector<16x32xf32>
    %423 = vector.broadcast %300 : vector<1x32xf32> to vector<16x32xf32>
    %424 = arith.addf %422, %423 : vector<16x32xf32>
    %cst_149 = arith.constant dense<0.000000e+00> : vector<16xf32>
    %425 = vector.multi_reduction <add>, %424, %cst_149 [1] : vector<16x32xf32> to vector<16xf32>
    %426 = vector.shape_cast %425 : vector<16xf32> to vector<16x1xf32>
    %cst_150 = arith.constant 3.200000e+01 : f32
    %427 = vector.broadcast %cst_150 : f32 to vector<16x1xf32>
    %428 = arith.divf %426, %427 : vector<16x1xf32>
    %429 = vector.broadcast %428 : vector<16x1xf32> to vector<16x32xf32>
    %430 = arith.subf %424, %429 : vector<16x32xf32>
    %431 = arith.mulf %430, %430 : vector<16x32xf32>
    %cst_151 = arith.constant dense<0.000000e+00> : vector<16xf32>
    %432 = vector.multi_reduction <add>, %431, %cst_151 [1] : vector<16x32xf32> to vector<16xf32>
    %433 = vector.shape_cast %432 : vector<16xf32> to vector<16x1xf32>
    %cst_152 = arith.constant 3.200000e+01 : f32
    %434 = vector.broadcast %cst_152 : f32 to vector<16x1xf32>
    %435 = arith.divf %433, %434 : vector<16x1xf32>
    %cst_153 = arith.constant 9.99999974E-6 : f32
    %436 = vector.broadcast %cst_153 : f32 to vector<16x1xf32>
    %437 = arith.addf %435, %436 : vector<16x1xf32>
    %438 = math.rsqrt %437 : vector<16x1xf32>
    %439 = vector.broadcast %438 : vector<16x1xf32> to vector<16x32xf32>
    %440 = arith.mulf %430, %439 : vector<16x32xf32>
    %441 = vector.broadcast %301 : vector<1x32xf32> to vector<16x32xf32>
    %442 = arith.mulf %440, %441 : vector<16x32xf32>
    %443 = vector.broadcast %302 : vector<1x32xf32> to vector<16x32xf32>
    %444 = arith.addf %442, %443 : vector<16x32xf32>
    %c1_154 = arith.constant 1 : index
    %c0_155 = arith.constant 0 : index
    %c0_156 = arith.constant 0 : index
    %445 = vector.load %arg8[%c1_154, %c0_155, %c0_156] : memref<2x32x128xf32, #tpu.memory_space<vmem>>, vector<1x32x128xf32>
    %446 = vector.shape_cast %445 : vector<1x32x128xf32> to vector<32x128xf32>
    %cst_157 = arith.constant dense<0.000000e+00> : vector<16x128xf32>
    %447 = tpu.matmul %444, %446, %cst_157 {dimension_numbers = #tpu.dot_dimension_numbers<[1], [0], [0], [1], [0, 0, 1, 1], [], []>} : vector<16x32xf32>, vector<32x128xf32>, vector<16x128xf32> -> vector<16x128xf32>
    %448 = vector.broadcast %305 : vector<1x128xf32> to vector<16x128xf32>
    %449 = arith.addf %447, %448 : vector<16x128xf32>
    %450 = arith.mulf %449, %449 : vector<16x128xf32>
    %451 = arith.mulf %449, %450 : vector<16x128xf32>
    %cst_158 = arith.constant 4.471500e-02 : f32
    %452 = vector.broadcast %cst_158 : f32 to vector<16x128xf32>
    %453 = arith.mulf %452, %451 : vector<16x128xf32>
    %454 = arith.addf %449, %453 : vector<16x128xf32>
    %cst_159 = arith.constant 0.797884583 : f32
    %455 = vector.broadcast %cst_159 : f32 to vector<16x128xf32>
    %456 = arith.mulf %455, %454 : vector<16x128xf32>
    %457 = math.tanh %456 : vector<16x128xf32>
    %cst_160 = arith.constant 1.000000e+00 : f32
    %458 = vector.broadcast %cst_160 : f32 to vector<16x128xf32>
    %459 = arith.addf %458, %457 : vector<16x128xf32>
    %cst_161 = arith.constant 5.000000e-01 : f32
    %460 = vector.broadcast %cst_161 : f32 to vector<16x128xf32>
    %461 = arith.mulf %460, %459 : vector<16x128xf32>
    %462 = arith.mulf %449, %461 : vector<16x128xf32>
    %c1_162 = arith.constant 1 : index
    %c0_163 = arith.constant 0 : index
    %c0_164 = arith.constant 0 : index
    %463 = vector.load %arg9[%c1_162, %c0_163, %c0_164] : memref<2x128x32xf32, #tpu.memory_space<vmem>>, vector<1x128x32xf32>
    %464 = vector.shape_cast %463 : vector<1x128x32xf32> to vector<128x32xf32>
    %cst_165 = arith.constant dense<0.000000e+00> : vector<16x32xf32>
    %465 = tpu.matmul %462, %464, %cst_165 {dimension_numbers = #tpu.dot_dimension_numbers<[1], [0], [0], [1], [0, 0, 1, 1], [], []>} : vector<16x128xf32>, vector<128x32xf32>, vector<16x32xf32> -> vector<16x32xf32>
    %466 = arith.addf %424, %465 : vector<16x32xf32>
    %467 = vector.broadcast %303 : vector<1x32xf32> to vector<16x32xf32>
    %468 = arith.addf %466, %467 : vector<16x32xf32>
    %469 = tpu.iota {dimensions = array<i32: 0>} : vector<2x16xi32>
    %470 = tpu.iota {dimensions = array<i32: 1>} : vector<2x16xi32>
    %c8_i32_166 = arith.constant 8 : i32
    %471 = vector.broadcast %c8_i32_166 : i32 to vector<2x16xi32>
    %472 = arith.muli %469, %471 : vector<2x16xi32>
    %473 = arith.cmpi eq, %470, %472 : vector<2x16xi32>
    %cst_167 = arith.constant 1.000000e+00 : f32
    %cst_168 = arith.constant 0.000000e+00 : f32
    %474 = vector.broadcast %cst_167 : f32 to vector<2x16xf32>
    %475 = vector.broadcast %cst_168 : f32 to vector<2x16xf32>
    %476 = arith.select %473, %474, %475 : vector<2x16xi1>, vector<2x16xf32>
    %cst_169 = arith.constant dense<0.000000e+00> : vector<2x32xf32>
    %477 = tpu.matmul %476, %468, %cst_169 {dimension_numbers = #tpu.dot_dimension_numbers<[1], [0], [0], [1], [0, 0, 1, 1], [], []>} : vector<2x16xf32>, vector<16x32xf32>, vector<2x32xf32> -> vector<2x32xf32>
    %c0_170 = arith.constant 0 : index
    %c0_171 = arith.constant 0 : index
    %478 = vector.load %arg5[%c0_170, %c0_171] : memref<2x32xf32, #tpu.memory_space<vmem>>, vector<2x32xf32>
    %479 = vector.extract_strided_slice %478 {offsets = [0, 0], sizes = [1, 32], strides = [1, 1]} : vector<2x32xf32> to vector<1x32xf32>
    %480 = vector.extract_strided_slice %478 {offsets = [1, 0], sizes = [1, 32], strides = [1, 1]} : vector<2x32xf32> to vector<1x32xf32>
    %cst_172 = arith.constant dense<0.000000e+00> : vector<2xf32>
    %481 = vector.multi_reduction <add>, %477, %cst_172 [1] : vector<2x32xf32> to vector<2xf32>
    %482 = vector.shape_cast %481 : vector<2xf32> to vector<2x1xf32>
    %cst_173 = arith.constant 3.200000e+01 : f32
    %483 = vector.broadcast %cst_173 : f32 to vector<2x1xf32>
    %484 = arith.divf %482, %483 : vector<2x1xf32>
    %485 = vector.broadcast %484 : vector<2x1xf32> to vector<2x32xf32>
    %486 = arith.subf %477, %485 : vector<2x32xf32>
    %487 = arith.mulf %486, %486 : vector<2x32xf32>
    %cst_174 = arith.constant dense<0.000000e+00> : vector<2xf32>
    %488 = vector.multi_reduction <add>, %487, %cst_174 [1] : vector<2x32xf32> to vector<2xf32>
    %489 = vector.shape_cast %488 : vector<2xf32> to vector<2x1xf32>
    %cst_175 = arith.constant 3.200000e+01 : f32
    %490 = vector.broadcast %cst_175 : f32 to vector<2x1xf32>
    %491 = arith.divf %489, %490 : vector<2x1xf32>
    %cst_176 = arith.constant 9.99999974E-6 : f32
    %492 = vector.broadcast %cst_176 : f32 to vector<2x1xf32>
    %493 = arith.addf %491, %492 : vector<2x1xf32>
    %494 = math.rsqrt %493 : vector<2x1xf32>
    %495 = vector.broadcast %494 : vector<2x1xf32> to vector<2x32xf32>
    %496 = arith.mulf %486, %495 : vector<2x32xf32>
    %497 = vector.broadcast %479 : vector<1x32xf32> to vector<2x32xf32>
    %498 = arith.mulf %496, %497 : vector<2x32xf32>
    %499 = vector.broadcast %480 : vector<1x32xf32> to vector<2x32xf32>
    %500 = arith.addf %498, %499 : vector<2x32xf32>
    %c0_177 = arith.constant 0 : index
    %c0_178 = arith.constant 0 : index
    %501 = vector.load %arg6[%c0_177, %c0_178] : memref<32x16xf32, #tpu.memory_space<vmem>>, vector<32x16xf32>
    %cst_179 = arith.constant dense<0.000000e+00> : vector<2x16xf32>
    %502 = tpu.matmul %500, %501, %cst_179 {dimension_numbers = #tpu.dot_dimension_numbers<[1], [0], [0], [1], [0, 0, 1, 1], [], []>} : vector<2x32xf32>, vector<32x16xf32>, vector<2x16xf32> -> vector<2x16xf32>
    %c0_180 = arith.constant 0 : index
    %c0_181 = arith.constant 0 : index
    %503 = vector.load %arg13[%c0_180, %c0_181] : memref<64x32xf32, #tpu.memory_space<vmem>>, vector<64x32xf32>
    %c0_182 = arith.constant 0 : index
    %c0_183 = arith.constant 0 : index
    %504 = vector.load %arg14[%c0_182, %c0_183] : memref<8x32xf32, #tpu.memory_space<vmem>>, vector<8x32xf32>
    %c0_184 = arith.constant 0 : index
    %c0_185 = arith.constant 0 : index
    %505 = vector.load %arg12[%c0_184, %c0_185] : memref<16x1xi32, #tpu.memory_space<vmem>>, vector<16x1xi32>
    %506 = tpu.iota {dimensions = array<i32: 1>} : vector<16x64xi32>
    %507 = vector.broadcast %505 : vector<16x1xi32> to vector<16x64xi32>
    %508 = arith.cmpi eq, %506, %507 : vector<16x64xi32>
    %cst_186 = arith.constant 1.000000e+00 : f32
    %cst_187 = arith.constant 0.000000e+00 : f32
    %509 = vector.broadcast %cst_186 : f32 to vector<16x64xf32>
    %510 = vector.broadcast %cst_187 : f32 to vector<16x64xf32>
    %511 = arith.select %508, %509, %510 : vector<16x64xi1>, vector<16x64xf32>
    %cst_188 = arith.constant dense<0.000000e+00> : vector<16x32xf32>
    %512 = tpu.matmul %511, %503, %cst_188 {dimension_numbers = #tpu.dot_dimension_numbers<[1], [0], [0], [1], [0, 0, 1, 1], [], []>} : vector<16x64xf32>, vector<64x32xf32>, vector<16x32xf32> -> vector<16x32xf32>
    %513 = tpu.concatenate %504, %504 in 0 : vector<8x32xf32>, vector<8x32xf32> -> vector<16x32xf32>
    %514 = arith.addf %512, %513 : vector<16x32xf32>
    %515 = tpu.iota {dimensions = array<i32: 0>} : vector<16x16xi32>
    %516 = tpu.iota {dimensions = array<i32: 1>} : vector<16x16xi32>
    %c0_i32_189 = arith.constant 0 : i32
    %517 = vector.broadcast %c0_i32_189 : i32 to vector<16x16xi32>
    %518 = arith.cmpi sge, %515, %517 : vector<16x16xi32>
    %c8_i32_190 = arith.constant 8 : i32
    %519 = vector.broadcast %c8_i32_190 : i32 to vector<16x16xi32>
    %520 = arith.cmpi slt, %515, %519 : vector<16x16xi32>
    %521 = arith.andi %518, %520 : vector<16x16xi1>
    %c0_i32_191 = arith.constant 0 : i32
    %522 = vector.broadcast %c0_i32_191 : i32 to vector<16x16xi32>
    %523 = arith.cmpi sge, %516, %522 : vector<16x16xi32>
    %c8_i32_192 = arith.constant 8 : i32
    %524 = vector.broadcast %c8_i32_192 : i32 to vector<16x16xi32>
    %525 = arith.cmpi slt, %516, %524 : vector<16x16xi32>
    %526 = arith.andi %523, %525 : vector<16x16xi1>
    %527 = arith.andi %521, %526 : vector<16x16xi1>
    %c8_i32_193 = arith.constant 8 : i32
    %528 = vector.broadcast %c8_i32_193 : i32 to vector<16x16xi32>
    %529 = arith.cmpi sge, %515, %528 : vector<16x16xi32>
    %c16_i32_194 = arith.constant 16 : i32
    %530 = vector.broadcast %c16_i32_194 : i32 to vector<16x16xi32>
    %531 = arith.cmpi slt, %515, %530 : vector<16x16xi32>
    %532 = arith.andi %529, %531 : vector<16x16xi1>
    %c8_i32_195 = arith.constant 8 : i32
    %533 = vector.broadcast %c8_i32_195 : i32 to vector<16x16xi32>
    %534 = arith.cmpi sge, %516, %533 : vector<16x16xi32>
    %c16_i32_196 = arith.constant 16 : i32
    %535 = vector.broadcast %c16_i32_196 : i32 to vector<16x16xi32>
    %536 = arith.cmpi slt, %516, %535 : vector<16x16xi32>
    %537 = arith.andi %534, %536 : vector<16x16xi1>
    %538 = arith.andi %532, %537 : vector<16x16xi1>
    %539 = arith.ori %527, %538 : vector<16x16xi1>
    %540 = arith.cmpi sle, %516, %515 : vector<16x16xi32>
    %541 = arith.andi %539, %540 : vector<16x16xi1>
    %c0_197 = arith.constant 0 : index
    %c0_198 = arith.constant 0 : index
    %c0_199 = arith.constant 0 : index
    %542 = vector.load %arg20[%c0_197, %c0_198, %c0_199] : memref<2x9x32xf32, #tpu.memory_space<vmem>>, vector<1x9x32xf32>
    %543 = vector.shape_cast %542 : vector<1x9x32xf32> to vector<9x32xf32>
    %544 = vector.extract_strided_slice %543 {offsets = [0, 0], sizes = [1, 32], strides = [1, 1]} : vector<9x32xf32> to vector<1x32xf32>
    %545 = vector.extract_strided_slice %543 {offsets = [1, 0], sizes = [1, 32], strides = [1, 1]} : vector<9x32xf32> to vector<1x32xf32>
    %546 = vector.extract_strided_slice %543 {offsets = [2, 0], sizes = [1, 32], strides = [1, 1]} : vector<9x32xf32> to vector<1x32xf32>
    %547 = vector.extract_strided_slice %543 {offsets = [3, 0], sizes = [1, 32], strides = [1, 1]} : vector<9x32xf32> to vector<1x32xf32>
    %548 = vector.extract_strided_slice %543 {offsets = [4, 0], sizes = [1, 32], strides = [1, 1]} : vector<9x32xf32> to vector<1x32xf32>
    %549 = vector.extract_strided_slice %543 {offsets = [5, 0], sizes = [1, 32], strides = [1, 1]} : vector<9x32xf32> to vector<1x32xf32>
    %550 = vector.extract_strided_slice %543 {offsets = [6, 0], sizes = [1, 32], strides = [1, 1]} : vector<9x32xf32> to vector<1x32xf32>
    %551 = vector.extract_strided_slice %543 {offsets = [7, 0], sizes = [1, 32], strides = [1, 1]} : vector<9x32xf32> to vector<1x32xf32>
    %552 = vector.extract_strided_slice %543 {offsets = [8, 0], sizes = [1, 32], strides = [1, 1]} : vector<9x32xf32> to vector<1x32xf32>
    %c0_200 = arith.constant 0 : index
    %c0_201 = arith.constant 0 : index
    %c0_202 = arith.constant 0 : index
    %553 = vector.load %arg21[%c0_200, %c0_201, %c0_202] : memref<2x1x128xf32, #tpu.memory_space<vmem>>, vector<1x1x128xf32>
    %554 = vector.shape_cast %553 : vector<1x1x128xf32> to vector<1x128xf32>
    %cst_203 = arith.constant dense<0.000000e+00> : vector<16xf32>
    %555 = vector.multi_reduction <add>, %514, %cst_203 [1] : vector<16x32xf32> to vector<16xf32>
    %556 = vector.shape_cast %555 : vector<16xf32> to vector<16x1xf32>
    %cst_204 = arith.constant 3.200000e+01 : f32
    %557 = vector.broadcast %cst_204 : f32 to vector<16x1xf32>
    %558 = arith.divf %556, %557 : vector<16x1xf32>
    %559 = vector.broadcast %558 : vector<16x1xf32> to vector<16x32xf32>
    %560 = arith.subf %514, %559 : vector<16x32xf32>
    %561 = arith.mulf %560, %560 : vector<16x32xf32>
    %cst_205 = arith.constant dense<0.000000e+00> : vector<16xf32>
    %562 = vector.multi_reduction <add>, %561, %cst_205 [1] : vector<16x32xf32> to vector<16xf32>
    %563 = vector.shape_cast %562 : vector<16xf32> to vector<16x1xf32>
    %cst_206 = arith.constant 3.200000e+01 : f32
    %564 = vector.broadcast %cst_206 : f32 to vector<16x1xf32>
    %565 = arith.divf %563, %564 : vector<16x1xf32>
    %cst_207 = arith.constant 9.99999974E-6 : f32
    %566 = vector.broadcast %cst_207 : f32 to vector<16x1xf32>
    %567 = arith.addf %565, %566 : vector<16x1xf32>
    %568 = math.rsqrt %567 : vector<16x1xf32>
    %569 = vector.broadcast %568 : vector<16x1xf32> to vector<16x32xf32>
    %570 = arith.mulf %560, %569 : vector<16x32xf32>
    %571 = vector.broadcast %544 : vector<1x32xf32> to vector<16x32xf32>
    %572 = arith.mulf %570, %571 : vector<16x32xf32>
    %573 = vector.broadcast %545 : vector<1x32xf32> to vector<16x32xf32>
    %574 = arith.addf %572, %573 : vector<16x32xf32>
    %c0_208 = arith.constant 0 : index
    %c0_209 = arith.constant 0 : index
    %c0_210 = arith.constant 0 : index
    %575 = vector.load %arg17[%c0_208, %c0_209, %c0_210] : memref<8x32x32xf32, #tpu.memory_space<vmem>>, vector<1x32x32xf32>
    %576 = vector.shape_cast %575 : vector<1x32x32xf32> to vector<32x32xf32>
    %cst_211 = arith.constant dense<0.000000e+00> : vector<16x32xf32>
    %577 = tpu.matmul %574, %576, %cst_211 {dimension_numbers = #tpu.dot_dimension_numbers<[1], [0], [0], [1], [0, 0, 1, 1], [], []>} : vector<16x32xf32>, vector<32x32xf32>, vector<16x32xf32> -> vector<16x32xf32>
    %578 = vector.broadcast %546 : vector<1x32xf32> to vector<16x32xf32>
    %579 = arith.addf %577, %578 : vector<16x32xf32>
    %c1_212 = arith.constant 1 : index
    %c0_213 = arith.constant 0 : index
    %c0_214 = arith.constant 0 : index
    %580 = vector.load %arg17[%c1_212, %c0_213, %c0_214] : memref<8x32x32xf32, #tpu.memory_space<vmem>>, vector<1x32x32xf32>
    %581 = vector.shape_cast %580 : vector<1x32x32xf32> to vector<32x32xf32>
    %cst_215 = arith.constant dense<0.000000e+00> : vector<16x32xf32>
    %582 = tpu.matmul %574, %581, %cst_215 {dimension_numbers = #tpu.dot_dimension_numbers<[1], [0], [0], [1], [0, 0, 1, 1], [], []>} : vector<16x32xf32>, vector<32x32xf32>, vector<16x32xf32> -> vector<16x32xf32>
    %583 = vector.broadcast %547 : vector<1x32xf32> to vector<16x32xf32>
    %584 = arith.addf %582, %583 : vector<16x32xf32>
    %c2_216 = arith.constant 2 : index
    %c0_217 = arith.constant 0 : index
    %c0_218 = arith.constant 0 : index
    %585 = vector.load %arg17[%c2_216, %c0_217, %c0_218] : memref<8x32x32xf32, #tpu.memory_space<vmem>>, vector<1x32x32xf32>
    %586 = vector.shape_cast %585 : vector<1x32x32xf32> to vector<32x32xf32>
    %cst_219 = arith.constant dense<0.000000e+00> : vector<16x32xf32>
    %587 = tpu.matmul %574, %586, %cst_219 {dimension_numbers = #tpu.dot_dimension_numbers<[1], [0], [0], [1], [0, 0, 1, 1], [], []>} : vector<16x32xf32>, vector<32x32xf32>, vector<16x32xf32> -> vector<16x32xf32>
    %588 = vector.broadcast %548 : vector<1x32xf32> to vector<16x32xf32>
    %589 = arith.addf %587, %588 : vector<16x32xf32>
    %590 = tpu.transpose %584, [1, 0] : vector<16x32xf32> -> vector<32x16xf32>
    %591 = vector.extract_strided_slice %579 {offsets = [0, 0], sizes = [16, 8], strides = [1, 1]} : vector<16x32xf32> to vector<16x8xf32>
    %592 = vector.extract_strided_slice %590 {offsets = [0, 0], sizes = [8, 16], strides = [1, 1]} : vector<32x16xf32> to vector<8x16xf32>
    %cst_220 = arith.constant dense<0.000000e+00> : vector<16x16xf32>
    %593 = tpu.matmul %591, %592, %cst_220 {dimension_numbers = #tpu.dot_dimension_numbers<[1], [0], [0], [1], [0, 0, 1, 1], [], []>} : vector<16x8xf32>, vector<8x16xf32>, vector<16x16xf32> -> vector<16x16xf32>
    %cst_221 = arith.constant 0.353553385 : f32
    %594 = vector.broadcast %cst_221 : f32 to vector<16x16xf32>
    %595 = arith.mulf %593, %594 : vector<16x16xf32>
    %cst_222 = arith.constant -1.000000e+30 : f32
    %596 = vector.broadcast %cst_222 : f32 to vector<16x16xf32>
    %597 = arith.select %541, %595, %596 : vector<16x16xi1>, vector<16x16xf32>
    %cst_223 = arith.constant dense<0xFF800000> : vector<16xf32>
    %598 = vector.multi_reduction <maximumf>, %597, %cst_223 [1] : vector<16x16xf32> to vector<16xf32>
    %599 = vector.shape_cast %598 : vector<16xf32> to vector<16x1xf32>
    %600 = vector.broadcast %599 : vector<16x1xf32> to vector<16x16xf32>
    %601 = arith.subf %597, %600 : vector<16x16xf32>
    %602 = math.exp %601 : vector<16x16xf32>
    %cst_224 = arith.constant dense<0.000000e+00> : vector<16xf32>
    %603 = vector.multi_reduction <add>, %602, %cst_224 [1] : vector<16x16xf32> to vector<16xf32>
    %604 = vector.shape_cast %603 : vector<16xf32> to vector<16x1xf32>
    %605 = tpu.reciprocal %604 {approx = true} : vector<16x1xf32> -> vector<16x1xf32>
    %606 = vector.broadcast %605 : vector<16x1xf32> to vector<16x16xf32>
    %607 = arith.mulf %602, %606 : vector<16x16xf32>
    %608 = vector.extract_strided_slice %589 {offsets = [0, 0], sizes = [16, 8], strides = [1, 1]} : vector<16x32xf32> to vector<16x8xf32>
    %cst_225 = arith.constant dense<0.000000e+00> : vector<16x8xf32>
    %609 = tpu.matmul %607, %608, %cst_225 {dimension_numbers = #tpu.dot_dimension_numbers<[1], [0], [0], [1], [0, 0, 1, 1], [], []>} : vector<16x16xf32>, vector<16x8xf32>, vector<16x8xf32> -> vector<16x8xf32>
    %610 = vector.extract_strided_slice %579 {offsets = [0, 8], sizes = [16, 8], strides = [1, 1]} : vector<16x32xf32> to vector<16x8xf32>
    %611 = vector.extract_strided_slice %590 {offsets = [8, 0], sizes = [8, 16], strides = [1, 1]} : vector<32x16xf32> to vector<8x16xf32>
    %cst_226 = arith.constant dense<0.000000e+00> : vector<16x16xf32>
    %612 = tpu.matmul %610, %611, %cst_226 {dimension_numbers = #tpu.dot_dimension_numbers<[1], [0], [0], [1], [0, 0, 1, 1], [], []>} : vector<16x8xf32>, vector<8x16xf32>, vector<16x16xf32> -> vector<16x16xf32>
    %cst_227 = arith.constant 0.353553385 : f32
    %613 = vector.broadcast %cst_227 : f32 to vector<16x16xf32>
    %614 = arith.mulf %612, %613 : vector<16x16xf32>
    %cst_228 = arith.constant -1.000000e+30 : f32
    %615 = vector.broadcast %cst_228 : f32 to vector<16x16xf32>
    %616 = arith.select %541, %614, %615 : vector<16x16xi1>, vector<16x16xf32>
    %cst_229 = arith.constant dense<0xFF800000> : vector<16xf32>
    %617 = vector.multi_reduction <maximumf>, %616, %cst_229 [1] : vector<16x16xf32> to vector<16xf32>
    %618 = vector.shape_cast %617 : vector<16xf32> to vector<16x1xf32>
    %619 = vector.broadcast %618 : vector<16x1xf32> to vector<16x16xf32>
    %620 = arith.subf %616, %619 : vector<16x16xf32>
    %621 = math.exp %620 : vector<16x16xf32>
    %cst_230 = arith.constant dense<0.000000e+00> : vector<16xf32>
    %622 = vector.multi_reduction <add>, %621, %cst_230 [1] : vector<16x16xf32> to vector<16xf32>
    %623 = vector.shape_cast %622 : vector<16xf32> to vector<16x1xf32>
    %624 = tpu.reciprocal %623 {approx = true} : vector<16x1xf32> -> vector<16x1xf32>
    %625 = vector.broadcast %624 : vector<16x1xf32> to vector<16x16xf32>
    %626 = arith.mulf %621, %625 : vector<16x16xf32>
    %627 = vector.extract_strided_slice %589 {offsets = [0, 8], sizes = [16, 8], strides = [1, 1]} : vector<16x32xf32> to vector<16x8xf32>
    %cst_231 = arith.constant dense<0.000000e+00> : vector<16x8xf32>
    %628 = tpu.matmul %626, %627, %cst_231 {dimension_numbers = #tpu.dot_dimension_numbers<[1], [0], [0], [1], [0, 0, 1, 1], [], []>} : vector<16x16xf32>, vector<16x8xf32>, vector<16x8xf32> -> vector<16x8xf32>
    %629 = vector.extract_strided_slice %579 {offsets = [0, 16], sizes = [16, 8], strides = [1, 1]} : vector<16x32xf32> to vector<16x8xf32>
    %630 = vector.extract_strided_slice %590 {offsets = [16, 0], sizes = [8, 16], strides = [1, 1]} : vector<32x16xf32> to vector<8x16xf32>
    %cst_232 = arith.constant dense<0.000000e+00> : vector<16x16xf32>
    %631 = tpu.matmul %629, %630, %cst_232 {dimension_numbers = #tpu.dot_dimension_numbers<[1], [0], [0], [1], [0, 0, 1, 1], [], []>} : vector<16x8xf32>, vector<8x16xf32>, vector<16x16xf32> -> vector<16x16xf32>
    %cst_233 = arith.constant 0.353553385 : f32
    %632 = vector.broadcast %cst_233 : f32 to vector<16x16xf32>
    %633 = arith.mulf %631, %632 : vector<16x16xf32>
    %cst_234 = arith.constant -1.000000e+30 : f32
    %634 = vector.broadcast %cst_234 : f32 to vector<16x16xf32>
    %635 = arith.select %541, %633, %634 : vector<16x16xi1>, vector<16x16xf32>
    %cst_235 = arith.constant dense<0xFF800000> : vector<16xf32>
    %636 = vector.multi_reduction <maximumf>, %635, %cst_235 [1] : vector<16x16xf32> to vector<16xf32>
    %637 = vector.shape_cast %636 : vector<16xf32> to vector<16x1xf32>
    %638 = vector.broadcast %637 : vector<16x1xf32> to vector<16x16xf32>
    %639 = arith.subf %635, %638 : vector<16x16xf32>
    %640 = math.exp %639 : vector<16x16xf32>
    %cst_236 = arith.constant dense<0.000000e+00> : vector<16xf32>
    %641 = vector.multi_reduction <add>, %640, %cst_236 [1] : vector<16x16xf32> to vector<16xf32>
    %642 = vector.shape_cast %641 : vector<16xf32> to vector<16x1xf32>
    %643 = tpu.reciprocal %642 {approx = true} : vector<16x1xf32> -> vector<16x1xf32>
    %644 = vector.broadcast %643 : vector<16x1xf32> to vector<16x16xf32>
    %645 = arith.mulf %640, %644 : vector<16x16xf32>
    %646 = vector.extract_strided_slice %589 {offsets = [0, 16], sizes = [16, 8], strides = [1, 1]} : vector<16x32xf32> to vector<16x8xf32>
    %cst_237 = arith.constant dense<0.000000e+00> : vector<16x8xf32>
    %647 = tpu.matmul %645, %646, %cst_237 {dimension_numbers = #tpu.dot_dimension_numbers<[1], [0], [0], [1], [0, 0, 1, 1], [], []>} : vector<16x16xf32>, vector<16x8xf32>, vector<16x8xf32> -> vector<16x8xf32>
    %648 = vector.extract_strided_slice %579 {offsets = [0, 24], sizes = [16, 8], strides = [1, 1]} : vector<16x32xf32> to vector<16x8xf32>
    %649 = vector.extract_strided_slice %590 {offsets = [24, 0], sizes = [8, 16], strides = [1, 1]} : vector<32x16xf32> to vector<8x16xf32>
    %cst_238 = arith.constant dense<0.000000e+00> : vector<16x16xf32>
    %650 = tpu.matmul %648, %649, %cst_238 {dimension_numbers = #tpu.dot_dimension_numbers<[1], [0], [0], [1], [0, 0, 1, 1], [], []>} : vector<16x8xf32>, vector<8x16xf32>, vector<16x16xf32> -> vector<16x16xf32>
    %cst_239 = arith.constant 0.353553385 : f32
    %651 = vector.broadcast %cst_239 : f32 to vector<16x16xf32>
    %652 = arith.mulf %650, %651 : vector<16x16xf32>
    %cst_240 = arith.constant -1.000000e+30 : f32
    %653 = vector.broadcast %cst_240 : f32 to vector<16x16xf32>
    %654 = arith.select %541, %652, %653 : vector<16x16xi1>, vector<16x16xf32>
    %cst_241 = arith.constant dense<0xFF800000> : vector<16xf32>
    %655 = vector.multi_reduction <maximumf>, %654, %cst_241 [1] : vector<16x16xf32> to vector<16xf32>
    %656 = vector.shape_cast %655 : vector<16xf32> to vector<16x1xf32>
    %657 = vector.broadcast %656 : vector<16x1xf32> to vector<16x16xf32>
    %658 = arith.subf %654, %657 : vector<16x16xf32>
    %659 = math.exp %658 : vector<16x16xf32>
    %cst_242 = arith.constant dense<0.000000e+00> : vector<16xf32>
    %660 = vector.multi_reduction <add>, %659, %cst_242 [1] : vector<16x16xf32> to vector<16xf32>
    %661 = vector.shape_cast %660 : vector<16xf32> to vector<16x1xf32>
    %662 = tpu.reciprocal %661 {approx = true} : vector<16x1xf32> -> vector<16x1xf32>
    %663 = vector.broadcast %662 : vector<16x1xf32> to vector<16x16xf32>
    %664 = arith.mulf %659, %663 : vector<16x16xf32>
    %665 = vector.extract_strided_slice %589 {offsets = [0, 24], sizes = [16, 8], strides = [1, 1]} : vector<16x32xf32> to vector<16x8xf32>
    %cst_243 = arith.constant dense<0.000000e+00> : vector<16x8xf32>
    %666 = tpu.matmul %664, %665, %cst_243 {dimension_numbers = #tpu.dot_dimension_numbers<[1], [0], [0], [1], [0, 0, 1, 1], [], []>} : vector<16x16xf32>, vector<16x8xf32>, vector<16x8xf32> -> vector<16x8xf32>
    %667 = tpu.concatenate %609, %628, %647, %666 in 1 : vector<16x8xf32>, vector<16x8xf32>, vector<16x8xf32>, vector<16x8xf32> -> vector<16x32xf32>
    %c3_244 = arith.constant 3 : index
    %c0_245 = arith.constant 0 : index
    %c0_246 = arith.constant 0 : index
    %668 = vector.load %arg17[%c3_244, %c0_245, %c0_246] : memref<8x32x32xf32, #tpu.memory_space<vmem>>, vector<1x32x32xf32>
    %669 = vector.shape_cast %668 : vector<1x32x32xf32> to vector<32x32xf32>
    %cst_247 = arith.constant dense<0.000000e+00> : vector<16x32xf32>
    %670 = tpu.matmul %667, %669, %cst_247 {dimension_numbers = #tpu.dot_dimension_numbers<[1], [0], [0], [1], [0, 0, 1, 1], [], []>} : vector<16x32xf32>, vector<32x32xf32>, vector<16x32xf32> -> vector<16x32xf32>
    %671 = arith.addf %514, %670 : vector<16x32xf32>
    %672 = vector.broadcast %549 : vector<1x32xf32> to vector<16x32xf32>
    %673 = arith.addf %671, %672 : vector<16x32xf32>
    %cst_248 = arith.constant dense<0.000000e+00> : vector<16xf32>
    %674 = vector.multi_reduction <add>, %673, %cst_248 [1] : vector<16x32xf32> to vector<16xf32>
    %675 = vector.shape_cast %674 : vector<16xf32> to vector<16x1xf32>
    %cst_249 = arith.constant 3.200000e+01 : f32
    %676 = vector.broadcast %cst_249 : f32 to vector<16x1xf32>
    %677 = arith.divf %675, %676 : vector<16x1xf32>
    %678 = vector.broadcast %677 : vector<16x1xf32> to vector<16x32xf32>
    %679 = arith.subf %673, %678 : vector<16x32xf32>
    %680 = arith.mulf %679, %679 : vector<16x32xf32>
    %cst_250 = arith.constant dense<0.000000e+00> : vector<16xf32>
    %681 = vector.multi_reduction <add>, %680, %cst_250 [1] : vector<16x32xf32> to vector<16xf32>
    %682 = vector.shape_cast %681 : vector<16xf32> to vector<16x1xf32>
    %cst_251 = arith.constant 3.200000e+01 : f32
    %683 = vector.broadcast %cst_251 : f32 to vector<16x1xf32>
    %684 = arith.divf %682, %683 : vector<16x1xf32>
    %cst_252 = arith.constant 9.99999974E-6 : f32
    %685 = vector.broadcast %cst_252 : f32 to vector<16x1xf32>
    %686 = arith.addf %684, %685 : vector<16x1xf32>
    %687 = math.rsqrt %686 : vector<16x1xf32>
    %688 = vector.broadcast %687 : vector<16x1xf32> to vector<16x32xf32>
    %689 = arith.mulf %679, %688 : vector<16x32xf32>
    %690 = vector.broadcast %550 : vector<1x32xf32> to vector<16x32xf32>
    %691 = arith.mulf %689, %690 : vector<16x32xf32>
    %692 = vector.broadcast %551 : vector<1x32xf32> to vector<16x32xf32>
    %693 = arith.addf %691, %692 : vector<16x32xf32>
    %c0_253 = arith.constant 0 : index
    %c0_254 = arith.constant 0 : index
    %c0_255 = arith.constant 0 : index
    %694 = vector.load %arg18[%c0_253, %c0_254, %c0_255] : memref<2x32x128xf32, #tpu.memory_space<vmem>>, vector<1x32x128xf32>
    %695 = vector.shape_cast %694 : vector<1x32x128xf32> to vector<32x128xf32>
    %cst_256 = arith.constant dense<0.000000e+00> : vector<16x128xf32>
    %696 = tpu.matmul %693, %695, %cst_256 {dimension_numbers = #tpu.dot_dimension_numbers<[1], [0], [0], [1], [0, 0, 1, 1], [], []>} : vector<16x32xf32>, vector<32x128xf32>, vector<16x128xf32> -> vector<16x128xf32>
    %697 = vector.broadcast %554 : vector<1x128xf32> to vector<16x128xf32>
    %698 = arith.addf %696, %697 : vector<16x128xf32>
    %699 = arith.mulf %698, %698 : vector<16x128xf32>
    %700 = arith.mulf %698, %699 : vector<16x128xf32>
    %cst_257 = arith.constant 4.471500e-02 : f32
    %701 = vector.broadcast %cst_257 : f32 to vector<16x128xf32>
    %702 = arith.mulf %701, %700 : vector<16x128xf32>
    %703 = arith.addf %698, %702 : vector<16x128xf32>
    %cst_258 = arith.constant 0.797884583 : f32
    %704 = vector.broadcast %cst_258 : f32 to vector<16x128xf32>
    %705 = arith.mulf %704, %703 : vector<16x128xf32>
    %706 = math.tanh %705 : vector<16x128xf32>
    %cst_259 = arith.constant 1.000000e+00 : f32
    %707 = vector.broadcast %cst_259 : f32 to vector<16x128xf32>
    %708 = arith.addf %707, %706 : vector<16x128xf32>
    %cst_260 = arith.constant 5.000000e-01 : f32
    %709 = vector.broadcast %cst_260 : f32 to vector<16x128xf32>
    %710 = arith.mulf %709, %708 : vector<16x128xf32>
    %711 = arith.mulf %698, %710 : vector<16x128xf32>
    %c0_261 = arith.constant 0 : index
    %c0_262 = arith.constant 0 : index
    %c0_263 = arith.constant 0 : index
    %712 = vector.load %arg19[%c0_261, %c0_262, %c0_263] : memref<2x128x32xf32, #tpu.memory_space<vmem>>, vector<1x128x32xf32>
    %713 = vector.shape_cast %712 : vector<1x128x32xf32> to vector<128x32xf32>
    %cst_264 = arith.constant dense<0.000000e+00> : vector<16x32xf32>
    %714 = tpu.matmul %711, %713, %cst_264 {dimension_numbers = #tpu.dot_dimension_numbers<[1], [0], [0], [1], [0, 0, 1, 1], [], []>} : vector<16x128xf32>, vector<128x32xf32>, vector<16x32xf32> -> vector<16x32xf32>
    %715 = arith.addf %673, %714 : vector<16x32xf32>
    %716 = vector.broadcast %552 : vector<1x32xf32> to vector<16x32xf32>
    %717 = arith.addf %715, %716 : vector<16x32xf32>
    %c1_265 = arith.constant 1 : index
    %c0_266 = arith.constant 0 : index
    %c0_267 = arith.constant 0 : index
    %718 = vector.load %arg20[%c1_265, %c0_266, %c0_267] : memref<2x9x32xf32, #tpu.memory_space<vmem>>, vector<1x9x32xf32>
    %719 = vector.shape_cast %718 : vector<1x9x32xf32> to vector<9x32xf32>
    %720 = vector.extract_strided_slice %719 {offsets = [0, 0], sizes = [1, 32], strides = [1, 1]} : vector<9x32xf32> to vector<1x32xf32>
    %721 = vector.extract_strided_slice %719 {offsets = [1, 0], sizes = [1, 32], strides = [1, 1]} : vector<9x32xf32> to vector<1x32xf32>
    %722 = vector.extract_strided_slice %719 {offsets = [2, 0], sizes = [1, 32], strides = [1, 1]} : vector<9x32xf32> to vector<1x32xf32>
    %723 = vector.extract_strided_slice %719 {offsets = [3, 0], sizes = [1, 32], strides = [1, 1]} : vector<9x32xf32> to vector<1x32xf32>
    %724 = vector.extract_strided_slice %719 {offsets = [4, 0], sizes = [1, 32], strides = [1, 1]} : vector<9x32xf32> to vector<1x32xf32>
    %725 = vector.extract_strided_slice %719 {offsets = [5, 0], sizes = [1, 32], strides = [1, 1]} : vector<9x32xf32> to vector<1x32xf32>
    %726 = vector.extract_strided_slice %719 {offsets = [6, 0], sizes = [1, 32], strides = [1, 1]} : vector<9x32xf32> to vector<1x32xf32>
    %727 = vector.extract_strided_slice %719 {offsets = [7, 0], sizes = [1, 32], strides = [1, 1]} : vector<9x32xf32> to vector<1x32xf32>
    %728 = vector.extract_strided_slice %719 {offsets = [8, 0], sizes = [1, 32], strides = [1, 1]} : vector<9x32xf32> to vector<1x32xf32>
    %c1_268 = arith.constant 1 : index
    %c0_269 = arith.constant 0 : index
    %c0_270 = arith.constant 0 : index
    %729 = vector.load %arg21[%c1_268, %c0_269, %c0_270] : memref<2x1x128xf32, #tpu.memory_space<vmem>>, vector<1x1x128xf32>
    %730 = vector.shape_cast %729 : vector<1x1x128xf32> to vector<1x128xf32>
    %cst_271 = arith.constant dense<0.000000e+00> : vector<16xf32>
    %731 = vector.multi_reduction <add>, %717, %cst_271 [1] : vector<16x32xf32> to vector<16xf32>
    %732 = vector.shape_cast %731 : vector<16xf32> to vector<16x1xf32>
    %cst_272 = arith.constant 3.200000e+01 : f32
    %733 = vector.broadcast %cst_272 : f32 to vector<16x1xf32>
    %734 = arith.divf %732, %733 : vector<16x1xf32>
    %735 = vector.broadcast %734 : vector<16x1xf32> to vector<16x32xf32>
    %736 = arith.subf %717, %735 : vector<16x32xf32>
    %737 = arith.mulf %736, %736 : vector<16x32xf32>
    %cst_273 = arith.constant dense<0.000000e+00> : vector<16xf32>
    %738 = vector.multi_reduction <add>, %737, %cst_273 [1] : vector<16x32xf32> to vector<16xf32>
    %739 = vector.shape_cast %738 : vector<16xf32> to vector<16x1xf32>
    %cst_274 = arith.constant 3.200000e+01 : f32
    %740 = vector.broadcast %cst_274 : f32 to vector<16x1xf32>
    %741 = arith.divf %739, %740 : vector<16x1xf32>
    %cst_275 = arith.constant 9.99999974E-6 : f32
    %742 = vector.broadcast %cst_275 : f32 to vector<16x1xf32>
    %743 = arith.addf %741, %742 : vector<16x1xf32>
    %744 = math.rsqrt %743 : vector<16x1xf32>
    %745 = vector.broadcast %744 : vector<16x1xf32> to vector<16x32xf32>
    %746 = arith.mulf %736, %745 : vector<16x32xf32>
    %747 = vector.broadcast %720 : vector<1x32xf32> to vector<16x32xf32>
    %748 = arith.mulf %746, %747 : vector<16x32xf32>
    %749 = vector.broadcast %721 : vector<1x32xf32> to vector<16x32xf32>
    %750 = arith.addf %748, %749 : vector<16x32xf32>
    %c4_276 = arith.constant 4 : index
    %c0_277 = arith.constant 0 : index
    %c0_278 = arith.constant 0 : index
    %751 = vector.load %arg17[%c4_276, %c0_277, %c0_278] : memref<8x32x32xf32, #tpu.memory_space<vmem>>, vector<1x32x32xf32>
    %752 = vector.shape_cast %751 : vector<1x32x32xf32> to vector<32x32xf32>
    %cst_279 = arith.constant dense<0.000000e+00> : vector<16x32xf32>
    %753 = tpu.matmul %750, %752, %cst_279 {dimension_numbers = #tpu.dot_dimension_numbers<[1], [0], [0], [1], [0, 0, 1, 1], [], []>} : vector<16x32xf32>, vector<32x32xf32>, vector<16x32xf32> -> vector<16x32xf32>
    %754 = vector.broadcast %722 : vector<1x32xf32> to vector<16x32xf32>
    %755 = arith.addf %753, %754 : vector<16x32xf32>
    %c5_280 = arith.constant 5 : index
    %c0_281 = arith.constant 0 : index
    %c0_282 = arith.constant 0 : index
    %756 = vector.load %arg17[%c5_280, %c0_281, %c0_282] : memref<8x32x32xf32, #tpu.memory_space<vmem>>, vector<1x32x32xf32>
    %757 = vector.shape_cast %756 : vector<1x32x32xf32> to vector<32x32xf32>
    %cst_283 = arith.constant dense<0.000000e+00> : vector<16x32xf32>
    %758 = tpu.matmul %750, %757, %cst_283 {dimension_numbers = #tpu.dot_dimension_numbers<[1], [0], [0], [1], [0, 0, 1, 1], [], []>} : vector<16x32xf32>, vector<32x32xf32>, vector<16x32xf32> -> vector<16x32xf32>
    %759 = vector.broadcast %723 : vector<1x32xf32> to vector<16x32xf32>
    %760 = arith.addf %758, %759 : vector<16x32xf32>
    %c6_284 = arith.constant 6 : index
    %c0_285 = arith.constant 0 : index
    %c0_286 = arith.constant 0 : index
    %761 = vector.load %arg17[%c6_284, %c0_285, %c0_286] : memref<8x32x32xf32, #tpu.memory_space<vmem>>, vector<1x32x32xf32>
    %762 = vector.shape_cast %761 : vector<1x32x32xf32> to vector<32x32xf32>
    %cst_287 = arith.constant dense<0.000000e+00> : vector<16x32xf32>
    %763 = tpu.matmul %750, %762, %cst_287 {dimension_numbers = #tpu.dot_dimension_numbers<[1], [0], [0], [1], [0, 0, 1, 1], [], []>} : vector<16x32xf32>, vector<32x32xf32>, vector<16x32xf32> -> vector<16x32xf32>
    %764 = vector.broadcast %724 : vector<1x32xf32> to vector<16x32xf32>
    %765 = arith.addf %763, %764 : vector<16x32xf32>
    %766 = tpu.transpose %760, [1, 0] : vector<16x32xf32> -> vector<32x16xf32>
    %767 = vector.extract_strided_slice %755 {offsets = [0, 0], sizes = [16, 8], strides = [1, 1]} : vector<16x32xf32> to vector<16x8xf32>
    %768 = vector.extract_strided_slice %766 {offsets = [0, 0], sizes = [8, 16], strides = [1, 1]} : vector<32x16xf32> to vector<8x16xf32>
    %cst_288 = arith.constant dense<0.000000e+00> : vector<16x16xf32>
    %769 = tpu.matmul %767, %768, %cst_288 {dimension_numbers = #tpu.dot_dimension_numbers<[1], [0], [0], [1], [0, 0, 1, 1], [], []>} : vector<16x8xf32>, vector<8x16xf32>, vector<16x16xf32> -> vector<16x16xf32>
    %cst_289 = arith.constant 0.353553385 : f32
    %770 = vector.broadcast %cst_289 : f32 to vector<16x16xf32>
    %771 = arith.mulf %769, %770 : vector<16x16xf32>
    %cst_290 = arith.constant -1.000000e+30 : f32
    %772 = vector.broadcast %cst_290 : f32 to vector<16x16xf32>
    %773 = arith.select %541, %771, %772 : vector<16x16xi1>, vector<16x16xf32>
    %cst_291 = arith.constant dense<0xFF800000> : vector<16xf32>
    %774 = vector.multi_reduction <maximumf>, %773, %cst_291 [1] : vector<16x16xf32> to vector<16xf32>
    %775 = vector.shape_cast %774 : vector<16xf32> to vector<16x1xf32>
    %776 = vector.broadcast %775 : vector<16x1xf32> to vector<16x16xf32>
    %777 = arith.subf %773, %776 : vector<16x16xf32>
    %778 = math.exp %777 : vector<16x16xf32>
    %cst_292 = arith.constant dense<0.000000e+00> : vector<16xf32>
    %779 = vector.multi_reduction <add>, %778, %cst_292 [1] : vector<16x16xf32> to vector<16xf32>
    %780 = vector.shape_cast %779 : vector<16xf32> to vector<16x1xf32>
    %781 = tpu.reciprocal %780 {approx = true} : vector<16x1xf32> -> vector<16x1xf32>
    %782 = vector.broadcast %781 : vector<16x1xf32> to vector<16x16xf32>
    %783 = arith.mulf %778, %782 : vector<16x16xf32>
    %784 = vector.extract_strided_slice %765 {offsets = [0, 0], sizes = [16, 8], strides = [1, 1]} : vector<16x32xf32> to vector<16x8xf32>
    %cst_293 = arith.constant dense<0.000000e+00> : vector<16x8xf32>
    %785 = tpu.matmul %783, %784, %cst_293 {dimension_numbers = #tpu.dot_dimension_numbers<[1], [0], [0], [1], [0, 0, 1, 1], [], []>} : vector<16x16xf32>, vector<16x8xf32>, vector<16x8xf32> -> vector<16x8xf32>
    %786 = vector.extract_strided_slice %755 {offsets = [0, 8], sizes = [16, 8], strides = [1, 1]} : vector<16x32xf32> to vector<16x8xf32>
    %787 = vector.extract_strided_slice %766 {offsets = [8, 0], sizes = [8, 16], strides = [1, 1]} : vector<32x16xf32> to vector<8x16xf32>
    %cst_294 = arith.constant dense<0.000000e+00> : vector<16x16xf32>
    %788 = tpu.matmul %786, %787, %cst_294 {dimension_numbers = #tpu.dot_dimension_numbers<[1], [0], [0], [1], [0, 0, 1, 1], [], []>} : vector<16x8xf32>, vector<8x16xf32>, vector<16x16xf32> -> vector<16x16xf32>
    %cst_295 = arith.constant 0.353553385 : f32
    %789 = vector.broadcast %cst_295 : f32 to vector<16x16xf32>
    %790 = arith.mulf %788, %789 : vector<16x16xf32>
    %cst_296 = arith.constant -1.000000e+30 : f32
    %791 = vector.broadcast %cst_296 : f32 to vector<16x16xf32>
    %792 = arith.select %541, %790, %791 : vector<16x16xi1>, vector<16x16xf32>
    %cst_297 = arith.constant dense<0xFF800000> : vector<16xf32>
    %793 = vector.multi_reduction <maximumf>, %792, %cst_297 [1] : vector<16x16xf32> to vector<16xf32>
    %794 = vector.shape_cast %793 : vector<16xf32> to vector<16x1xf32>
    %795 = vector.broadcast %794 : vector<16x1xf32> to vector<16x16xf32>
    %796 = arith.subf %792, %795 : vector<16x16xf32>
    %797 = math.exp %796 : vector<16x16xf32>
    %cst_298 = arith.constant dense<0.000000e+00> : vector<16xf32>
    %798 = vector.multi_reduction <add>, %797, %cst_298 [1] : vector<16x16xf32> to vector<16xf32>
    %799 = vector.shape_cast %798 : vector<16xf32> to vector<16x1xf32>
    %800 = tpu.reciprocal %799 {approx = true} : vector<16x1xf32> -> vector<16x1xf32>
    %801 = vector.broadcast %800 : vector<16x1xf32> to vector<16x16xf32>
    %802 = arith.mulf %797, %801 : vector<16x16xf32>
    %803 = vector.extract_strided_slice %765 {offsets = [0, 8], sizes = [16, 8], strides = [1, 1]} : vector<16x32xf32> to vector<16x8xf32>
    %cst_299 = arith.constant dense<0.000000e+00> : vector<16x8xf32>
    %804 = tpu.matmul %802, %803, %cst_299 {dimension_numbers = #tpu.dot_dimension_numbers<[1], [0], [0], [1], [0, 0, 1, 1], [], []>} : vector<16x16xf32>, vector<16x8xf32>, vector<16x8xf32> -> vector<16x8xf32>
    %805 = vector.extract_strided_slice %755 {offsets = [0, 16], sizes = [16, 8], strides = [1, 1]} : vector<16x32xf32> to vector<16x8xf32>
    %806 = vector.extract_strided_slice %766 {offsets = [16, 0], sizes = [8, 16], strides = [1, 1]} : vector<32x16xf32> to vector<8x16xf32>
    %cst_300 = arith.constant dense<0.000000e+00> : vector<16x16xf32>
    %807 = tpu.matmul %805, %806, %cst_300 {dimension_numbers = #tpu.dot_dimension_numbers<[1], [0], [0], [1], [0, 0, 1, 1], [], []>} : vector<16x8xf32>, vector<8x16xf32>, vector<16x16xf32> -> vector<16x16xf32>
    %cst_301 = arith.constant 0.353553385 : f32
    %808 = vector.broadcast %cst_301 : f32 to vector<16x16xf32>
    %809 = arith.mulf %807, %808 : vector<16x16xf32>
    %cst_302 = arith.constant -1.000000e+30 : f32
    %810 = vector.broadcast %cst_302 : f32 to vector<16x16xf32>
    %811 = arith.select %541, %809, %810 : vector<16x16xi1>, vector<16x16xf32>
    %cst_303 = arith.constant dense<0xFF800000> : vector<16xf32>
    %812 = vector.multi_reduction <maximumf>, %811, %cst_303 [1] : vector<16x16xf32> to vector<16xf32>
    %813 = vector.shape_cast %812 : vector<16xf32> to vector<16x1xf32>
    %814 = vector.broadcast %813 : vector<16x1xf32> to vector<16x16xf32>
    %815 = arith.subf %811, %814 : vector<16x16xf32>
    %816 = math.exp %815 : vector<16x16xf32>
    %cst_304 = arith.constant dense<0.000000e+00> : vector<16xf32>
    %817 = vector.multi_reduction <add>, %816, %cst_304 [1] : vector<16x16xf32> to vector<16xf32>
    %818 = vector.shape_cast %817 : vector<16xf32> to vector<16x1xf32>
    %819 = tpu.reciprocal %818 {approx = true} : vector<16x1xf32> -> vector<16x1xf32>
    %820 = vector.broadcast %819 : vector<16x1xf32> to vector<16x16xf32>
    %821 = arith.mulf %816, %820 : vector<16x16xf32>
    %822 = vector.extract_strided_slice %765 {offsets = [0, 16], sizes = [16, 8], strides = [1, 1]} : vector<16x32xf32> to vector<16x8xf32>
    %cst_305 = arith.constant dense<0.000000e+00> : vector<16x8xf32>
    %823 = tpu.matmul %821, %822, %cst_305 {dimension_numbers = #tpu.dot_dimension_numbers<[1], [0], [0], [1], [0, 0, 1, 1], [], []>} : vector<16x16xf32>, vector<16x8xf32>, vector<16x8xf32> -> vector<16x8xf32>
    %824 = vector.extract_strided_slice %755 {offsets = [0, 24], sizes = [16, 8], strides = [1, 1]} : vector<16x32xf32> to vector<16x8xf32>
    %825 = vector.extract_strided_slice %766 {offsets = [24, 0], sizes = [8, 16], strides = [1, 1]} : vector<32x16xf32> to vector<8x16xf32>
    %cst_306 = arith.constant dense<0.000000e+00> : vector<16x16xf32>
    %826 = tpu.matmul %824, %825, %cst_306 {dimension_numbers = #tpu.dot_dimension_numbers<[1], [0], [0], [1], [0, 0, 1, 1], [], []>} : vector<16x8xf32>, vector<8x16xf32>, vector<16x16xf32> -> vector<16x16xf32>
    %cst_307 = arith.constant 0.353553385 : f32
    %827 = vector.broadcast %cst_307 : f32 to vector<16x16xf32>
    %828 = arith.mulf %826, %827 : vector<16x16xf32>
    %cst_308 = arith.constant -1.000000e+30 : f32
    %829 = vector.broadcast %cst_308 : f32 to vector<16x16xf32>
    %830 = arith.select %541, %828, %829 : vector<16x16xi1>, vector<16x16xf32>
    %cst_309 = arith.constant dense<0xFF800000> : vector<16xf32>
    %831 = vector.multi_reduction <maximumf>, %830, %cst_309 [1] : vector<16x16xf32> to vector<16xf32>
    %832 = vector.shape_cast %831 : vector<16xf32> to vector<16x1xf32>
    %833 = vector.broadcast %832 : vector<16x1xf32> to vector<16x16xf32>
    %834 = arith.subf %830, %833 : vector<16x16xf32>
    %835 = math.exp %834 : vector<16x16xf32>
    %cst_310 = arith.constant dense<0.000000e+00> : vector<16xf32>
    %836 = vector.multi_reduction <add>, %835, %cst_310 [1] : vector<16x16xf32> to vector<16xf32>
    %837 = vector.shape_cast %836 : vector<16xf32> to vector<16x1xf32>
    %838 = tpu.reciprocal %837 {approx = true} : vector<16x1xf32> -> vector<16x1xf32>
    %839 = vector.broadcast %838 : vector<16x1xf32> to vector<16x16xf32>
    %840 = arith.mulf %835, %839 : vector<16x16xf32>
    %841 = vector.extract_strided_slice %765 {offsets = [0, 24], sizes = [16, 8], strides = [1, 1]} : vector<16x32xf32> to vector<16x8xf32>
    %cst_311 = arith.constant dense<0.000000e+00> : vector<16x8xf32>
    %842 = tpu.matmul %840, %841, %cst_311 {dimension_numbers = #tpu.dot_dimension_numbers<[1], [0], [0], [1], [0, 0, 1, 1], [], []>} : vector<16x16xf32>, vector<16x8xf32>, vector<16x8xf32> -> vector<16x8xf32>
    %843 = tpu.concatenate %785, %804, %823, %842 in 1 : vector<16x8xf32>, vector<16x8xf32>, vector<16x8xf32>, vector<16x8xf32> -> vector<16x32xf32>
    %c7_312 = arith.constant 7 : index
    %c0_313 = arith.constant 0 : index
    %c0_314 = arith.constant 0 : index
    %844 = vector.load %arg17[%c7_312, %c0_313, %c0_314] : memref<8x32x32xf32, #tpu.memory_space<vmem>>, vector<1x32x32xf32>
    %845 = vector.shape_cast %844 : vector<1x32x32xf32> to vector<32x32xf32>
    %cst_315 = arith.constant dense<0.000000e+00> : vector<16x32xf32>
    %846 = tpu.matmul %843, %845, %cst_315 {dimension_numbers = #tpu.dot_dimension_numbers<[1], [0], [0], [1], [0, 0, 1, 1], [], []>} : vector<16x32xf32>, vector<32x32xf32>, vector<16x32xf32> -> vector<16x32xf32>
    %847 = arith.addf %717, %846 : vector<16x32xf32>
    %848 = vector.broadcast %725 : vector<1x32xf32> to vector<16x32xf32>
    %849 = arith.addf %847, %848 : vector<16x32xf32>
    %cst_316 = arith.constant dense<0.000000e+00> : vector<16xf32>
    %850 = vector.multi_reduction <add>, %849, %cst_316 [1] : vector<16x32xf32> to vector<16xf32>
    %851 = vector.shape_cast %850 : vector<16xf32> to vector<16x1xf32>
    %cst_317 = arith.constant 3.200000e+01 : f32
    %852 = vector.broadcast %cst_317 : f32 to vector<16x1xf32>
    %853 = arith.divf %851, %852 : vector<16x1xf32>
    %854 = vector.broadcast %853 : vector<16x1xf32> to vector<16x32xf32>
    %855 = arith.subf %849, %854 : vector<16x32xf32>
    %856 = arith.mulf %855, %855 : vector<16x32xf32>
    %cst_318 = arith.constant dense<0.000000e+00> : vector<16xf32>
    %857 = vector.multi_reduction <add>, %856, %cst_318 [1] : vector<16x32xf32> to vector<16xf32>
    %858 = vector.shape_cast %857 : vector<16xf32> to vector<16x1xf32>
    %cst_319 = arith.constant 3.200000e+01 : f32
    %859 = vector.broadcast %cst_319 : f32 to vector<16x1xf32>
    %860 = arith.divf %858, %859 : vector<16x1xf32>
    %cst_320 = arith.constant 9.99999974E-6 : f32
    %861 = vector.broadcast %cst_320 : f32 to vector<16x1xf32>
    %862 = arith.addf %860, %861 : vector<16x1xf32>
    %863 = math.rsqrt %862 : vector<16x1xf32>
    %864 = vector.broadcast %863 : vector<16x1xf32> to vector<16x32xf32>
    %865 = arith.mulf %855, %864 : vector<16x32xf32>
    %866 = vector.broadcast %726 : vector<1x32xf32> to vector<16x32xf32>
    %867 = arith.mulf %865, %866 : vector<16x32xf32>
    %868 = vector.broadcast %727 : vector<1x32xf32> to vector<16x32xf32>
    %869 = arith.addf %867, %868 : vector<16x32xf32>
    %c1_321 = arith.constant 1 : index
    %c0_322 = arith.constant 0 : index
    %c0_323 = arith.constant 0 : index
    %870 = vector.load %arg18[%c1_321, %c0_322, %c0_323] : memref<2x32x128xf32, #tpu.memory_space<vmem>>, vector<1x32x128xf32>
    %871 = vector.shape_cast %870 : vector<1x32x128xf32> to vector<32x128xf32>
    %cst_324 = arith.constant dense<0.000000e+00> : vector<16x128xf32>
    %872 = tpu.matmul %869, %871, %cst_324 {dimension_numbers = #tpu.dot_dimension_numbers<[1], [0], [0], [1], [0, 0, 1, 1], [], []>} : vector<16x32xf32>, vector<32x128xf32>, vector<16x128xf32> -> vector<16x128xf32>
    %873 = vector.broadcast %730 : vector<1x128xf32> to vector<16x128xf32>
    %874 = arith.addf %872, %873 : vector<16x128xf32>
    %875 = arith.mulf %874, %874 : vector<16x128xf32>
    %876 = arith.mulf %874, %875 : vector<16x128xf32>
    %cst_325 = arith.constant 4.471500e-02 : f32
    %877 = vector.broadcast %cst_325 : f32 to vector<16x128xf32>
    %878 = arith.mulf %877, %876 : vector<16x128xf32>
    %879 = arith.addf %874, %878 : vector<16x128xf32>
    %cst_326 = arith.constant 0.797884583 : f32
    %880 = vector.broadcast %cst_326 : f32 to vector<16x128xf32>
    %881 = arith.mulf %880, %879 : vector<16x128xf32>
    %882 = math.tanh %881 : vector<16x128xf32>
    %cst_327 = arith.constant 1.000000e+00 : f32
    %883 = vector.broadcast %cst_327 : f32 to vector<16x128xf32>
    %884 = arith.addf %883, %882 : vector<16x128xf32>
    %cst_328 = arith.constant 5.000000e-01 : f32
    %885 = vector.broadcast %cst_328 : f32 to vector<16x128xf32>
    %886 = arith.mulf %885, %884 : vector<16x128xf32>
    %887 = arith.mulf %874, %886 : vector<16x128xf32>
    %c1_329 = arith.constant 1 : index
    %c0_330 = arith.constant 0 : index
    %c0_331 = arith.constant 0 : index
    %888 = vector.load %arg19[%c1_329, %c0_330, %c0_331] : memref<2x128x32xf32, #tpu.memory_space<vmem>>, vector<1x128x32xf32>
    %889 = vector.shape_cast %888 : vector<1x128x32xf32> to vector<128x32xf32>
    %cst_332 = arith.constant dense<0.000000e+00> : vector<16x32xf32>
    %890 = tpu.matmul %887, %889, %cst_332 {dimension_numbers = #tpu.dot_dimension_numbers<[1], [0], [0], [1], [0, 0, 1, 1], [], []>} : vector<16x128xf32>, vector<128x32xf32>, vector<16x32xf32> -> vector<16x32xf32>
    %891 = arith.addf %849, %890 : vector<16x32xf32>
    %892 = vector.broadcast %728 : vector<1x32xf32> to vector<16x32xf32>
    %893 = arith.addf %891, %892 : vector<16x32xf32>
    %894 = tpu.iota {dimensions = array<i32: 1>} : vector<1x16xi32>
    %c0_333 = arith.constant 0 : index
    %895 = memref.load %arg22[%c0_333] : memref<2xi32, #tpu.memory_space<smem>>
    %896 = vector.broadcast %895 : i32 to vector<1x16xi32>
    %897 = arith.cmpi eq, %894, %896 : vector<1x16xi32>
    %cst_334 = arith.constant 1.000000e+00 : f32
    %cst_335 = arith.constant 0.000000e+00 : f32
    %898 = vector.broadcast %cst_334 : f32 to vector<1x16xf32>
    %899 = vector.broadcast %cst_335 : f32 to vector<1x16xf32>
    %900 = arith.select %897, %898, %899 : vector<1x16xi1>, vector<1x16xf32>
    %c1_336 = arith.constant 1 : index
    %901 = memref.load %arg22[%c1_336] : memref<2xi32, #tpu.memory_space<smem>>
    %902 = vector.broadcast %901 : i32 to vector<1x16xi32>
    %903 = arith.cmpi eq, %894, %902 : vector<1x16xi32>
    %cst_337 = arith.constant 1.000000e+00 : f32
    %cst_338 = arith.constant 0.000000e+00 : f32
    %904 = vector.broadcast %cst_337 : f32 to vector<1x16xf32>
    %905 = vector.broadcast %cst_338 : f32 to vector<1x16xf32>
    %906 = arith.select %903, %904, %905 : vector<1x16xi1>, vector<1x16xf32>
    %907 = tpu.concatenate %900, %906 in 0 : vector<1x16xf32>, vector<1x16xf32> -> vector<2x16xf32>
    %cst_339 = arith.constant dense<0.000000e+00> : vector<2x32xf32>
    %908 = tpu.matmul %907, %893, %cst_339 {dimension_numbers = #tpu.dot_dimension_numbers<[1], [0], [0], [1], [0, 0, 1, 1], [], []>} : vector<2x16xf32>, vector<16x32xf32>, vector<2x32xf32> -> vector<2x32xf32>
    %c0_340 = arith.constant 0 : index
    %c0_341 = arith.constant 0 : index
    %909 = vector.load %arg15[%c0_340, %c0_341] : memref<2x32xf32, #tpu.memory_space<vmem>>, vector<2x32xf32>
    %910 = vector.extract_strided_slice %909 {offsets = [0, 0], sizes = [1, 32], strides = [1, 1]} : vector<2x32xf32> to vector<1x32xf32>
    %911 = vector.extract_strided_slice %909 {offsets = [1, 0], sizes = [1, 32], strides = [1, 1]} : vector<2x32xf32> to vector<1x32xf32>
    %cst_342 = arith.constant dense<0.000000e+00> : vector<2xf32>
    %912 = vector.multi_reduction <add>, %908, %cst_342 [1] : vector<2x32xf32> to vector<2xf32>
    %913 = vector.shape_cast %912 : vector<2xf32> to vector<2x1xf32>
    %cst_343 = arith.constant 3.200000e+01 : f32
    %914 = vector.broadcast %cst_343 : f32 to vector<2x1xf32>
    %915 = arith.divf %913, %914 : vector<2x1xf32>
    %916 = vector.broadcast %915 : vector<2x1xf32> to vector<2x32xf32>
    %917 = arith.subf %908, %916 : vector<2x32xf32>
    %918 = arith.mulf %917, %917 : vector<2x32xf32>
    %cst_344 = arith.constant dense<0.000000e+00> : vector<2xf32>
    %919 = vector.multi_reduction <add>, %918, %cst_344 [1] : vector<2x32xf32> to vector<2xf32>
    %920 = vector.shape_cast %919 : vector<2xf32> to vector<2x1xf32>
    %cst_345 = arith.constant 3.200000e+01 : f32
    %921 = vector.broadcast %cst_345 : f32 to vector<2x1xf32>
    %922 = arith.divf %920, %921 : vector<2x1xf32>
    %cst_346 = arith.constant 9.99999974E-6 : f32
    %923 = vector.broadcast %cst_346 : f32 to vector<2x1xf32>
    %924 = arith.addf %922, %923 : vector<2x1xf32>
    %925 = math.rsqrt %924 : vector<2x1xf32>
    %926 = vector.broadcast %925 : vector<2x1xf32> to vector<2x32xf32>
    %927 = arith.mulf %917, %926 : vector<2x32xf32>
    %928 = vector.broadcast %910 : vector<1x32xf32> to vector<2x32xf32>
    %929 = arith.mulf %927, %928 : vector<2x32xf32>
    %930 = vector.broadcast %911 : vector<1x32xf32> to vector<2x32xf32>
    %931 = arith.addf %929, %930 : vector<2x32xf32>
    %c0_347 = arith.constant 0 : index
    %c0_348 = arith.constant 0 : index
    %932 = vector.load %arg16[%c0_347, %c0_348] : memref<32x16xf32, #tpu.memory_space<vmem>>, vector<32x16xf32>
    %cst_349 = arith.constant dense<0.000000e+00> : vector<2x16xf32>
    %933 = tpu.matmul %931, %932, %cst_349 {dimension_numbers = #tpu.dot_dimension_numbers<[1], [0], [0], [1], [0, 0, 1, 1], [], []>} : vector<2x32xf32>, vector<32x16xf32>, vector<2x16xf32> -> vector<2x16xf32>
    %934 = arith.mulf %502, %502 : vector<2x16xf32>
    %cst_350 = arith.constant dense<0.000000e+00> : vector<2xf32>
    %935 = vector.multi_reduction <add>, %934, %cst_350 [1] : vector<2x16xf32> to vector<2xf32>
    %936 = vector.shape_cast %935 : vector<2xf32> to vector<2x1xf32>
    %937 = math.rsqrt %936 : vector<2x1xf32>
    %938 = vector.broadcast %937 : vector<2x1xf32> to vector<2x16xf32>
    %939 = arith.mulf %502, %938 : vector<2x16xf32>
    %940 = arith.mulf %933, %933 : vector<2x16xf32>
    %cst_351 = arith.constant dense<0.000000e+00> : vector<2xf32>
    %941 = vector.multi_reduction <add>, %940, %cst_351 [1] : vector<2x16xf32> to vector<2xf32>
    %942 = vector.shape_cast %941 : vector<2xf32> to vector<2x1xf32>
    %943 = math.rsqrt %942 : vector<2x1xf32>
    %944 = vector.broadcast %943 : vector<2x1xf32> to vector<2x16xf32>
    %945 = arith.mulf %933, %944 : vector<2x16xf32>
    %c0_352 = arith.constant 0 : index
    %946 = memref.load %arg23[%c0_352] : memref<1xf32, #tpu.memory_space<smem>>
    %947 = vector.broadcast %946 : f32 to vector<2x2xf32>
    %948 = math.exp %947 : vector<2x2xf32>
    %cst_353 = arith.constant 1.000000e+02 : f32
    %949 = vector.broadcast %cst_353 : f32 to vector<2x2xf32>
    %950 = arith.minimumf %948, %949 : vector<2x2xf32>
    %cst_354 = arith.constant dense<0.000000e+00> : vector<2x2xf32>
    %951 = tpu.matmul %939, %945, %cst_354 {dimension_numbers = #tpu.dot_dimension_numbers<[1], [1], [0], [0], [0, 0, 1, 0], [], []>} : vector<2x16xf32>, vector<2x16xf32>, vector<2x2xf32> -> vector<2x2xf32>
    %952 = arith.mulf %950, %951 : vector<2x2xf32>
    %c0_355 = arith.constant 0 : index
    %c0_356 = arith.constant 0 : index
    %953 = vector.load %arg24[%c0_355, %c0_356] : memref<2x2xf32, #tpu.memory_space<vmem>>, vector<2x2xf32>
    tpu.vector_store %arg24[%c0_355, %c0_356], %952 {strides = array<i32>} : memref<2x2xf32, #tpu.memory_space<vmem>>, vector<2x2xf32>,
    return
  }
}

</mosaic_0001>

<bundles_post_ra>
// kernel: clip_forward.1
= control target key start
LH: loop header
LB: loop body
LE: loop exit
PB: predicated region body
PF: predicated region fallthrough
CT: control target
= control target key end

     0   :  { %s10743_s0 = inlined_call_operand.vmem [shape: f32[8,192], index: 0, kind: input, shape index: {}]   ;;  %s10744_s1 = inlined_call_operand.vmem [shape: f32[192,32], index: 1, kind: input, shape index: {}]   ;;  %s10745_s2 = inlined_call_operand.vmem [shape: f32[1,32], index: 2, kind: input, shape index: {}]   ;;  %s10746_s3 = inlined_call_operand.vmem [shape: f32[5,32], index: 3, kind: input, shape index: {}]   ;;  %s10747_s4 = inlined_call_operand.vmem [shape: f32[2,32], index: 4, kind: input, shape index: {}]   ;;  %s10748_s5 = inlined_call_operand.vmem [shape: f32[2,32], index: 5, kind: input, shape index: {}]   ;;  %s10749_s6 = inlined_call_operand.vmem [shape: f32[32,16], index: 6, kind: input, shape index: {}]   ;;  %s10750_s7 = inlined_call_operand.vmem [shape: f32[8,32,32], index: 7, kind: input, shape index: {}]   ;;  %s10751_s8 = inlined_call_operand.vmem [shape: f32[2,32,128], index: 8, kind: input, shape index: {}]   ;;  %s10752_s9 = inlined_call_operand.vmem [shape: f32[2,128,32], index: 9, kind: input, shape index: {}]   ;;  %s10753_s10 = inlined_call_operand.vmem [shape: f32[2,9,32], index: 10, kind: input, shape index: {}]   ;;  %s10754_s11 = inlined_call_operand.vmem [shape: f32[2,1,128], index: 11, kind: input, shape index: {}]   ;;  %s10755_s12 = inlined_call_operand.vmem [shape: s32[16,1], index: 12, kind: input, shape index: {}]   ;;  %s10756_s13 = inlined_call_operand.vmem [shape: f32[64,32], index: 13, kind: input, shape index: {}]   ;;  %s10757_s14 = inlined_call_operand.vmem [shape: f32[8,32], index: 14, kind: input, shape index: {}]   ;;  %s10758_s15 = inlined_call_operand.vmem [shape: f32[2,32], index: 15, kind: input, shape index: {}]   ;;  %s10759_s16 = inlined_call_operand.vmem [shape: f32[32,16], index: 16, kind: input, shape index: {}]   ;;  %s10760_s17 = inlined_call_operand.vmem [shape: f32[8,32,32], index: 17, kind: input, shape index: {}]   ;;  %s10761_s18 = inlined_call_operand.vmem [shape: f32[2,32,128], index: 18, kind: input, shape index: {}]   ;;  %s10762_s19 = inlined_call_operand.vmem [shape: f32[2,128,32], index: 19, kind: input, shape index: {}]   ;;  %s10763_s20 = inlined_call_operand.vmem [shape: f32[2,9,32], index: 20, kind: input, shape index: {}]   ;;  %s10764_s21 = inlined_call_operand.vmem [shape: f32[2,1,128], index: 21, kind: input, shape index: {}]   ;;  %s10765_s22 = inlined_call_operand.vmem [shape: s32[2], index: 22, kind: input, shape index: {}]   ;;  %s10766_s23 = inlined_call_operand.<no memory space> [shape: f32[1], index: 23, kind: input, shape index: {}]   ;;  %s10767_s24 = inlined_call_operand.vmem [shape: f32[2,2], index: 24, kind: output, shape index: {}]  }
   0x1   :  { %10777 = sst [smem:[#allocation6_spill]] %s10743_s0 }
   0x2   :  { %10778 = sst [smem:[#allocation7_spill]] %s10744_s1 }
   0x3   :  { %10779 = sst [smem:[#allocation8_spill]] %s10745_s2 }
   0x4   :  { %10780 = sst [smem:[#allocation9_spill]] %s10746_s3 }
   0x5   :  { %10781 = sst [smem:[#allocation10_spill]] %s10747_s4 }
   0x6   :  { %10782 = sst [smem:[#allocation11_spill]] %s10748_s5 }
   0x7   :  { %10783 = sst [smem:[#allocation12_spill]] %s10749_s6 }
   0x8   :  { %10784 = sst [smem:[#allocation13_spill]] %s10750_s7 }
   0x9   :  { %10785 = sst [smem:[#allocation14_spill]] %s10751_s8 }
   0xa   :  { %30 = vsyncpa [#allocation4], 0  ;;  %s81_s27 = sshll.u32 %s10765_s22, 4  ;;  %s82_s27 = int_to_ptr.vmem [resolvable:$true] %s81_s27 }
   0xb   :  { %s9111_s28 = scalar_lea.vmem %s82_s27, 16  ;;  %p9116_p1 = scmp.lt.s32.totalorder %s82_s27, %s82_s27 }
   0xc   :  { %p9112_p0 = scmp.ne.s32.totalorder %s82_s27, %s9111_s28  ;;  %p9117_p2 = scmp.lt.s32.totalorder %s9111_s28, %s9111_s28 }
   0xe   :  { %p9118_p3 = por %p9117_p2, %p9116_p1 }
  0x10   :  { %p9119_p4 = pnand %p9118_p3, %p9112_p0 }
  0x12   :  { %9122 = shalt.err (!%p9119_p4)
}
  0x13   :  { %s9125_s6 = smov [#allocation3]  }
  0x14   :  { %84 = dma.vmem_to_smem %s82_s27, 16, %s9125_s6, [#allocation4]  }
  0x15   :  { %9123 = dma.done.wait [#allocation4], 16  }
  0x16   :  { %9124 = vsyncadd [#allocation4], 4294967280 }
  0x17   :  { %90 = sfence }
  0x18   :  { %s10786_s0 = sld [smem:[#allocation7_spill]]  ;;  %v9126_v3 = vmov 0.0|0.0   ;;  %vm118_vm0 = vcmask 523264   ;;  %s10787_s30 = sld [smem:[#allocation6_spill]]  ;;  %v192_v39 = vlaneseq  ;;  %v9127_v43 = vmov 0.0  }
  0x19   :  { %8266 = vmatprep.subr.bf16.mxu0 %v9126_v3  ;;  %vm225_vm6 = vcmask 64512   ;;  %s10788_s5 = sld [smem:[#allocation9_spill]]  ;;  %vm351_vm14 = vcmask 1044480   ;;  %vm344_vm15 = vcmask 39936   ;;  %s10789_s28 = sld [smem:[#allocation8_spill]] }
  0x1a   :  { %v9355_v40 = vshrl.u32 %v192_v39, 7  ;;  %v9357_v41 = vand.u32 127, %v192_v39  ;;  %s10790_s29 = sld [smem:[#allocation10_spill]]  ;;  %s10791_s3 = sld [smem:[#allocation13_spill]] }
  0x1b   :  { %s9129_s6 = smov 120   ;;  %s9130_s2 = smov 104  }
  0x1c   :  { %v6992_v42 = vadd.s32 4294967295, %v9355_v40  ;;  %vm197_vm1 = vcmp.ge.s32.totalorder %v9355_v40, 1  ;;  %vm199_vm2 = vcmp.lt.s32.totalorder %v9355_v40, 5  ;;  %v9368_v45 = vadd.s32 8, %v9355_v40  ;;  %s9131_s8 = smov 8   ;;  %s10773_s26 = smov 24  }
  0x1d   :  { %vm201_vm3 = vmand %vm197_vm1, %vm199_vm2  ;;  %vm328_vm11 = vcmp.eq.s32.totalorder %v9357_v41, %v9355_v40  ;;  %s10796_s7 = sld [smem:[#allocation14_spill]]  ;;  %s10797_s4 = smov 16  }
  0x1e   :  { %v94_v0 = vld [vmem:[%s10786_s0] sm:$0xff]  ;;  %v95_v1 = vld [vmem:[%s10786_s0 + $0x8] sm:$0xff]  ;;  %v96_v2 = vld [vmem:[%s10786_s0 + $0x10] sm:$0xff]  ;;  %vm205_vm4 = vcmp.eq.s32.totalorder %v9357_v41, %v6992_v42  ;;  %v6995_v46 = vadd.s32 4294967291, %v9368_v45  ;;  %vm210_vm7 = vcmp.ge.s32.totalorder %v9368_v45, 9  ;;  %vm212_vm8 = vcmp.lt.s32.totalorder %v9368_v45, 13 }
  0x1f   :  { %v8267_v4 = vpack.c.bf16 %v95_v1, %v94_v0  ;;  %v97_v5 = vld [vmem:[%s10786_s0 + $0x18] sm:$0xff]  ;;  %v98_v7 = vld [vmem:[%s10786_s0 + $0x20] sm:$0xff]  ;;  %v99_v8 = vld [vmem:[%s10786_s0 + $0x28] sm:$0xff]  ;;  %s10798_s25 = smov 24  }
  0x20   :  { %v8270_v6 = vpack.c.bf16 %v97_v5, %v96_v2  ;;  %v8273_v9 = vpack.c.bf16 %v99_v8, %v98_v7  ;;  %v100_v10 = vld [vmem:[%s10786_s0 + $0x30] sm:$0xff]  ;;  %v101_v11 = vld [vmem:[%s10786_s0 + $0x38] sm:$0xff]  ;;  %v93_v12 = vld [vmem:[%s10787_s30 + $0x8] sm:$0xff]  ;;  %vm218_vm10 = vcmp.eq.s32.totalorder %v9357_v41, %v6995_v46 }
  0x21   :  { %8268 = vmatpush1.bf16.msra.mxu0 %v8267_v4  ;;  %6991 = vmatprep.mubr.msk.f32.mxu0 %vm118_vm0, %v93_v12  ;;  %v8276_v13 = vpack.c.bf16 %v101_v11, %v100_v10  ;;  %v102_v14 = vld [vmem:[%s10786_s0 + $0x40] sm:$0xff]  ;;  %v103_v15 = vld [vmem:[%s10786_s0 + $0x48] sm:$0xff]  ;;  %v104_v17 = vld [vmem:[%s10786_s0 + $0x50] sm:$0xff] }
  0x22   :  { %8269 = vmatprep.subr.bf16.mxu0 %v9126_v3  ;;  %v8279_v16 = vpack.c.bf16 %v103_v15, %v102_v14  ;;  %v105_v18 = vld [vmem:[%s10786_s0 + $0x58] sm:$0xff]  ;;  %v106_v20 = vld [vmem:[%s10786_s0 + $0x60] sm:$0xff]  ;;  %v107_v21 = vld [vmem:[%s10786_s0 + $0x68] sm:$0xff] }
  0x23   :  { %v8282_v19 = vpack.c.bf16 %v105_v18, %v104_v17  ;;  %v8285_v22 = vpack.c.bf16 %v107_v21, %v106_v20  ;;  %v108_v23 = vld [vmem:[%s10786_s0 + $0x70] sm:$0xff]  ;;  %v109_v24 = vld [vmem:[%s10786_s0 + $0x78] sm:$0xff]  ;;  %v110_v26 = vld [vmem:[%s10786_s0 + $0x80] sm:$0xff]  ;;  %v9407_v17 = vsub.s32 0, %v9355_v40 }
  0x24   :  { %v8288_v25 = vpack.c.bf16 %v109_v24, %v108_v23  ;;  %v111_v27 = vld [vmem:[%s10786_s0 + $0x88] sm:$0xff]  ;;  %v112_v29 = vld [vmem:[%s10786_s0 + $0x90] sm:$0xff]  ;;  %v113_v30 = vld [vmem:[%s10786_s0 + $0x98] sm:$0xff] }
  0x25   :  { %8271 = vmatpush1.bf16.msra.mxu0 %v8270_v6  ;;  %v8291_v28 = vpack.c.bf16 %v111_v27, %v110_v26  ;;  %v8294_v31 = vpack.c.bf16 %v113_v30, %v112_v29  ;;  %v114_v32 = vld [vmem:[%s10786_s0 + $0xa0] sm:$0xff]  ;;  %v115_v33 = vld [vmem:[%s10786_s0 + $0xa8] sm:$0xff]  ;;  %v116_v35 = vld [vmem:[%s10786_s0 + $0xb0] sm:$0xff] }
  0x26   :  { %8272 = vmatprep.subr.bf16.mxu0 %v9126_v3  ;;  %v8297_v34 = vpack.c.bf16 %v115_v33, %v114_v32  ;;  %v117_v36 = vld [vmem:[%s10786_s0 + $0xb8] sm:$0xff]  ;;  %v92_v38 = vld [vmem:[%s10787_s30] sm:$0xff]  ;;  %vm207_vm5 = vmand %vm201_vm3, %vm205_vm4  ;;  %vm310_vm3 = vcmp.eq.s32.totalorder %v9368_v45, 8  ;;  %vm435_vm4 = vcmask 261120  }
  0x27   :  { %v8300_v37 = vpack.c.bf16 %v117_v36, %v116_v35  ;;  %v223_v44 = vsel %vm207_vm5, 1.0, %v9127_v43  ;;  %vm214_vm9 = vmand %vm210_vm7, %vm212_vm8  ;;  %v91_v49 = vld [vmem:[%s10788_s5] sm:$0x1f]  ;;  %v314_v55 = vsel %vm310_vm3, 1.0, %v9127_v43  ;;  %vm488_vm7 = vcmp.ge.s32.totalorder %v9357_v41, 8  ;;  %s10775_s5 = smov 16  }
  0x28   :  { %7614 = vmatprep.mubr.msk.f32.mxu1 %vm225_vm6, %v223_v44  ;;  %vm220_vm12 = vmand %vm214_vm9, %vm218_vm10  ;;  %v6998_v53 = vld [vmem:[%s10789_s28] ss:$0 sm:$0xff]  ;;  %vm884_vm10 = vcmask 130048   ;;  %s9128_s28 = smov 112  }
  0x29   :  { %8274 = vmatpush1.bf16.msra.mxu0 %v8273_v9  ;;  %vm330_vm13 = vmand %vm199_vm2, %vm328_vm11  ;;  %v224_v48 = vsel %vm220_vm12, 1.0, %v9127_v43  ;;  %vm307_vm2 = vcmp.eq.s32.totalorder %v9355_v40, 0  ;;  %v323_v57 = vmul.f32 %v6998_v53, %v314_v55  ;;  %v434_v18 = vld [vmem:[%s10790_s29] sm:$0x3]  ;;  %vm1630_vm12 = vcmask 195584   ;;  %s10799_s29 = sld [smem:[#allocation12_spill]] }
  0x2a   :  { %8275 = vmatprep.subr.bf16.mxu0 %v9126_v3  ;;  %v342_v51 = vsel %vm330_vm13, 1.0, %v9127_v43  ;;  %vm339_vm1 = vmand %vm212_vm8, %vm328_vm11  ;;  %v313_v54 = vsel %vm307_vm2, 1.0, %v9127_v43  ;;  %v466_v20 = vrot.slane %v434_v18, %v9407_v17  ;;  %v536_v46 = vld [vmem:[%s10791_s3] sm:$0xff]  ;;  %vm489_vm8 = vcmp.lt.s32.totalorder %v9357_v41, 13 }
  0x2b   :  { %v343_v52 = vsel %vm339_vm1, 1.0, %v9127_v43  ;;  %v322_v56 = vmul.f32 %v6998_v53, %v313_v54  ;;  %v7006_v53 = vld [vmem:[%s10791_s3 + $0x28] sm:$0xff]  ;;  %vm9496_vm5 = vmpackc.low %vm225_vm6, %vm225_vm6  ;;  %vm480_vm11 = vcmp.lt.s32.totalorder %v9357_v41, 5  ;;  %vm9134_vm13 = vmmov 0  }
  0x2c   :  { %vm9513_vm9 = vmand %vm488_vm7, %vm489_vm8  ;;  %vm3745_vm8 = vcmp.le.s32.totalorder %v9357_v41, %v9368_v45 }
  0x2d   :  { %8277 = vmatpush1.bf16.msra.mxu0 %v8276_v13 }
  0x2e   :  { %8278 = vmatprep.subr.bf16.mxu0 %v9126_v3 }
  0x31   :  { %8280 = vmatpush1.bf16.msra.mxu0 %v8279_v16 }
  0x32   :  { %8281 = vmatprep.subr.bf16.mxu0 %v9126_v3 }
  0x35   :  { %8283 = vmatpush1.bf16.msra.mxu0 %v8282_v19  ;;  %v9413_v19 = vsub.s32 1, %v9355_v40 }
  0x36   :  { %8284 = vmatprep.subr.bf16.mxu0 %v9126_v3 }
  0x37   :  { %v472_v23 = vrot.slane %v434_v18, %v9413_v19 }
  0x39   :  { %8286 = vmatpush1.bf16.msra.mxu0 %v8285_v22 }
  0x3a   :  { %8287 = vmatprep.subr.bf16.mxu0 %v9126_v3 }
  0x3d   :  { %8289 = vmatpush1.bf16.msra.mxu0 %v8288_v25 }
  0x3e   :  { %8290 = vmatprep.subr.bf16.mxu0 %v9126_v3 }
  0x41   :  { %8292 = vmatpush1.bf16.msra.mxu0 %v8291_v28 }
  0x42   :  { %8293 = vmatprep.subr.bf16.mxu0 %v9126_v3 }
  0x45   :  { %8295 = vmatpush1.bf16.msra.mxu0 %v8294_v31 }
  0x46   :  { %8296 = vmatprep.subr.bf16.mxu0 %v9126_v3 }
  0x49   :  { %8298 = vmatpush1.bf16.msra.mxu0 %v8297_v34 }
  0x4a   :  { %8299 = vmatprep.subr.bf16.mxu0 %v9126_v3 }
  0x4d   :  { %8301 = vmatpush1.bf16.msra.mxu0 %v8300_v37 }
  0x50   :  { %187 = vmatmul.mubr.f32.vlgmr.msra.gmra.mrb[0].mxu0 %v92_v38 }
 0x123   :  { %v188_v47 = vpop.f32.mrb[0].mxu0 }
 0x124   :  { %v190_v50 = vpop.f32.mrb[1].mxu0  ;;  %7612 = vmatprep.subr.mxu1 %v188_v47 }
 0x125   :  { %7613 = vmatpush3.msra.mxu1 %v188_v47  ;;  %v537_v47 = vld [vmem:[%s10791_s3 + $0x8] sm:$0xff]  ;;  %v539_v50 = vld [vmem:[%s10791_s3 + $0x18] sm:$0xff] }
 0x126   :  { %7615 = vmatmul.mubr.msk.f32.vlgmr.msra.gmra.mrb[0].mxu1 %vm225_vm6, %v224_v48  ;;  %7617 = vmatprep.subr.msk.mxu1 %vm351_vm14, %v91_v49  ;;  %v8302_v48 = vpack.c.bf16 %v537_v47, %v536_v46 }
 0x127   :  { %7618 = vmatpush3.msk.msra.mxu1 %vm351_vm14, %v91_v49  ;;  %7619 = vmatprep.mubr.msk.f32.mxu1 %vm344_vm15, %v342_v51  ;;  %v538_v49 = vld [vmem:[%s10791_s3 + $0x10] sm:$0xff] }
 0x128   :  { %8303 = vmatprep.subr.bf16.mxu1 %v8302_v48  ;;  %v8306_v51 = vpack.c.bf16 %v539_v50, %v538_v49 }
 0x12e   :  { %7620 = vmatmul.mubr.msk.f32.vlgmr.msra.gmra.mrb[0].mxu1 %vm344_vm15, %v343_v52  ;;  %v7005_v52 = vld [vmem:[%s10791_s3 + $0x20] sm:$0xff]  ;;  %vm3531_vm15 = vcmask 254976  }
 0x12f   :  { %8305 = vmatpush3.bf16.msra.mxu1 %v8302_v48  ;;  %v8310_v54 = vpack.c.bf16 %v7006_v53, %v7005_v52 }
 0x130   :  { %8307 = vmatprep.subr.bf16.mxu1 %v8306_v51 }
 0x133   :  { %8309 = vmatpush3.bf16.msra.mxu1 %v8306_v51 }
 0x134   :  { %8311 = vmatprep.subr.bf16.mxu1 %v8310_v54 }
 0x201   :  { %v7621_v58 = vpop.f32.mrb[0].mxu1 }
 0x202   :  { %v421_v59 = vpop.f32.mrb[1].mxu1  ;;  %v8784_v61 = vadd.f32 %v7621_v58, %v323_v57 }
 0x203   :  { %v8785_v60 = vadd.f32 %v421_v59, %v322_v56 }
 0x204   :  { %v439_v63 = vsel %vm435_vm4, %v8784_v61, 0.0 }
 0x205   :  { %v436_v62 = vsel %vm435_vm4, %v8785_v60, 0.0 }
 0x206   :  { %437 = vadd.xlane.f32.xlu0 %v436_v62 }
 0x20a   :  { %440 = vadd.xlane.f32.xlu0 %v439_v63 }
 0x293   :  { %v438_v0 = vpop.xlane.xlu0 %437 }
 0x294   :  { %v443_v1 = vmul.f32 0.03125, %v438_v0 }
 0x296   :  { %v445_v2 = vsub.f32 %v8785_v60, %v443_v1 }
 0x297   :  { %v441_v4 = vpop.xlane.xlu0 %440 }
 0x298   :  { %v444_v5 = vmul.f32 0.03125, %v441_v4  ;;  %v447_v6 = vmul.f32 %v445_v2, %v445_v2 }
 0x29a   :  { %v446_v7 = vsub.f32 %v8784_v61, %v444_v5  ;;  %v449_v8 = vsel %vm435_vm4, %v447_v6, 0.0  ;;  %v9450_v61 = vld [vmem:[%s10753_s10] sm:$0xff] }
 0x29b   :  { %450 = vadd.xlane.f32.xlu1 %v449_v8  ;;  %v527_v62 = vrot.slane %v9450_v61, %v9407_v17  ;;  %v533_v1 = vrot.slane %v9450_v61, %v9413_v19  ;;  %v7008_v8 = vld [vmem:[%s10791_s3 + $0x38] sm:$0xff] }
 0x29c   :  { %v448_v9 = vmul.f32 %v446_v7, %v446_v7 }
 0x29e   :  { %v452_v10 = vsel %vm435_vm4, %v448_v9, 0.0 }
 0x29f   :  { %453 = vadd.xlane.f32.xlu1 %v452_v10 }
 0x328   :  { %v451_v11 = vpop.xlane.xlu1 %450 }
 0x329   :  { %v455_v12 = vmul.f32 0.03125, %v451_v11 }
 0x32b   :  { %v457_v13 = vadd.f32 1e-05, %v455_v12  ;;  %v7011_v12 = vld [vmem:[%s10791_s3 + $0x40] sm:$0xff] }
 0x32c   :  { %v454_v14 = vpop.xlane.xlu1 %453 }
 0x32d   :  { %8921 = vrsqrt.f32 %v457_v13  ;;  %v456_v15 = vmul.f32 0.03125, %v454_v14  ;;  %v7012_v13 = vld [vmem:[%s10791_s3 + $0x48] sm:$0xff] }
 0x32e   :  { %v8318_v14 = vpack.c.bf16 %v7012_v13, %v7011_v12 }
 0x32f   :  { %v458_v16 = vadd.f32 1e-05, %v456_v15  ;;  %v7013_v15 = vld [vmem:[%s10791_s3 + $0x50] sm:$0xff] }
 0x331   :  { %8923 = vrsqrt.f32 %v458_v16  ;;  %v7014_v16 = vld [vmem:[%s10791_s3 + $0x58] sm:$0xff] }
 0x332   :  { %v8322_v18 = vpack.c.bf16 %v7014_v16, %v7013_v15 }
 0x337   :  { %v8922_v21 = vpop.eup %8921 }
 0x338   :  { %v461_v22 = vmul.f32 %v8922_v21, %v445_v2 }
 0x33a   :  { %v467_v24 = vmul.f32 %v466_v20, %v461_v22 }
 0x33b   :  { %v8924_v25 = vpop.eup %8923 }
 0x33c   :  { %v9417_v26 = vadd.f32 %v472_v23, %v467_v24  ;;  %v462_v27 = vmul.f32 %v8924_v25, %v446_v7  ;;  %v7007_v7 = vld [vmem:[%s10791_s3 + $0x30] sm:$0xff]  ;;  %v9486_v24 = vsub.s32 3, %v9355_v40 }
 0x33d   :  { %v8314_v11 = vpack.c.bf16 %v7008_v8, %v7007_v7 }
 0x33e   :  { %v498_v28 = vsel %vm435_vm4, %v9417_v26, 0.0  ;;  %v468_v29 = vmul.f32 %v466_v20, %v462_v27  ;;  %v9481_v20 = vsub.s32 2, %v9355_v40  ;;  %v633_v27 = vrot.slane %v9450_v61, %v9486_v24 }
 0x33f   :  { %499 = vadd.xlane.f32.xlu0 %v498_v28 }
 0x340   :  { %v9421_v30 = vadd.f32 %v472_v23, %v468_v29  ;;  %v543_v21 = vrot.slane %v9450_v61, %v9481_v20 }
 0x342   :  { %v501_v31 = vsel %vm435_vm4, %v9421_v30, 0.0 }
 0x343   :  { %502 = vadd.xlane.f32.xlu1 %v501_v31 }
 0x3cc   :  { %v500_v32 = vpop.xlane.xlu0 %499 }
 0x3cd   :  { %v504_v33 = vmul.f32 0.03125, %v500_v32  ;;  %v9492_v32 = vsub.s32 4, %v9355_v40 }
 0x3cf   :  { %v506_v34 = vsub.f32 %v9417_v26, %v504_v33 }
 0x3d0   :  { %v503_v35 = vpop.xlane.xlu1 %502 }
 0x3d1   :  { %v505_v36 = vmul.f32 0.03125, %v503_v35  ;;  %v508_v37 = vmul.f32 %v506_v34, %v506_v34 }
 0x3d3   :  { %v507_v38 = vsub.f32 %v9421_v30, %v505_v36  ;;  %v510_v39 = vsel %vm435_vm4, %v508_v37, 0.0  ;;  %v717_v37 = vrot.slane %v9450_v61, %v9492_v32 }
 0x3d4   :  { %511 = vadd.xlane.f32.xlu0 %v510_v39 }
 0x3d5   :  { %v509_v42 = vmul.f32 %v507_v38, %v507_v38 }
 0x3d7   :  { %v513_v44 = vsel %vm435_vm4, %v509_v42, 0.0 }
 0x3d8   :  { %514 = vadd.xlane.f32.xlu1 %v513_v44 }
 0x461   :  { %v512_v55 = vpop.xlane.xlu0 %511 }
 0x462   :  { %v516_v56 = vmul.f32 0.03125, %v512_v55 }
 0x464   :  { %v518_v57 = vadd.f32 1e-05, %v516_v56 }
 0x465   :  { %v515_v58 = vpop.xlane.xlu1 %514 }
 0x466   :  { %8925 = vrsqrt.f32 %v518_v57  ;;  %v517_v59 = vmul.f32 0.03125, %v515_v58 }
 0x468   :  { %v519_v60 = vadd.f32 1e-05, %v517_v59 }
 0x46a   :  { %8927 = vrsqrt.f32 %v519_v60 }
 0x470   :  { %v8926_v63 = vpop.eup %8925 }
 0x471   :  { %v522_v0 = vmul.f32 %v8926_v63, %v506_v34 }
 0x473   :  { %v528_v2 = vmul.f32 %v527_v62, %v522_v0 }
 0x474   :  { %v8928_v4 = vpop.eup %8927 }
 0x475   :  { %v523_v5 = vmul.f32 %v8928_v4, %v507_v38  ;;  %v534_v6 = vadd.f32 %v533_v1, %v528_v2 }
 0x477   :  { %v529_v9 = vmul.f32 %v527_v62, %v523_v5  ;;  %7630 = vmatprep.mubr.msk.f32.mxu1 %vm435_vm4, %v534_v6 }
 0x479   :  { %v535_v10 = vadd.f32 %v533_v1, %v529_v9 }
 0x47b   :  { %7631 = vmatmul.mubr.msk.f32.vlgmr.msra.gmra.mrb[2].mxu1 %vm435_vm4, %v535_v10 }
 0x47c   :  { %8313 = vmatpush3.bf16.msra.mxu1 %v8310_v54  ;;  %7641 = vmatprep.mubr.msk.f32.mxu1 %vm435_vm4, %v534_v6 }
 0x47d   :  { %8315 = vmatprep.subr.bf16.mxu1 %v8314_v11 }
 0x480   :  { %8317 = vmatpush3.bf16.msra.mxu1 %v8314_v11 }
 0x481   :  { %8319 = vmatprep.subr.bf16.mxu1 %v8318_v14 }
 0x483   :  { %7642 = vmatmul.mubr.msk.f32.vlgmr.msra.gmra.mrb[4].mxu1 %vm435_vm4, %v535_v10 }
 0x484   :  { %8321 = vmatpush3.bf16.msra.mxu1 %v8318_v14  ;;  %7652 = vmatprep.mubr.msk.f32.mxu1 %vm435_vm4, %v534_v6 }
 0x485   :  { %8323 = vmatprep.subr.bf16.mxu1 %v8322_v18 }
 0x488   :  { %8325 = vmatpush3.bf16.msra.mxu1 %v8322_v18 }
 0x48b   :  { %7653 = vmatmul.mubr.msk.f32.vlgmr.msra.gmra.mrb[6].mxu1 %vm435_vm4, %v535_v10 }
 0x54e   :  { %v7632_v22 = vpop.f32.mrb[2].mxu1 }
 0x54f   :  { %v616_v23 = vpop.f32.mrb[3].mxu1  ;;  %v622_v46 = vadd.f32 %v7632_v22, %v543_v21 }
 0x550   :  { %v617_v25 = vadd.f32 %v616_v23, %v543_v21 }
 0x552   :  { %7659 = vmatprep.mubr.msk.f32.mxu1 %vm225_vm6, %v617_v25 }
 0x556   :  { %v7643_v28 = vpop.f32.mrb[4].mxu1 }
 0x557   :  { %v706_v29 = vadd.f32 %v7643_v28, %v633_v27  ;;  %v700_v31 = vpop.f32.mrb[5].mxu1 }
 0x558   :  { %v701_v33 = vadd.f32 %v700_v31, %v633_v27 }
 0x55a   :  { %v8326_v35 = vpack.c.bf16 %v706_v29, %v701_v33  ;;  %v8804_v36 = vpack.i.bf16 %v706_v29, %v701_v33 }
 0x55c   :  { %8328 = vmatprep.subr.msk.bf16.mxu1 %vm9496_vm5, %v8326_v35 }
 0x55d   :  { %8331 = vmatpush3.bf16.xpose.msk.msra.mxu1 %vm9496_vm5, %v8326_v35 }
 0x55e   :  { %v7654_v38 = vpop.f32.mrb[6].mxu1 }
 0x55f   :  { %v790_v39 = vadd.f32 %v7654_v38, %v717_v37  ;;  %v784_v42 = vpop.f32.mrb[7].mxu1 }
 0x560   :  { %v785_v44 = vadd.f32 %v784_v42, %v717_v37 }
 0x562   :  { %v8332_v47 = vpack.c.bf16 %v790_v39, %v785_v44  ;;  %v9506_v48 = vpack.i.bf16 %v790_v39, %v785_v44 }
 0x564   :  { %7660 = vmatmul.mubr.msk.f32.vlgmr.msra.gmra.mrb[8].mxu1 %vm225_vm6, %v622_v46  ;;  %8333 = vmatprep.subr.bf16.mxu1 %v8332_v47 }
 0x565   :  { %8335 = vmatpush3.bf16.msra.mxu1 %v8332_v47 }
 0x637   :  { %v7661_v49 = vpop.f32.mrb[8].mxu1 }
 0x638   :  { %v881_v51 = vmul.f32 0.35355338, %v7661_v49  ;;  %v871_v52 = vpop.f32.mrb[9].mxu1 }
 0x639   :  { %v880_v53 = vmul.f32 0.35355338, %v871_v52 }
 0x63a   :  { %v883_v54 = vsel %vm9513_vm9, %v881_v51, -1e+30 }
 0x63b   :  { %v888_v55 = vsel %vm884_vm10, %v883_v54, -inf  ;;  %v882_v56 = vsel %vm480_vm11, %v880_v53, -1e+30 }
 0x63c   :  { %889 = vmax.xlane.f32.xlu1 %v888_v55  ;;  %v885_v57 = vsel %vm884_vm10, %v882_v56, -inf }
 0x63d   :  { %886 = vmax.xlane.f32.xlu0 %v885_v57 }
 0x6c9   :  { %v890_v58 = vpop.xlane.xlu1 %889 }
 0x6ca   :  { %v892_v59 = vsub.f32 %v883_v54, %v890_v58  ;;  %v887_v60 = vpop.xlane.xlu0 %886 }
 0x6cb   :  { %v891_v62 = vsub.f32 %v882_v56, %v887_v60 }
 0x6cc   :  { %v895_v63 = vmul.f32 1.442695, %v892_v59 }
 0x6cd   :  { %v893_v0 = vmul.f32 1.442695, %v891_v62 }
 0x6ce   :  { %8929 = vpow2.f32 %v895_v63 }
 0x6cf   :  { %8931 = vpow2.f32 %v893_v0 }
 0x6d8   :  { %v8930_v1 = vpop.eup %8929 }
 0x6d9   :  { %v8932_v2 = vpop.eup %8931  ;;  %v900_v4 = vsel %vm884_vm10, %v8930_v1, 0.0 }
 0x6da   :  { %901 = vadd.xlane.f32.xlu1 %v900_v4  ;;  %v897_v5 = vsel %vm884_vm10, %v8932_v2, 0.0 }
 0x6db   :  { %898 = vadd.xlane.f32.xlu0 %v897_v5 }
 0x6eb   :  { %8805 = vrot.lane.b32.xlu1 %v8804_v36, %s9128_s28 }
 0x6ef   :  { %988 = vrot.lane.b32.xlu1 %v617_v25, %s9129_s6 }
 0x6f1   :  { %8800 = vrot.lane.b32.xlu0 %v8804_v36, %s9129_s6 }
 0x6f3   :  { %990 = vrot.lane.b32.xlu1 %v622_v46, %s9129_s6 }
 0x6f5   :  { %8810 = vrot.lane.b32.xlu0 %v8804_v36, %s9130_s2 }
 0x6f7   :  { %1194 = vrot.lane.b32.xlu1 %v617_v25, %s9128_s28 }
 0x6f9   :  { %1196 = vrot.lane.b32.xlu0 %v622_v46, %s9128_s28 }
 0x6fb   :  { %1398 = vrot.lane.b32.xlu1 %v617_v25, %s9130_s2 }
 0x6fd   :  { %1400 = vrot.lane.b32.xlu0 %v622_v46, %s9130_s2 }
 0x767   :  { %v902_v6 = vpop.xlane.xlu1 %901 }
 0x768   :  { %8933 = vrcp.f32 %v902_v6  ;;  %v899_v7 = vpop.xlane.xlu0 %898 }
 0x769   :  { %8935 = vrcp.f32 %v899_v7 }
 0x76b   :  { %v8806_v9 = vpop.permute.xlu1 %8805 }
 0x76c   :  { %v8801_v8 = vpop.permute.xlu0 %8800  ;;  %v8808_v15 = vunpack.i.h.bf16 %v8806_v9  ;;  %v8807_v16 = vunpack.i.l.bf16 %v8806_v9 }
 0x76d   :  { %v8803_v10 = vunpack.i.h.bf16 %v8801_v8  ;;  %v8802_v11 = vunpack.i.l.bf16 %v8801_v8 }
 0x76e   :  { %v8346_v23 = vpack.c.bf16 %v8808_v15, %v8807_v16 }
 0x76f   :  { %v8336_v12 = vpack.c.bf16 %v8803_v10, %v8802_v11  ;;  %v989_v18 = vpop.permute.xlu1 %988 }
 0x770   :  { %v8811_v25 = vpop.permute.xlu0 %8810 }
 0x771   :  { %8338 = vmatprep.subr.msk.bf16.mxu1 %vm9496_vm5, %v8336_v12  ;;  %v8813_v28 = vunpack.i.h.bf16 %v8811_v25  ;;  %v8812_v29 = vunpack.i.l.bf16 %v8811_v25 }
 0x772   :  { %v8934_v13 = vpop.eup %8933 }
 0x773   :  { %v8936_v14 = vpop.eup %8935  ;;  %v906_v22 = vmul.f32 %v8934_v13, %v8930_v1  ;;  %v991_v27 = vpop.permute.xlu1 %990  ;;  %v8356_v31 = vpack.c.bf16 %v8813_v28, %v8812_v29 }
 0x774   :  { %v905_v21 = vmul.f32 %v8936_v14, %v8932_v2  ;;  %v1197_v35 = vpop.permute.xlu0 %1196 }
 0x776   :  { %7666 = vmatprep.mubr.msk.f32.mxu1 %vm884_vm10, %v905_v21 }
 0x777   :  { %7667 = vmatmul.mubr.msk.f32.vlgmr.msra.gmra.mrb[10].mxu1 %vm884_vm10, %v906_v22  ;;  %v1195_v33 = vpop.permute.xlu1 %1194 }
 0x778   :  { %8341 = vmatpush3.bf16.xpose.msk.msra.mxu1 %vm9496_vm5, %v8336_v12  ;;  %7673 = vmatprep.mubr.msk.f32.mxu1 %vm225_vm6, %v989_v18  ;;  %v1401_v37 = vpop.permute.xlu0 %1400 }
 0x779   :  { %8348 = vmatprep.subr.msk.bf16.mxu1 %vm9496_vm5, %v8346_v23 }
 0x77b   :  { %v1399_v36 = vpop.permute.xlu1 %1398 }
 0x77f   :  { %7674 = vmatmul.mubr.msk.f32.vlgmr.msra.gmra.mrb[12].mxu1 %vm225_vm6, %v991_v27 }
 0x780   :  { %8351 = vmatpush3.bf16.xpose.msk.msra.mxu1 %vm9496_vm5, %v8346_v23  ;;  %7687 = vmatprep.mubr.msk.f32.mxu1 %vm225_vm6, %v1195_v33 }
 0x781   :  { %8358 = vmatprep.subr.msk.bf16.mxu1 %vm9496_vm5, %v8356_v31 }
 0x787   :  { %7688 = vmatmul.mubr.msk.f32.vlgmr.msra.gmra.mrb[14].mxu1 %vm225_vm6, %v1197_v35 }
 0x788   :  { %8361 = vmatpush3.bf16.xpose.msk.msra.mxu1 %vm9496_vm5, %v8356_v31  ;;  %7701 = vmatprep.mubr.msk.f32.mxu1 %vm225_vm6, %v1399_v36 }
 0x78f   :  { %7702 = vmatmul.mubr.msk.f32.vlgmr.msra.gmra.mrb[16].mxu1 %vm225_vm6, %v1401_v37 }
 0x84a   :  { %v9555_v38 = vpop.f32.mrb[10].mxu1 }
 0x84b   :  { %v9557_v39 = vpop.f32.mrb[11].mxu1 }
 0x852   :  { %v7675_v42 = vpop.f32.mrb[12].mxu1 }
 0x853   :  { %v1080_v44 = vmul.f32 0.35355338, %v7675_v42  ;;  %v1070_v46 = vpop.f32.mrb[13].mxu1 }
 0x854   :  { %v1079_v47 = vmul.f32 0.35355338, %v1070_v46 }
 0x855   :  { %v1082_v49 = vsel %vm9513_vm9, %v1080_v44, -1e+30 }
 0x856   :  { %v1086_v51 = vsel %vm884_vm10, %v1082_v49, -inf  ;;  %v1081_v52 = vsel %vm480_vm11, %v1079_v47, -1e+30 }
 0x857   :  { %1087 = vmax.xlane.f32.xlu0 %v1086_v51  ;;  %v1083_v53 = vsel %vm884_vm10, %v1081_v52, -inf }
 0x858   :  { %1084 = vmax.xlane.f32.xlu1 %v1083_v53 }
 0x85a   :  { %v7689_v54 = vpop.f32.mrb[14].mxu1 }
 0x85b   :  { %v1286_v55 = vmul.f32 0.35355338, %v7689_v54  ;;  %v1276_v56 = vpop.f32.mrb[15].mxu1 }
 0x85c   :  { %v1285_v57 = vmul.f32 0.35355338, %v1276_v56 }
 0x85d   :  { %v1288_v58 = vsel %vm9513_vm9, %v1286_v55, -1e+30 }
 0x85e   :  { %v1292_v59 = vsel %vm884_vm10, %v1288_v58, -inf  ;;  %v1287_v60 = vsel %vm480_vm11, %v1285_v57, -1e+30 }
 0x85f   :  { %1293 = vmax.xlane.f32.xlu0 %v1292_v59  ;;  %v1289_v63 = vsel %vm884_vm10, %v1287_v60, -inf }
 0x862   :  { %v7703_v62 = vpop.f32.mrb[16].mxu1 }
 0x863   :  { %v1490_v0 = vmul.f32 0.35355338, %v7703_v62  ;;  %v1480_v1 = vpop.f32.mrb[17].mxu1  ;;  %1290 = vmax.xlane.f32.xlu0 %v1289_v63 }
 0x864   :  { %v1489_v2 = vmul.f32 0.35355338, %v1480_v1 }
 0x865   :  { %v1492_v4 = vsel %vm9513_vm9, %v1490_v0, -1e+30 }
 0x866   :  { %v1496_v5 = vsel %vm884_vm10, %v1492_v4, -inf  ;;  %v1491_v6 = vsel %vm480_vm11, %v1489_v2, -1e+30 }
 0x867   :  { %1497 = vmax.xlane.f32.xlu0 %v1496_v5  ;;  %v1493_v7 = vsel %vm884_vm10, %v1491_v6, -inf }
 0x868   :  { %1494 = vmax.xlane.f32.xlu1 %v1493_v7 }
 0x879   :  { %8815 = vrot.lane.b32.xlu1 %v9506_v48, %s9129_s6 }
 0x8e4   :  { %v1088_v8 = vpop.xlane.xlu0 %1087 }
 0x8e5   :  { %v1090_v9 = vsub.f32 %v1082_v49, %v1088_v8  ;;  %v1085_v10 = vpop.xlane.xlu1 %1084 }
 0x8e6   :  { %v1089_v11 = vsub.f32 %v1081_v52, %v1085_v10 }
 0x8e7   :  { %v1093_v12 = vmul.f32 1.442695, %v1090_v9 }
 0x8e8   :  { %v1091_v13 = vmul.f32 1.442695, %v1089_v11 }
 0x8e9   :  { %8937 = vpow2.f32 %v1093_v12 }
 0x8ea   :  { %8939 = vpow2.f32 %v1091_v13 }
 0x8ec   :  { %v1294_v14 = vpop.xlane.xlu0 %1293 }
 0x8ed   :  { %v1296_v15 = vsub.f32 %v1288_v58, %v1294_v14 }
 0x8ef   :  { %v1299_v16 = vmul.f32 1.442695, %v1296_v15 }
 0x8f0   :  { %v1291_v18 = vpop.xlane.xlu0 %1290 }
 0x8f1   :  { %8941 = vpow2.f32 %v1299_v16  ;;  %v1295_v21 = vsub.f32 %v1287_v60, %v1291_v18 }
 0x8f3   :  { %v8938_v22 = vpop.eup %8937  ;;  %v1297_v23 = vmul.f32 1.442695, %v1295_v21 }
 0x8f4   :  { %v8940_v25 = vpop.eup %8939  ;;  %v1498_v27 = vpop.xlane.xlu0 %1497  ;;  %v1098_v28 = vsel %vm884_vm10, %v8938_v22, 0.0 }
 0x8f5   :  { %8943 = vpow2.f32 %v1297_v23  ;;  %v1500_v29 = vsub.f32 %v1492_v4, %v1498_v27  ;;  %1099 = vadd.xlane.f32.xlu0 %v1098_v28  ;;  %v1495_v31 = vpop.xlane.xlu1 %1494  ;;  %v1095_v33 = vsel %vm884_vm10, %v8940_v25, 0.0  ;;  %v7042_v27 = vld [vmem:[%s10791_s3 + $0x68] sm:$0xff] }
 0x8f6   :  { %v1499_v35 = vsub.f32 %v1491_v6, %v1495_v31  ;;  %1096 = vadd.xlane.f32.xlu1 %v1095_v33  ;;  %v7043_v33 = vld [vmem:[%s10791_s3 + $0x70] sm:$0xff] }
 0x8f7   :  { %v1503_v36 = vmul.f32 1.442695, %v1500_v29 }
 0x8f8   :  { %v1501_v37 = vmul.f32 1.442695, %v1499_v35  ;;  %v7044_v35 = vld [vmem:[%s10791_s3 + $0x78] sm:$0xff] }
 0x8f9   :  { %8945 = vpow2.f32 %v1503_v36  ;;  %v8816_v42 = vpop.permute.xlu1 %8815  ;;  %v8370_v36 = vpack.c.bf16 %v7044_v35, %v7043_v33  ;;  %v9655_v33 = vsub.s32 6, %v9355_v40  ;;  %v9658_v35 = vsub.s32 7, %v9355_v40 }
 0x8fa   :  { %8947 = vpow2.f32 %v1501_v37  ;;  %v8818_v44 = vunpack.i.h.bf16 %v8816_v42  ;;  %v8817_v46 = vunpack.i.l.bf16 %v8816_v42 }
 0x8fb   :  { %v8942_v47 = vpop.eup %8941 }
 0x8fc   :  { %v1304_v49 = vsel %vm884_vm10, %v8942_v47, 0.0  ;;  %v8342_v51 = vpack.c.bf16 %v8818_v44, %v8817_v46 }
 0x8fd   :  { %1305 = vadd.xlane.f32.xlu0 %v1304_v49 }
 0x8fe   :  { %8343 = vmatprep.subr.bf16.mxu0 %v8342_v51 }
 0x8ff   :  { %v8944_v52 = vpop.eup %8943  ;;  %8345 = vmatpush3.bf16.msra.mxu0 %v8342_v51 }
 0x900   :  { %v1301_v53 = vsel %vm884_vm10, %v8944_v52, 0.0 }
 0x901   :  { %1302 = vadd.xlane.f32.xlu1 %v1301_v53 }
 0x903   :  { %v8946_v54 = vpop.eup %8945 }
 0x904   :  { %v8948_v55 = vpop.eup %8947  ;;  %v1508_v56 = vsel %vm884_vm10, %v8946_v54, 0.0 }
 0x905   :  { %1509 = vadd.xlane.f32.xlu0 %v1508_v56  ;;  %v1505_v57 = vsel %vm884_vm10, %v8948_v55, 0.0 }
 0x906   :  { %1506 = vadd.xlane.f32.xlu1 %v1505_v57 }
 0x917   :  { %8825 = vrot.lane.b32.xlu1 %v9506_v48, %s9130_s2 }
 0x91b   :  { %8820 = vrot.lane.b32.xlu0 %v9506_v48, %s9128_s28 }
 0x982   :  { %v1100_v58 = vpop.xlane.xlu0 %1099 }
 0x983   :  { %8949 = vrcp.f32 %v1100_v58  ;;  %v1097_v59 = vpop.xlane.xlu1 %1096 }
 0x984   :  { %8951 = vrcp.f32 %v1097_v59 }
 0x98a   :  { %v1306_v62 = vpop.xlane.xlu0 %1305 }
 0x98d   :  { %v8950_v60 = vpop.eup %8949 }
 0x98e   :  { %v8952_v63 = vpop.eup %8951  ;;  %v1303_v0 = vpop.xlane.xlu1 %1302  ;;  %v1104_v2 = vmul.f32 %v8950_v60, %v8938_v22 }
 0x98f   :  { %8953 = vrcp.f32 %v1303_v0  ;;  %v1103_v1 = vmul.f32 %v8952_v63, %v8940_v25  ;;  %v7041_v25 = vld [vmem:[%s10791_s3 + $0x60] sm:$0xff] }
 0x990   :  { %8955 = vrcp.f32 %v1306_v62  ;;  %v8366_v28 = vpack.c.bf16 %v7042_v27, %v7041_v25  ;;  %v9624_v62 = vsub.s32 5, %v9355_v40 }
 0x991   :  { %7680 = vmatprep.mubr.msk.f32.mxu0 %vm884_vm10, %v1103_v1 }
 0x992   :  { %v1510_v4 = vpop.xlane.xlu0 %1509  ;;  %7681 = vmatmul.mubr.msk.f32.vlgmr.msra.gmra.mrb[2].mxu0 %vm884_vm10, %v1104_v2 }
 0x993   :  { %8957 = vrcp.f32 %v1510_v4  ;;  %v1507_v5 = vpop.xlane.xlu1 %1506 }
 0x994   :  { %8959 = vrcp.f32 %v1507_v5 }
 0x996   :  { %v8821_v48 = vpop.permute.xlu0 %8820 }
 0x997   :  { %v8823_v6 = vunpack.i.h.bf16 %v8821_v48  ;;  %v8822_v7 = vunpack.i.l.bf16 %v8821_v48  ;;  %v8826_v8 = vpop.permute.xlu1 %8825 }
 0x998   :  { %v8828_v9 = vunpack.i.h.bf16 %v8826_v8  ;;  %v8827_v10 = vunpack.i.l.bf16 %v8826_v8 }
 0x999   :  { %v8954_v11 = vpop.eup %8953  ;;  %v8352_v12 = vpack.c.bf16 %v8823_v6, %v8822_v7 }
 0x99a   :  { %v8956_v13 = vpop.eup %8955  ;;  %v1309_v14 = vmul.f32 %v8954_v11, %v8944_v52  ;;  %v8362_v15 = vpack.c.bf16 %v8828_v9, %v8827_v10 }
 0x99b   :  { %8353 = vmatprep.subr.bf16.mxu0 %v8352_v12  ;;  %v1310_v18 = vmul.f32 %v8956_v13, %v8942_v47 }
 0x99c   :  { %8355 = vmatpush3.bf16.msra.mxu0 %v8352_v12  ;;  %7694 = vmatprep.mubr.msk.f32.mxu0 %vm884_vm10, %v1309_v14  ;;  %v1765_v14 = vld [vmem:[%s10796_s7] sm:$0xff] }
 0x99d   :  { %v8958_v16 = vpop.eup %8957  ;;  %8363 = vmatprep.subr.bf16.mxu1 %v8362_v15 }
 0x99e   :  { %v8960_v21 = vpop.eup %8959  ;;  %8365 = vmatpush3.bf16.msra.mxu1 %v8362_v15  ;;  %v1514_v23 = vmul.f32 %v8958_v16, %v8946_v54  ;;  %v1766_v15 = vld [vmem:[%s10796_s7 + $0x8] sm:$0xff] }
 0x99f   :  { %7695 = vmatmul.mubr.msk.f32.vlgmr.msra.gmra.mrb[4].mxu0 %vm884_vm10, %v1310_v18  ;;  %v1513_v22 = vmul.f32 %v8960_v21, %v8948_v55  ;;  %8367 = vmatprep.subr.bf16.mxu1 %v8366_v28  ;;  %v8374_v16 = vpack.c.bf16 %v1766_v15, %v1765_v14  ;;  %v1767_v18 = vld [vmem:[%s10796_s7 + $0x10] sm:$0xff]  ;;  %v1768_v21 = vld [vmem:[%s10796_s7 + $0x18] sm:$0xff] }
 0x9a1   :  { %7708 = vmatprep.mubr.msk.f32.mxu1 %vm884_vm10, %v1513_v22  ;;  %8375 = vmatprep.subr.bf16.mxu0 %v8374_v16  ;;  %v8378_v22 = vpack.c.bf16 %v1768_v21, %v1767_v18 }
 0x9a2   :  { %7709 = vmatmul.mubr.msk.f32.vlgmr.msra.gmra.mrb[18].mxu1 %vm884_vm10, %v1514_v23  ;;  %8377 = vmatpush3.bf16.msra.mxu0 %v8374_v16 }
 0x9a3   :  { %8369 = vmatpush3.bf16.msra.mxu1 %v8366_v28  ;;  %8379 = vmatprep.subr.bf16.mxu0 %v8378_v22 }
 0x9a4   :  { %8371 = vmatprep.subr.bf16.mxu1 %v8370_v36 }
 0x9a6   :  { %8381 = vmatpush3.bf16.msra.mxu0 %v8378_v22 }
 0x9a7   :  { %8373 = vmatpush3.bf16.msra.mxu1 %v8370_v36  ;;  %v1756_v36 = vrot.slane %v9450_v61, %v9655_v33 }
 0xa65   :  { %v7682_v29 = vpop.f32.mrb[2].mxu0 }
 0xa66   :  { %1606 = vrot.lane.b32.xlu1 %v7682_v29, %s9131_s8  ;;  %v1185_v31 = vpop.f32.mrb[3].mxu0 }
 0xa6a   :  { %1604 = vrot.lane.b32.xlu1 %v1185_v31, %s9131_s8 }
 0xa72   :  { %v7696_v37 = vpop.f32.mrb[4].mxu0 }
 0xa73   :  { %1614 = vrot.lane.b32.xlu1 %v7696_v37, %s10775_s5  ;;  %v1389_v42 = vpop.f32.mrb[5].mxu0 }
 0xa74   :  { %1612 = vrot.lane.b32.xlu0 %v1389_v42, %s10775_s5  ;;  %s10800_s5 = sld [smem:[#allocation11_spill]] }
 0xa75   :  { %v7710_v44 = vpop.f32.mrb[18].mxu1 }
 0xa76   :  { %v1593_v46 = vpop.f32.mrb[19].mxu1 }
 0xa77   :  { %1622 = vrot.lane.b32.xlu1 %v7710_v44, %s10773_s26  ;;  %v1762_v44 = vrot.slane %v9450_v61, %v9658_v35 }
 0xa78   :  { %1620 = vrot.lane.b32.xlu0 %v1593_v46, %s10773_s26 }
 0xad8   :  { %v1607_v47 = vpop.permute.xlu1 %1606 }
 0xad9   :  { %v1627_v55 = vsel %vm225_vm6, %v9555_v38, %v1607_v47 }
 0xadc   :  { %v1605_v49 = vpop.permute.xlu1 %1604 }
 0xadd   :  { %v1626_v53 = vsel %vm225_vm6, %v9557_v39, %v1605_v49  ;;  %v1724_v39 = vrot.slane %v9450_v61, %v9624_v62  ;;  %v1876_v61 = vld [vmem:[%s10752_s9 + $0x10] sm:$0xff] }
 0xae5   :  { %v1615_v51 = vpop.permute.xlu1 %1614 }
 0xae6   :  { %v1613_v52 = vpop.permute.xlu0 %1612  ;;  %v1629_v58 = vsel %vm884_vm10, %v1627_v55, %v1615_v51  ;;  %v1875_v55 = vld [vmem:[%s10752_s9 + $0x8] sm:$0xff] }
 0xae7   :  { %v1628_v56 = vsel %vm884_vm10, %v1626_v53, %v1613_v52 }
 0xae9   :  { %v1623_v54 = vpop.permute.xlu1 %1622 }
 0xaea   :  { %v1621_v57 = vpop.permute.xlu0 %1620  ;;  %v1632_v60 = vsel %vm1630_vm12, %v1629_v58, %v1623_v54  ;;  %v1874_v54 = vld [vmem:[%s10752_s9] sm:$0xff] }
 0xaeb   :  { %v1631_v59 = vsel %vm1630_vm12, %v1628_v56, %v1621_v57  ;;  %v8382_v56 = vpack.c.bf16 %v1875_v55, %v1874_v54  ;;  %v1877_v57 = vld [vmem:[%s10752_s9 + $0x18] sm:$0xff]  ;;  %v7050_v54 = vld [vmem:[%s10753_s10 + $0x8] ss:$0 sm:$0xff] }
 0xaec   :  { %7719 = vmatprep.mubr.msk.f32.mxu1 %vm435_vm4, %v1631_v59  ;;  %v8386_v58 = vpack.c.bf16 %v1877_v57, %v1876_v61  ;;  %v1878_v59 = vld [vmem:[%s10752_s9 + $0x20] sm:$0xff] }
 0xaed   :  { %7720 = vmatmul.mubr.msk.f32.vlgmr.msra.gmra.mrb[20].mxu1 %vm435_vm4, %v1632_v60  ;;  %8383 = vmatprep.subr.bf16.mxu1 %v8382_v56  ;;  %v1879_v60 = vld [vmem:[%s10752_s9 + $0x28] sm:$0xff] }
 0xaee   :  { %8385 = vmatpush3.bf16.msra.mxu1 %v8382_v56 }
 0xaef   :  { %8387 = vmatprep.subr.bf16.mxu1 %v8386_v58 }
 0xaf2   :  { %8389 = vmatpush3.bf16.msra.mxu1 %v8386_v58 }
 0xbc0   :  { %v7721_v38 = vpop.f32.mrb[20].mxu1 }
 0xbc1   :  { %v1720_v63 = vadd.f32 %v7721_v38, %v9421_v30  ;;  %v1710_v0 = vpop.f32.mrb[21].mxu1  ;;  %v1880_v38 = vld [vmem:[%s10752_s9 + $0x30] sm:$0xff] }
 0xbc2   :  { %v1719_v1 = vadd.f32 %v1710_v0, %v9417_v26 }
 0xbc3   :  { %v9630_v2 = vadd.f32 %v1724_v39, %v1720_v63  ;;  %v1881_v63 = vld [vmem:[%s10752_s9 + $0x38] sm:$0xff] }
 0xbc4   :  { %v9632_v4 = vadd.f32 %v1724_v39, %v1719_v1  ;;  %v8390_v39 = vpack.c.bf16 %v1879_v60, %v1878_v59  ;;  %v8394_v0 = vpack.c.bf16 %v1881_v63, %v1880_v38  ;;  %v1882_v1 = vld [vmem:[%s10752_s9 + $0x40] sm:$0xff] }
 0xbc5   :  { %v1730_v5 = vsel %vm435_vm4, %v9630_v2, 0.0 }
 0xbc6   :  { %1731 = vadd.xlane.f32.xlu1 %v1730_v5  ;;  %v1727_v48 = vsel %vm435_vm4, %v9632_v4, 0.0  ;;  %8391 = vmatprep.subr.bf16.mxu1 %v8390_v39  ;;  %v1883_v5 = vld [vmem:[%s10752_s9 + $0x48] sm:$0xff] }
 0xbc7   :  { %1728 = vadd.xlane.f32.xlu0 %v1727_v48  ;;  %8393 = vmatpush3.bf16.msra.mxu1 %v8390_v39  ;;  %v1884_v48 = vld [vmem:[%s10752_s9 + $0x50] sm:$0xff] }
 0xbc8   :  { %8395 = vmatprep.subr.bf16.mxu1 %v8394_v0 }
 0xbcb   :  { %8397 = vmatpush3.bf16.msra.mxu1 %v8394_v0 }
 0xc53   :  { %v1732_v6 = vpop.xlane.xlu1 %1731 }
 0xc54   :  { %v1734_v7 = vmul.f32 0.03125, %v1732_v6  ;;  %v1729_v8 = vpop.xlane.xlu0 %1728  ;;  %v8398_v6 = vpack.c.bf16 %v1883_v5, %v1882_v1 }
 0xc55   :  { %v1733_v9 = vmul.f32 0.03125, %v1729_v8 }
 0xc56   :  { %v1736_v30 = vsub.f32 %v9630_v2, %v1734_v7  ;;  %v1885_v7 = vld [vmem:[%s10752_s9 + $0x58] sm:$0xff]  ;;  %8399 = vmatprep.subr.bf16.mxu1 %v8398_v6 }
 0xc57   :  { %v1735_v26 = vsub.f32 %v9632_v4, %v1733_v9  ;;  %v8402_v8 = vpack.c.bf16 %v1885_v7, %v1884_v48  ;;  %v1886_v9 = vld [vmem:[%s10752_s9 + $0x60] sm:$0xff]  ;;  %8401 = vmatpush3.bf16.msra.mxu1 %v8398_v6 }
 0xc58   :  { %v1738_v12 = vmul.f32 %v1736_v30, %v1736_v30 }
 0xc59   :  { %v1737_v10 = vmul.f32 %v1735_v26, %v1735_v26  ;;  %8403 = vmatprep.subr.bf16.mxu1 %v8402_v8 }
 0xc5a   :  { %v1742_v13 = vsel %vm435_vm4, %v1738_v12, 0.0 }
 0xc5b   :  { %v1739_v11 = vsel %vm435_vm4, %v1737_v10, 0.0  ;;  %v1888_v10 = vld [vmem:[%s10752_s9 + $0x70] sm:$0xff]  ;;  %8405 = vmatpush3.bf16.msra.mxu1 %v8402_v8  ;;  %v7054_v8 = vld [vmem:[%s10791_s3 + $0x80] sm:$0xff] }
 0xc5c   :  { %1740 = vadd.xlane.f32.xlu0 %v1739_v11  ;;  %v1889_v11 = vld [vmem:[%s10752_s9 + $0x78] sm:$0xff] }
 0xc5d   :  { %v8410_v12 = vpack.c.bf16 %v1889_v11, %v1888_v10  ;;  %v7057_v10 = vld [vmem:[%s10791_s3 + $0x98] sm:$0xff] }
 0xc60   :  { %1743 = vadd.xlane.f32.xlu0 %v1742_v13  ;;  %v7047_v13 = vld [vmem:[%s10754_s11] ss:$0 sm:$0xff] }
 0xce9   :  { %v1741_v23 = vpop.xlane.xlu0 %1740 }
 0xcea   :  { %v1745_v25 = vmul.f32 0.03125, %v1741_v23 }
 0xcec   :  { %v1747_v27 = vadd.f32 1e-05, %v1745_v25 }
 0xced   :  { %v1744_v28 = vpop.xlane.xlu0 %1743 }
 0xcee   :  { %8961 = vrsqrt.f32 %v1747_v27  ;;  %v1746_v29 = vmul.f32 0.03125, %v1744_v28 }
 0xcf0   :  { %v1748_v31 = vadd.f32 1e-05, %v1746_v29 }
 0xcf2   :  { %8963 = vrsqrt.f32 %v1748_v31 }
 0xcf8   :  { %v8962_v37 = vpop.eup %8961 }
 0xcf9   :  { %v1751_v42 = vmul.f32 %v8962_v37, %v1735_v26 }
 0xcfb   :  { %v1757_v46 = vmul.f32 %v1756_v36, %v1751_v42 }
 0xcfc   :  { %v8964_v47 = vpop.eup %8963 }
 0xcfd   :  { %v1752_v49 = vmul.f32 %v8964_v47, %v1736_v30  ;;  %v1763_v51 = vadd.f32 %v1762_v44, %v1757_v46  ;;  %v1887_v30 = vld [vmem:[%s10752_s9 + $0x68] sm:$0xff] }
 0xcfe   :  { %v8406_v26 = vpack.c.bf16 %v1887_v30, %v1886_v9  ;;  %v7055_v9 = vld [vmem:[%s10791_s3 + $0x88] sm:$0xff] }
 0xcff   :  { %v1758_v52 = vmul.f32 %v1756_v36, %v1752_v49  ;;  %7730 = vmatprep.mubr.msk.f32.mxu0 %vm435_vm4, %v1763_v51  ;;  %v8414_v30 = vpack.c.bf16 %v7055_v9, %v7054_v8 }
 0xd00   :  { %8407 = vmatprep.subr.bf16.mxu1 %v8406_v26 }
 0xd01   :  { %v1764_v53 = vadd.f32 %v1762_v44, %v1758_v52  ;;  %8409 = vmatpush3.bf16.msra.mxu1 %v8406_v26  ;;  %8415 = vmatprep.subr.bf16.mxu0 %v8414_v30  ;;  %v7056_v26 = vld [vmem:[%s10791_s3 + $0x90] sm:$0xff] }
 0xd02   :  { %8411 = vmatprep.subr.bf16.mxu1 %v8410_v12  ;;  %v8418_v11 = vpack.c.bf16 %v7057_v10, %v7056_v26 }
 0xd03   :  { %7731 = vmatmul.mubr.msk.f32.vlgmr.msra.gmra.mrb[6].mxu0 %vm435_vm4, %v1764_v53 }
 0xd04   :  { %8417 = vmatpush3.bf16.msra.mxu0 %v8414_v30 }
 0xd05   :  { %8413 = vmatpush3.bf16.msra.mxu1 %v8410_v12  ;;  %8419 = vmatprep.subr.bf16.mxu0 %v8418_v11  ;;  %v7060_v12 = vld [vmem:[%s10791_s3 + $0xa0] sm:$0xff] }
 0xd08   :  { %8421 = vmatpush3.bf16.msra.mxu0 %v8418_v11 }
 0xdd6   :  { %v7732_v14 = vpop.f32.mrb[6].mxu0 }
 0xdd7   :  { %v1853_v15 = vadd.f32 %v7732_v14, %v7047_v13  ;;  %v1847_v16 = vpop.f32.mrb[7].mxu0 }
 0xdd8   :  { %v1848_v18 = vadd.f32 %v7047_v13, %v1847_v16  ;;  %v7061_v13 = vld [vmem:[%s10791_s3 + $0xa8] sm:$0xff] }
 0xdd9   :  { %v1857_v21 = vmul.f32 %v1853_v15, %v1853_v15  ;;  %v8422_v14 = vpack.c.bf16 %v7061_v13, %v7060_v12 }
 0xdda   :  { %v1856_v22 = vmul.f32 %v1848_v18, %v1848_v18 }
 0xddb   :  { %v1859_v23 = vmul.f32 %v1857_v21, %v1853_v15  ;;  %8423 = vmatprep.subr.bf16.mxu0 %v8422_v14 }
 0xddc   :  { %v1858_v25 = vmul.f32 %v1856_v22, %v1848_v18 }
 0xddd   :  { %v1861_v27 = vmul.f32 0.044715, %v1859_v23 }
 0xdde   :  { %v1860_v28 = vmul.f32 0.044715, %v1858_v25  ;;  %v9755_v25 = vld [vmem:[%s10753_s10 + $0x10] sm:$0xff] }
 0xddf   :  { %v1863_v29 = vadd.f32 %v1861_v27, %v1853_v15  ;;  %v2007_v27 = vrot.slane %v9755_v25, %v9407_v17  ;;  %v2198_v8 = vrot.slane %v9755_v25, %v9492_v32 }
 0xde0   :  { %v1862_v31 = vadd.f32 %v1860_v28, %v1848_v18 }
 0xde1   :  { %v1865_v36 = vmul.f32 0.7978846, %v1863_v29 }
 0xde2   :  { %v1864_v37 = vmul.f32 0.7978846, %v1862_v31 }
 0xde3   :  { %8965 = vtanh.f32 %v1865_v36 }
 0xde4   :  { %8967 = vtanh.f32 %v1864_v37  ;;  %v2013_v37 = vrot.slane %v9755_v25, %v9413_v19 }
 0xded   :  { %v8966_v42 = vpop.eup %8965 }
 0xdee   :  { %v8968_v44 = vpop.eup %8967  ;;  %v1869_v46 = vadd.f32 1.0, %v8966_v42 }
 0xdef   :  { %v1868_v47 = vadd.f32 1.0, %v8968_v44 }
 0xdf0   :  { %v1871_v49 = vmul.f32 0.5, %v1869_v46  ;;  %v7062_v46 = vld [vmem:[%s10791_s3 + $0xb0] sm:$0xff] }
 0xdf1   :  { %v1870_v51 = vmul.f32 0.5, %v1868_v47  ;;  %v7063_v47 = vld [vmem:[%s10791_s3 + $0xb8] sm:$0xff] }
 0xdf2   :  { %v1873_v53 = vmul.f32 %v1871_v49, %v1853_v15 }
 0xdf3   :  { %v1872_v52 = vmul.f32 %v1870_v51, %v1848_v18 }
 0xdf5   :  { %7765 = vmatprep.mubr.f32.mxu1 %v1872_v52  ;;  %v8426_v52 = vpack.c.bf16 %v7063_v47, %v7062_v46 }
 0xdf6   :  { %7766 = vmatmul.mubr.f32.vlgmr.msra.gmra.mrb[22].mxu1 %v1873_v53  ;;  %v7066_v53 = vld [vmem:[%s10791_s3 + $0xc0] sm:$0xff] }
 0xec9   :  { %v7767_v55 = vpop.f32.mrb[22].mxu1 }
 0xeca   :  { %v1966_v56 = vadd.f32 %v7767_v55, %v9630_v2  ;;  %v1956_v61 = vpop.f32.mrb[23].mxu1 }
 0xecb   :  { %v1965_v57 = vadd.f32 %v1956_v61, %v9632_v4  ;;  %v7069_v61 = vld [vmem:[%s10791_s3 + $0xd8] sm:$0xff] }
 0xecc   :  { %v9722_v58 = vadd.f32 %v7050_v54, %v1966_v56  ;;  %v7068_v56 = vld [vmem:[%s10791_s3 + $0xd0] sm:$0xff] }
 0xecd   :  { %v9724_v59 = vadd.f32 %v7050_v54, %v1965_v57  ;;  %v7067_v54 = vld [vmem:[%s10791_s3 + $0xc8] sm:$0xff]  ;;  %v8434_v57 = vpack.c.bf16 %v7069_v61, %v7068_v56 }
 0xece   :  { %v1981_v60 = vsel %vm435_vm4, %v9722_v58, 0.0  ;;  %v8430_v55 = vpack.c.bf16 %v7067_v54, %v7066_v53 }
 0xecf   :  { %1982 = vadd.xlane.f32.xlu1 %v1981_v60  ;;  %v1978_v39 = vsel %vm435_vm4, %v9724_v59, 0.0  ;;  %v2024_v60 = vrot.slane %v9755_v25, %v9481_v20 }
 0xed0   :  { %1979 = vadd.xlane.f32.xlu0 %v1978_v39 }
 0xf5c   :  { %v1983_v38 = vpop.xlane.xlu1 %1982 }
 0xf5d   :  { %v1985_v63 = vmul.f32 0.03125, %v1983_v38  ;;  %v1980_v0 = vpop.xlane.xlu0 %1979 }
 0xf5e   :  { %v1984_v1 = vmul.f32 0.03125, %v1980_v0  ;;  %v2114_v0 = vrot.slane %v9755_v25, %v9486_v24 }
 0xf5f   :  { %v1987_v2 = vsub.f32 %v9722_v58, %v1985_v63 }
 0xf60   :  { %v1986_v4 = vsub.f32 %v9724_v59, %v1984_v1 }
 0xf61   :  { %v1989_v5 = vmul.f32 %v1987_v2, %v1987_v2 }
 0xf62   :  { %v1988_v48 = vmul.f32 %v1986_v4, %v1986_v4 }
 0xf63   :  { %v1993_v6 = vsel %vm435_vm4, %v1989_v5, 0.0 }
 0xf64   :  { %1994 = vadd.xlane.f32.xlu1 %v1993_v6  ;;  %v1990_v7 = vsel %vm435_vm4, %v1988_v48, 0.0 }
 0xf65   :  { %1991 = vadd.xlane.f32.xlu0 %v1990_v7 }
 0xff1   :  { %v1995_v15 = vpop.xlane.xlu1 %1994 }
 0xff2   :  { %v1997_v16 = vmul.f32 0.03125, %v1995_v15  ;;  %v1992_v18 = vpop.xlane.xlu0 %1991 }
 0xff3   :  { %v1996_v21 = vmul.f32 0.03125, %v1992_v18 }
 0xff4   :  { %v1999_v22 = vadd.f32 1e-05, %v1997_v16 }
 0xff5   :  { %v1998_v23 = vadd.f32 1e-05, %v1996_v21 }
 0xff6   :  { %8969 = vrsqrt.f32 %v1999_v22 }
 0xff7   :  { %8971 = vrsqrt.f32 %v1998_v23 }
0x1000   :  { %v8970_v28 = vpop.eup %8969 }
0x1001   :  { %v8972_v29 = vpop.eup %8971  ;;  %v2003_v31 = vmul.f32 %v8970_v28, %v1987_v2 }
0x1002   :  { %v2002_v36 = vmul.f32 %v8972_v29, %v1986_v4 }
0x1003   :  { %v2009_v42 = vmul.f32 %v2007_v27, %v2003_v31 }
0x1004   :  { %v2008_v44 = vmul.f32 %v2007_v27, %v2002_v36 }
0x1005   :  { %v2015_v51 = vadd.f32 %v2013_v37, %v2009_v42 }
0x1006   :  { %v2014_v49 = vadd.f32 %v2013_v37, %v2008_v44 }
0x1008   :  { %7776 = vmatprep.mubr.msk.f32.mxu0 %vm435_vm4, %v2014_v49 }
0x1009   :  { %7777 = vmatmul.mubr.msk.f32.vlgmr.msra.gmra.mrb[8].mxu0 %vm435_vm4, %v2015_v51 }
0x100a   :  { %8425 = vmatpush3.bf16.msra.mxu0 %v8422_v14  ;;  %7787 = vmatprep.mubr.msk.f32.mxu0 %vm435_vm4, %v2014_v49 }
0x100b   :  { %8427 = vmatprep.subr.bf16.mxu0 %v8426_v52 }
0x100e   :  { %8429 = vmatpush3.bf16.msra.mxu0 %v8426_v52 }
0x100f   :  { %8431 = vmatprep.subr.bf16.mxu0 %v8430_v55 }
0x1011   :  { %7788 = vmatmul.mubr.msk.f32.vlgmr.msra.gmra.mrb[10].mxu0 %vm435_vm4, %v2015_v51 }
0x1012   :  { %8433 = vmatpush3.bf16.msra.mxu0 %v8430_v55  ;;  %7798 = vmatprep.mubr.msk.f32.mxu0 %vm435_vm4, %v2014_v49 }
0x1013   :  { %8435 = vmatprep.subr.bf16.mxu0 %v8434_v57 }
0x1016   :  { %8437 = vmatpush3.bf16.msra.mxu0 %v8434_v57 }
0x1019   :  { %7799 = vmatmul.mubr.msk.f32.vlgmr.msra.gmra.mrb[12].mxu0 %vm435_vm4, %v2015_v51 }
0x10dc   :  { %v7778_v39 = vpop.f32.mrb[8].mxu0 }
0x10dd   :  { %v2097_v38 = vpop.f32.mrb[9].mxu0  ;;  %v9795_v1 = vadd.f32 %v7778_v39, %v2024_v60 }
0x10de   :  { %v9787_v63 = vadd.f32 %v2097_v38, %v2024_v60 }
0x10e0   :  { %2468 = vrot.lane.b32.xlu1 %v9787_v63, %s9129_s6  ;;  %7805 = vmatprep.mubr.msk.f32.mxu0 %vm225_vm6, %v9787_v63 }
0x10e4   :  { %v7789_v2 = vpop.f32.mrb[10].mxu0  ;;  %2470 = vrot.lane.b32.xlu1 %v9795_v1, %s9129_s6 }
0x10e5   :  { %v2187_v4 = vadd.f32 %v7789_v2, %v2114_v0  ;;  %v2181_v5 = vpop.f32.mrb[11].mxu0 }
0x10e6   :  { %v2182_v48 = vadd.f32 %v2181_v5, %v2114_v0 }
0x10e8   :  { %v9799_v6 = vpack.i.bf16 %v2187_v4, %v2182_v48  ;;  %v8438_v7 = vpack.c.bf16 %v2187_v4, %v2182_v48 }
0x10ea   :  { %8830 = vrot.lane.b32.xlu0 %v9799_v6, %s9129_s6  ;;  %8440 = vmatprep.subr.msk.bf16.mxu0 %vm9496_vm5, %v8438_v7 }
0x10eb   :  { %8443 = vmatpush3.bf16.xpose.msk.msra.mxu0 %vm9496_vm5, %v8438_v7 }
0x10ec   :  { %v7800_v9 = vpop.f32.mrb[12].mxu0 }
0x10ed   :  { %v2271_v30 = vadd.f32 %v7800_v9, %v2198_v8  ;;  %v2265_v26 = vpop.f32.mrb[13].mxu0 }
0x10ee   :  { %v2266_v10 = vadd.f32 %v2265_v26, %v2198_v8 }
0x10f0   :  { %v8444_v11 = vpack.c.bf16 %v2271_v30, %v2266_v10  ;;  %v9809_v12 = vpack.i.bf16 %v2271_v30, %v2266_v10 }
0x10f2   :  { %7806 = vmatmul.mubr.msk.f32.vlgmr.msra.gmra.mrb[14].mxu0 %vm225_vm6, %v9795_v1  ;;  %8445 = vmatprep.subr.bf16.mxu1 %v8444_v11 }
0x10f3   :  { %8447 = vmatpush3.bf16.msra.mxu1 %v8444_v11 }
0x1152   :  { %v2469_v13 = vpop.permute.xlu1 %2468 }
0x1153   :  { %7819 = vmatprep.mubr.msk.f32.mxu0 %vm225_vm6, %v2469_v13 }
0x1156   :  { %v2471_v21 = vpop.permute.xlu1 %2470 }
0x115c   :  { %v8831_v14 = vpop.permute.xlu0 %8830 }
0x115d   :  { %v8833_v15 = vunpack.i.h.bf16 %v8831_v14  ;;  %v8832_v16 = vunpack.i.l.bf16 %v8831_v14 }
0x115f   :  { %v8448_v18 = vpack.c.bf16 %v8833_v15, %v8832_v16 }
0x1161   :  { %8450 = vmatprep.subr.msk.bf16.mxu0 %vm9496_vm5, %v8448_v18 }
0x1162   :  { %8453 = vmatpush3.bf16.xpose.msk.msra.mxu0 %vm9496_vm5, %v8448_v18 }
0x1169   :  { %7820 = vmatmul.mubr.msk.f32.vlgmr.msra.gmra.mrb[16].mxu0 %vm225_vm6, %v2471_v21 }
0x11c5   :  { %v7807_v22 = vpop.f32.mrb[14].mxu0 }
0x11c6   :  { %v2362_v23 = vmul.f32 0.35355338, %v7807_v22  ;;  %v2352_v27 = vpop.f32.mrb[15].mxu0 }
0x11c7   :  { %v2361_v28 = vmul.f32 0.35355338, %v2352_v27 }
0x11c8   :  { %v2364_v29 = vsel %vm9513_vm9, %v2362_v23, -1e+30 }
0x11c9   :  { %v2368_v31 = vsel %vm884_vm10, %v2364_v29, -inf  ;;  %v2363_v36 = vsel %vm480_vm11, %v2361_v28, -1e+30 }
0x11ca   :  { %2369 = vmax.xlane.f32.xlu0 %v2368_v31  ;;  %v2365_v37 = vsel %vm884_vm10, %v2363_v36, -inf }
0x11cb   :  { %2366 = vmax.xlane.f32.xlu1 %v2365_v37 }
0x11dc   :  { %8835 = vrot.lane.b32.xlu1 %v9809_v12, %s9129_s6 }
0x123c   :  { %v7821_v42 = vpop.f32.mrb[16].mxu0 }
0x123d   :  { %v2550_v44 = vpop.f32.mrb[17].mxu0  ;;  %v2560_v46 = vmul.f32 0.35355338, %v7821_v42 }
0x123e   :  { %v2559_v47 = vmul.f32 0.35355338, %v2550_v44 }
0x123f   :  { %v2562_v52 = vsel %vm9513_vm9, %v2560_v46, -1e+30 }
0x1240   :  { %v2561_v49 = vsel %vm480_vm11, %v2559_v47, -1e+30  ;;  %v2566_v53 = vsel %vm884_vm10, %v2562_v52, -inf }
0x1241   :  { %v2563_v51 = vsel %vm884_vm10, %v2561_v49, -inf }
0x1242   :  { %2564 = vmax.xlane.f32.xlu0 %v2563_v51 }
0x1246   :  { %2567 = vmax.xlane.f32.xlu0 %v2566_v53 }
0x1257   :  { %v2370_v54 = vpop.xlane.xlu0 %2369 }
0x1258   :  { %v2372_v55 = vsub.f32 %v2364_v29, %v2370_v54  ;;  %v2367_v56 = vpop.xlane.xlu1 %2366 }
0x1259   :  { %v2371_v61 = vsub.f32 %v2363_v36, %v2367_v56 }
0x125a   :  { %v2375_v57 = vmul.f32 1.442695, %v2372_v55 }
0x125b   :  { %v2373_v60 = vmul.f32 1.442695, %v2371_v61 }
0x125c   :  { %8973 = vpow2.f32 %v2375_v57  ;;  %v8836_v39 = vpop.permute.xlu1 %8835 }
0x125d   :  { %8975 = vpow2.f32 %v2373_v60  ;;  %v8838_v38 = vunpack.i.h.bf16 %v8836_v39  ;;  %v8837_v0 = vunpack.i.l.bf16 %v8836_v39 }
0x125f   :  { %v8454_v2 = vpack.c.bf16 %v8838_v38, %v8837_v0 }
0x1261   :  { %8455 = vmatprep.subr.bf16.mxu1 %v8454_v2 }
0x1266   :  { %v8974_v4 = vpop.eup %8973 }
0x1267   :  { %v8976_v5 = vpop.eup %8975  ;;  %v2380_v48 = vsel %vm884_vm10, %v8974_v4, 0.0 }
0x1268   :  { %2381 = vadd.xlane.f32.xlu0 %v2380_v48  ;;  %v2377_v7 = vsel %vm884_vm10, %v8976_v5, 0.0 }
0x1269   :  { %2378 = vadd.xlane.f32.xlu1 %v2377_v7 }
0x127a   :  { %2674 = vrot.lane.b32.xlu1 %v9787_v63, %s9128_s28 }
0x12cf   :  { %v2565_v8 = vpop.xlane.xlu0 %2564 }
0x12d0   :  { %v2569_v9 = vsub.f32 %v2561_v49, %v2565_v8 }
0x12d2   :  { %v2571_v30 = vmul.f32 1.442695, %v2569_v9 }
0x12d3   :  { %v2568_v26 = vpop.xlane.xlu0 %2567 }
0x12d4   :  { %8977 = vpow2.f32 %v2571_v30  ;;  %v2570_v10 = vsub.f32 %v2562_v52, %v2568_v26 }
0x12d6   :  { %v2573_v11 = vmul.f32 1.442695, %v2570_v10 }
0x12d8   :  { %8979 = vpow2.f32 %v2573_v11 }
0x12de   :  { %v8978_v13 = vpop.eup %8977 }
0x12df   :  { %v2575_v14 = vsel %vm884_vm10, %v8978_v13, 0.0 }
0x12e0   :  { %2576 = vadd.xlane.f32.xlu1 %v2575_v14 }
0x12e2   :  { %v8980_v15 = vpop.eup %8979 }
0x12e3   :  { %v2578_v16 = vsel %vm884_vm10, %v8980_v15, 0.0 }
0x12e4   :  { %2579 = vadd.xlane.f32.xlu0 %v2578_v16 }
0x12f1   :  { %2676 = vrot.lane.b32.xlu1 %v9795_v1, %s9128_s28 }
0x12f5   :  { %v2382_v18 = vpop.xlane.xlu0 %2381 }
0x12f6   :  { %8981 = vrcp.f32 %v2382_v18  ;;  %v2379_v21 = vpop.xlane.xlu1 %2378 }
0x12f7   :  { %8983 = vrcp.f32 %v2379_v21 }
0x12fa   :  { %8840 = vrot.lane.b32.xlu0 %v9799_v6, %s9128_s28  ;;  %v2675_v29 = vpop.permute.xlu1 %2674 }
0x1300   :  { %v8982_v22 = vpop.eup %8981 }
0x1301   :  { %v8984_v23 = vpop.eup %8983  ;;  %v2386_v28 = vmul.f32 %v8982_v22, %v8974_v4 }
0x1302   :  { %v2385_v27 = vmul.f32 %v8984_v23, %v8976_v5 }
0x1304   :  { %7812 = vmatprep.mubr.msk.f32.mxu1 %vm884_vm10, %v2385_v27 }
0x1305   :  { %7813 = vmatmul.mubr.msk.f32.vlgmr.msra.gmra.mrb[24].mxu1 %vm884_vm10, %v2386_v28 }
0x1306   :  { %8457 = vmatpush3.bf16.msra.mxu1 %v8454_v2 }
0x136d   :  { %v2577_v31 = vpop.xlane.xlu1 %2576 }
0x136e   :  { %8985 = vrcp.f32 %v2577_v31 }
0x1371   :  { %v2580_v36 = vpop.xlane.xlu0 %2579  ;;  %v2677_v53 = vpop.permute.xlu1 %2676 }
0x1372   :  { %8987 = vrcp.f32 %v2580_v36 }
0x1375   :  { %v8841_v37 = vpop.permute.xlu0 %8840 }
0x1376   :  { %v8843_v42 = vunpack.i.h.bf16 %v8841_v37  ;;  %v8842_v44 = vunpack.i.l.bf16 %v8841_v37 }
0x1378   :  { %v8986_v46 = vpop.eup %8985  ;;  %v8458_v47 = vpack.c.bf16 %v8843_v42, %v8842_v44 }
0x1379   :  { %v2583_v49 = vmul.f32 %v8986_v46, %v8978_v13 }
0x137a   :  { %8460 = vmatprep.subr.msk.bf16.mxu1 %vm9496_vm5, %v8458_v47 }
0x137b   :  { %7826 = vmatprep.mubr.msk.f32.mxu1 %vm884_vm10, %v2583_v49 }
0x137c   :  { %v8988_v51 = vpop.eup %8987 }
0x137d   :  { %v2584_v52 = vmul.f32 %v8988_v51, %v8980_v15 }
0x137f   :  { %7827 = vmatmul.mubr.msk.f32.vlgmr.msra.gmra.mrb[26].mxu1 %vm884_vm10, %v2584_v52 }
0x1380   :  { %8463 = vmatpush3.bf16.xpose.msk.msra.mxu1 %vm9496_vm5, %v8458_v47  ;;  %7833 = vmatprep.mubr.msk.f32.mxu1 %vm225_vm6, %v2675_v29 }
0x1387   :  { %7834 = vmatmul.mubr.msk.f32.vlgmr.msra.gmra.mrb[28].mxu1 %vm225_vm6, %v2677_v53 }
0x13d8   :  { %v9853_v54 = vpop.f32.mrb[24].mxu1 }
0x13d9   :  { %v9855_v55 = vpop.f32.mrb[25].mxu1 }
0x1452   :  { %v9857_v56 = vpop.f32.mrb[26].mxu1 }
0x1453   :  { %v9859_v61 = vpop.f32.mrb[27].mxu1 }
0x145a   :  { %v7835_v57 = vpop.f32.mrb[28].mxu1 }
0x145b   :  { %v2766_v60 = vmul.f32 0.35355338, %v7835_v57  ;;  %v2756_v39 = vpop.f32.mrb[29].mxu1 }
0x145c   :  { %v2765_v38 = vmul.f32 0.35355338, %v2756_v39 }
0x145d   :  { %v2768_v0 = vsel %vm9513_vm9, %v2766_v60, -1e+30 }
0x145e   :  { %v2772_v2 = vsel %vm884_vm10, %v2768_v0, -inf  ;;  %v2767_v4 = vsel %vm480_vm11, %v2765_v38, -1e+30 }
0x145f   :  { %2773 = vmax.xlane.f32.xlu0 %v2772_v2  ;;  %v2769_v5 = vsel %vm884_vm10, %v2767_v4, -inf }
0x1460   :  { %2770 = vmax.xlane.f32.xlu1 %v2769_v5 }
0x1471   :  { %8845 = vrot.lane.b32.xlu1 %v9809_v12, %s9128_s28 }
0x1475   :  { %2878 = vrot.lane.b32.xlu1 %v9787_v63, %s9130_s2 }
0x1479   :  { %2880 = vrot.lane.b32.xlu1 %v9795_v1, %s9130_s2 }
0x14ec   :  { %v2774_v48 = vpop.xlane.xlu0 %2773 }
0x14ed   :  { %v2776_v7 = vsub.f32 %v2768_v0, %v2774_v48  ;;  %v2771_v8 = vpop.xlane.xlu1 %2770 }
0x14ee   :  { %v2775_v9 = vsub.f32 %v2767_v4, %v2771_v8 }
0x14ef   :  { %v2779_v30 = vmul.f32 1.442695, %v2776_v7 }
0x14f0   :  { %v2777_v26 = vmul.f32 1.442695, %v2775_v9 }
0x14f1   :  { %8989 = vpow2.f32 %v2779_v30  ;;  %v8846_v10 = vpop.permute.xlu1 %8845 }
0x14f2   :  { %v8848_v11 = vunpack.i.h.bf16 %v8846_v10  ;;  %v8847_v13 = vunpack.i.l.bf16 %v8846_v10  ;;  %8991 = vpow2.f32 %v2777_v26 }
0x14f4   :  { %v8464_v14 = vpack.c.bf16 %v8848_v11, %v8847_v13 }
0x14f5   :  { %v2879_v42 = vpop.permute.xlu1 %2878 }
0x14f6   :  { %8465 = vmatprep.subr.bf16.mxu0 %v8464_v14 }
0x14f7   :  { %8467 = vmatpush3.bf16.msra.mxu0 %v8464_v14 }
0x14fb   :  { %v8990_v15 = vpop.eup %8989 }
0x14fc   :  { %v2784_v63 = vsel %vm884_vm10, %v8990_v15, 0.0  ;;  %v8992_v16 = vpop.eup %8991 }
0x14fd   :  { %2785 = vadd.xlane.f32.xlu0 %v2784_v63  ;;  %v2781_v1 = vsel %vm884_vm10, %v8992_v16, 0.0 }
0x1501   :  { %2782 = vadd.xlane.f32.xlu0 %v2781_v1  ;;  %v7098_v1 = vld [vmem:[%s10791_s3 + $0xf0] sm:$0xff] }
0x1517   :  { %8850 = vrot.lane.b32.xlu0 %v9799_v6, %s9130_s2  ;;  %v2881_v6 = vpop.permute.xlu1 %2880 }
0x158a   :  { %v2786_v18 = vpop.xlane.xlu0 %2785 }
0x158b   :  { %8993 = vrcp.f32 %v2786_v18 }
0x158e   :  { %v2783_v21 = vpop.xlane.xlu0 %2782 }
0x158f   :  { %8995 = vrcp.f32 %v2783_v21  ;;  %v7099_v21 = vld [vmem:[%s10791_s3 + $0xf8] sm:$0xff] }
0x1592   :  { %v8851_v22 = vpop.permute.xlu0 %8850 }
0x1593   :  { %v8853_v23 = vunpack.i.h.bf16 %v8851_v22  ;;  %v8852_v27 = vunpack.i.l.bf16 %v8851_v22  ;;  %v8482_v22 = vpack.c.bf16 %v7099_v21, %v7098_v1  ;;  %v3235_v1 = vrot.slane %v9755_v25, %v9655_v33 }
0x1595   :  { %v8468_v28 = vpack.c.bf16 %v8853_v23, %v8852_v27  ;;  %v8994_v29 = vpop.eup %8993 }
0x1596   :  { %v2790_v37 = vmul.f32 %v8994_v29, %v8990_v15 }
0x1597   :  { %8470 = vmatprep.subr.msk.bf16.mxu0 %vm9496_vm5, %v8468_v28 }
0x1599   :  { %v8996_v31 = vpop.eup %8995 }
0x159a   :  { %v2789_v36 = vmul.f32 %v8996_v31, %v8992_v16  ;;  %v7096_v16 = vld [vmem:[%s10791_s3 + $0xe0] sm:$0xff] }
0x159c   :  { %7840 = vmatprep.mubr.msk.f32.mxu0 %vm884_vm10, %v2789_v36 }
0x159d   :  { %7841 = vmatmul.mubr.msk.f32.vlgmr.msra.gmra.mrb[18].mxu0 %vm884_vm10, %v2790_v37 }
0x159e   :  { %8473 = vmatpush3.bf16.xpose.msk.msra.mxu0 %vm9496_vm5, %v8468_v28  ;;  %7847 = vmatprep.mubr.msk.f32.mxu0 %vm225_vm6, %v2879_v42 }
0x15a5   :  { %7848 = vmatmul.mubr.msk.f32.vlgmr.msra.gmra.mrb[20].mxu0 %vm225_vm6, %v2881_v6 }
0x1670   :  { %v7842_v44 = vpop.f32.mrb[18].mxu0 }
0x1671   :  { %v2869_v46 = vpop.f32.mrb[19].mxu0 }
0x1678   :  { %v7849_v47 = vpop.f32.mrb[20].mxu0 }
0x1679   :  { %v2970_v49 = vmul.f32 0.35355338, %v7849_v47  ;;  %v2960_v51 = vpop.f32.mrb[21].mxu0 }
0x167a   :  { %v2969_v52 = vmul.f32 0.35355338, %v2960_v51 }
0x167b   :  { %v2972_v53 = vsel %vm9513_vm9, %v2970_v49, -1e+30  ;;  %vm3734_vm9 = vcmp.lt.s32.totalorder %v9357_v41, 8 }
0x167c   :  { %v2976_v57 = vsel %vm884_vm10, %v2972_v53, -inf  ;;  %v2971_v60 = vsel %vm480_vm11, %v2969_v52, -1e+30  ;;  %vm3744_vm11 = vcmp.le.s32.totalorder %v9357_v41, %v9355_v40 }
0x167d   :  { %2977 = vmax.xlane.f32.xlu0 %v2976_v57  ;;  %v2973_v39 = vsel %vm884_vm10, %v2971_v60, -inf }
0x167e   :  { %2974 = vmax.xlane.f32.xlu1 %v2973_v39 }
0x168f   :  { %8855 = vrot.lane.b32.xlu1 %v9809_v12, %s9130_s2 }
0x1693   :  { %3086 = vrot.lane.b32.xlu1 %v9857_v56, %s9131_s8 }
0x1697   :  { %3092 = vrot.lane.b32.xlu1 %v2869_v46, %s10797_s4 }
0x169b   :  { %3094 = vrot.lane.b32.xlu1 %v7842_v44, %s10797_s4 }
0x170a   :  { %v2978_v50 = vpop.xlane.xlu0 %2977 }
0x170b   :  { %v2980_v38 = vsub.f32 %v2972_v53, %v2978_v50  ;;  %v2975_v0 = vpop.xlane.xlu1 %2974 }
0x170c   :  { %v2979_v2 = vsub.f32 %v2971_v60, %v2975_v0 }
0x170d   :  { %v2983_v4 = vmul.f32 1.442695, %v2980_v38 }
0x170e   :  { %v2981_v5 = vmul.f32 1.442695, %v2979_v2 }
0x170f   :  { %v8856_v48 = vpop.permute.xlu1 %8855 }
0x1710   :  { %8997 = vpow2.f32 %v2981_v5  ;;  %v8858_v7 = vunpack.i.h.bf16 %v8856_v48  ;;  %v8857_v8 = vunpack.i.l.bf16 %v8856_v48 }
0x1711   :  { %8999 = vpow2.f32 %v2983_v4 }
0x1712   :  { %v8474_v9 = vpack.c.bf16 %v8858_v7, %v8857_v8 }
0x1713   :  { %v3087_v28 = vpop.permute.xlu1 %3086 }
0x1714   :  { %8475 = vmatprep.subr.bf16.mxu1 %v8474_v9  ;;  %v3107_v6 = vsel %vm225_vm6, %v9853_v54, %v3087_v28 }
0x1715   :  { %8477 = vmatpush3.bf16.msra.mxu1 %v8474_v9 }
0x1717   :  { %v3093_v29 = vpop.permute.xlu1 %3092 }
0x171a   :  { %v8998_v12 = vpop.eup %8997 }
0x171b   :  { %v2985_v56 = vsel %vm884_vm10, %v8998_v12, 0.0  ;;  %v9000_v30 = vpop.eup %8999  ;;  %v3095_v36 = vpop.permute.xlu1 %3094 }
0x171c   :  { %2986 = vadd.xlane.f32.xlu0 %v2985_v56  ;;  %v2988_v26 = vsel %vm884_vm10, %v9000_v30, 0.0  ;;  %v3109_v47 = vsel %vm884_vm10, %v3107_v6, %v3095_v36  ;;  %v7103_v56 = vld [vmem:[%s10796_s7 + $0x28] sm:$0xff] }
0x1720   :  { %2989 = vadd.xlane.f32.xlu0 %v2988_v26  ;;  %v7104_v26 = vld [vmem:[%s10796_s7 + $0x30] sm:$0xff] }
0x1736   :  { %3084 = vrot.lane.b32.xlu0 %v9859_v61, %s9131_s8  ;;  %v7097_v61 = vld [vmem:[%s10791_s3 + $0xe8] sm:$0xff] }
0x1737   :  { %v8478_v18 = vpack.c.bf16 %v7097_v61, %v7096_v16 }
0x1739   :  { %8479 = vmatprep.subr.bf16.mxu1 %v8478_v18 }
0x17a9   :  { %v2987_v10 = vpop.xlane.xlu0 %2986 }
0x17aa   :  { %9001 = vrcp.f32 %v2987_v10  ;;  %v7105_v10 = vld [vmem:[%s10796_s7 + $0x38] sm:$0xff] }
0x17ad   :  { %v2990_v11 = vpop.xlane.xlu0 %2989 }
0x17ae   :  { %9003 = vrcp.f32 %v2990_v11  ;;  %v8490_v11 = vpack.c.bf16 %v7105_v10, %v7104_v26 }
0x17b1   :  { %v3085_v31 = vpop.permute.xlu0 %3084 }
0x17b2   :  { %v3106_v37 = vsel %vm225_vm6, %v9855_v55, %v3085_v31  ;;  %v3203_v55 = vrot.slane %v9755_v25, %v9624_v62 }
0x17b3   :  { %v3108_v44 = vsel %vm884_vm10, %v3106_v37, %v3093_v29  ;;  %v7109_v37 = vld [vmem:[%s10752_s9 + $0x80] sm:$0xff] }
0x17b4   :  { %v9002_v13 = vpop.eup %9001 }
0x17b5   :  { %v2993_v14 = vmul.f32 %v9002_v13, %v8998_v12  ;;  %v7102_v12 = vld [vmem:[%s10796_s7 + $0x20] sm:$0xff] }
0x17b7   :  { %7854 = vmatprep.mubr.msk.f32.mxu1 %vm884_vm10, %v2993_v14 }
0x17b8   :  { %v9004_v15 = vpop.eup %9003 }
0x17b9   :  { %v2994_v63 = vmul.f32 %v9004_v15, %v9000_v30  ;;  %v8486_v30 = vpack.c.bf16 %v7103_v56, %v7102_v12 }
0x17bb   :  { %7855 = vmatmul.mubr.msk.f32.vlgmr.msra.gmra.mrb[30].mxu1 %vm884_vm10, %v2994_v63  ;;  %8487 = vmatprep.subr.bf16.mxu0 %v8486_v30 }
0x17bc   :  { %8481 = vmatpush3.bf16.msra.mxu1 %v8478_v18  ;;  %8489 = vmatpush3.bf16.msra.mxu0 %v8486_v30 }
0x17bd   :  { %8483 = vmatprep.subr.bf16.mxu1 %v8482_v22  ;;  %8491 = vmatprep.subr.bf16.mxu0 %v8490_v11 }
0x17c0   :  { %8485 = vmatpush3.bf16.msra.mxu1 %v8482_v22  ;;  %8493 = vmatpush3.bf16.msra.mxu0 %v8490_v11  ;;  %v3241_v22 = vrot.slane %v9755_v25, %v9658_v35  ;;  %v7111_v25 = vld [vmem:[%s10752_s9 + $0x90] sm:$0xff] }
0x17c1   :  { %8526 = vmatprep.subr.bf16.mxu0 %v9126_v3 }
0x188e   :  { %v7856_v23 = vpop.f32.mrb[30].mxu1 }
0x188f   :  { %3102 = vrot.lane.b32.xlu1 %v7856_v23, %s10798_s25  ;;  %v3073_v27 = vpop.f32.mrb[31].mxu1 }
0x1890   :  { %3100 = vrot.lane.b32.xlu0 %v3073_v27, %s10798_s25 }
0x1901   :  { %v3103_v42 = vpop.permute.xlu1 %3102 }
0x1902   :  { %v3101_v46 = vpop.permute.xlu0 %3100  ;;  %v3111_v51 = vsel %vm1630_vm12, %v3109_v47, %v3103_v42  ;;  %v7110_v42 = vld [vmem:[%s10752_s9 + $0x88] sm:$0xff]  ;;  %v7113_v47 = vld [vmem:[%s10752_s9 + $0xa0] sm:$0xff] }
0x1903   :  { %v3110_v49 = vsel %vm1630_vm12, %v3108_v44, %v3101_v46  ;;  %v8494_v6 = vpack.c.bf16 %v7110_v42, %v7109_v37  ;;  %v7112_v44 = vld [vmem:[%s10752_s9 + $0x98] sm:$0xff] }
0x1904   :  { %7865 = vmatprep.mubr.msk.f32.mxu1 %vm435_vm4, %v3110_v49  ;;  %v8498_v46 = vpack.c.bf16 %v7112_v44, %v7111_v25  ;;  %v7114_v49 = vld [vmem:[%s10752_s9 + $0xa8] sm:$0xff]  ;;  %v3454_v25 = vmul.u32 8, %v9355_v40 }
0x1905   :  { %7866 = vmatmul.mubr.msk.f32.vlgmr.msra.gmra.mrb[32].mxu1 %vm435_vm4, %v3111_v51  ;;  %8495 = vmatprep.subr.bf16.mxu1 %v8494_v6  ;;  %v8502_v51 = vpack.c.bf16 %v7114_v49, %v7113_v47 }
0x1906   :  { %8497 = vmatpush3.bf16.msra.mxu1 %v8494_v6  ;;  %vm3455_vm14 = vcmp.eq.s32.totalorder %v9357_v41, %v3454_v25 }
0x1907   :  { %8499 = vmatprep.subr.bf16.mxu1 %v8498_v46 }
0x190a   :  { %8501 = vmatpush3.bf16.msra.mxu1 %v8498_v46 }
0x190b   :  { %8503 = vmatprep.subr.bf16.mxu1 %v8502_v51 }
0x190e   :  { %8505 = vmatpush3.bf16.msra.mxu1 %v8502_v51  ;;  %v3456_v51 = vsel %vm3455_vm14, 1.0, %v9127_v43 }
0x19d8   :  { %v7867_v52 = vpop.f32.mrb[32].mxu1 }
0x19d9   :  { %v3199_v53 = vadd.f32 %v7867_v52, %v9722_v58  ;;  %v3189_v54 = vpop.f32.mrb[33].mxu1  ;;  %v7116_v52 = vld [vmem:[%s10752_s9 + $0xb8] sm:$0xff] }
0x19da   :  { %v3198_v57 = vadd.f32 %v3189_v54, %v9724_v59  ;;  %v7117_v54 = vld [vmem:[%s10752_s9 + $0xc0] sm:$0xff] }
0x19db   :  { %v9931_v60 = vadd.f32 %v3203_v55, %v3199_v53 }
0x19dc   :  { %v9933_v39 = vadd.f32 %v3203_v55, %v3198_v57  ;;  %v7115_v55 = vld [vmem:[%s10752_s9 + $0xb0] sm:$0xff]  ;;  %v7118_v57 = vld [vmem:[%s10752_s9 + $0xc8] sm:$0xff] }
0x19dd   :  { %v3209_v50 = vsel %vm435_vm4, %v9931_v60, 0.0  ;;  %v8506_v53 = vpack.c.bf16 %v7116_v52, %v7115_v55  ;;  %v3641_v52 = vld [vmem:[%s10755_s12] sm:$0xff] }
0x19de   :  { %3210 = vadd.xlane.f32.xlu1 %v3209_v50  ;;  %v3206_v38 = vsel %vm435_vm4, %v9933_v39, 0.0  ;;  %v7119_v50 = vld [vmem:[%s10752_s9 + $0xd0] sm:$0xff] }
0x19df   :  { %3207 = vadd.xlane.f32.xlu0 %v3206_v38  ;;  %8507 = vmatprep.subr.bf16.mxu1 %v8506_v53  ;;  %v8510_v38 = vpack.c.bf16 %v7118_v57, %v7117_v54 }
0x19e0   :  { %8509 = vmatpush3.bf16.msra.mxu1 %v8506_v53  ;;  %v9135_v53 = vmov 0  }
0x19e1   :  { %8511 = vmatprep.subr.bf16.mxu1 %v8510_v38  ;;  %8859 = vset.pattern.permute.xlu0 %v9135_v53 }
0x19e2   :  { %8860 = vset.pattern.permute.xlu1 %v9135_v53 }
0x19e4   :  { %8513 = vmatpush3.bf16.msra.mxu1 %v8510_v38 }
0x1a6b   :  { %v3211_v0 = vpop.xlane.xlu1 %3210 }
0x1a6c   :  { %v3213_v2 = vmul.f32 0.03125, %v3211_v0  ;;  %v3208_v4 = vpop.xlane.xlu0 %3207  ;;  %v7120_v0 = vld [vmem:[%s10752_s9 + $0xd8] sm:$0xff] }
0x1a6d   :  { %v3212_v5 = vmul.f32 0.03125, %v3208_v4  ;;  %v7121_v4 = vld [vmem:[%s10752_s9 + $0xe0] sm:$0xff] }
0x1a6e   :  { %v3215_v58 = vsub.f32 %v9931_v60, %v3213_v2  ;;  %v8514_v2 = vpack.c.bf16 %v7120_v0, %v7119_v50 }
0x1a6f   :  { %v3214_v59 = vsub.f32 %v9933_v39, %v3212_v5  ;;  %v7122_v5 = vld [vmem:[%s10752_s9 + $0xe8] sm:$0xff] }
0x1a70   :  { %v3217_v8 = vmul.f32 %v3215_v58, %v3215_v58  ;;  %8515 = vmatprep.subr.bf16.mxu1 %v8514_v2 }
0x1a71   :  { %v3216_v48 = vmul.f32 %v3214_v59, %v3214_v59  ;;  %8517 = vmatpush3.bf16.msra.mxu1 %v8514_v2  ;;  %v3642_v2 = vld [vmem:[%s10755_s12 + $0x8] sm:$0xff] }
0x1a72   :  { %v3221_v9 = vsel %vm435_vm4, %v3217_v8, 0.0  ;;  %v7106_v8 = vld [vmem:[%s10754_s11 + $0x1] ss:$0 sm:$0xff] }
0x1a73   :  { %v3218_v7 = vsel %vm435_vm4, %v3216_v48, 0.0  ;;  %v7124_v48 = vld [vmem:[%s10752_s9 + $0xf8] sm:$0xff] }
0x1a74   :  { %3219 = vadd.xlane.f32.xlu0 %v3218_v7 }
0x1a78   :  { %3222 = vadd.xlane.f32.xlu0 %v3221_v9 }
0x1b01   :  { %v3220_v13 = vpop.xlane.xlu0 %3219 }
0x1b02   :  { %v3224_v14 = vmul.f32 0.03125, %v3220_v13 }
0x1b04   :  { %v3226_v15 = vadd.f32 1e-05, %v3224_v14 }
0x1b05   :  { %v3223_v63 = vpop.xlane.xlu0 %3222 }
0x1b06   :  { %9005 = vrsqrt.f32 %v3226_v15  ;;  %v3225_v16 = vmul.f32 0.03125, %v3223_v63 }
0x1b08   :  { %v3227_v61 = vadd.f32 1e-05, %v3225_v16 }
0x1b0a   :  { %9007 = vrsqrt.f32 %v3227_v61 }
0x1b10   :  { %v9006_v18 = vpop.eup %9005 }
0x1b11   :  { %v3230_v21 = vmul.f32 %v9006_v18, %v3214_v59  ;;  %v7123_v59 = vld [vmem:[%s10752_s9 + $0xf0] sm:$0xff] }
0x1b12   :  { %v8522_v7 = vpack.c.bf16 %v7124_v48, %v7123_v59  ;;  %v3557_v59 = vld [vmem:[%s10799_s29 + $0x10] sm:$0xff]  ;;  %v3558_v48 = vld [vmem:[%s10799_s29 + $0x18] sm:$0xff] }
0x1b13   :  { %v3236_v23 = vmul.f32 %v3235_v1, %v3230_v21 }
0x1b14   :  { %v9008_v27 = vpop.eup %9007 }
0x1b15   :  { %v3231_v28 = vmul.f32 %v9008_v27, %v3215_v58  ;;  %v3242_v29 = vadd.f32 %v3241_v22, %v3236_v23  ;;  %v8518_v58 = vpack.c.bf16 %v7122_v5, %v7121_v4  ;;  %v3555_v4 = vld [vmem:[%s10799_s29] sm:$0xff]  ;;  %v3556_v5 = vld [vmem:[%s10799_s29 + $0x8] sm:$0xff] }
0x1b17   :  { %v3237_v31 = vmul.f32 %v3235_v1, %v3231_v28  ;;  %7876 = vmatprep.mubr.msk.f32.mxu0 %vm435_vm4, %v3242_v29  ;;  %8519 = vmatprep.subr.bf16.mxu1 %v8518_v58 }
0x1b18   :  { %8521 = vmatpush3.bf16.msra.mxu1 %v8518_v58  ;;  %v8530_v58 = vpack.c.bf16 %v3556_v5, %v3555_v4  ;;  %v3789_v5 = vld [vmem:[%s10760_s17] sm:$0xff] }
0x1b19   :  { %v3243_v36 = vadd.f32 %v3241_v22, %v3237_v31  ;;  %8523 = vmatprep.subr.bf16.mxu1 %v8522_v7 }
0x1b1b   :  { %7877 = vmatmul.mubr.msk.f32.vlgmr.msra.gmra.mrb[22].mxu0 %vm435_vm4, %v3243_v36  ;;  %v7125_v36 = vld [vmem:[%s10753_s10 + $0x18] ss:$0 sm:$0xff] }
0x1b1c   :  { %8525 = vmatpush3.bf16.msra.mxu1 %v8522_v7  ;;  %7918 = vmatprep.mubr.msk.f32.mxu0 %vm9134_vm13, %v9127_v43  ;;  %v8533_v7 = vpack.c.bf16 %v3558_v48, %v3557_v59  ;;  %v7132_v48 = vld [vmem:[%s10760_s17 + $0x20] sm:$0xff] }
0x1bee   :  { %v7878_v9 = vpop.f32.mrb[22].mxu0 }
0x1bef   :  { %v3333_v12 = vadd.f32 %v7878_v9, %v7106_v8  ;;  %v3327_v56 = vpop.f32.mrb[23].mxu0  ;;  %v3633_v9 = vld [vmem:[%s10756_s13 + $0x8] sm:$0xff] }
0x1bf0   :  { %v3328_v30 = vadd.f32 %v7106_v8, %v3327_v56  ;;  %v3632_v8 = vld [vmem:[%s10756_s13] sm:$0xff] }
0x1bf1   :  { %v3337_v26 = vmul.f32 %v3333_v12, %v3333_v12 }
0x1bf2   :  { %v3336_v10 = vmul.f32 %v3328_v30, %v3328_v30 }
0x1bf3   :  { %v3339_v11 = vmul.f32 %v3337_v26, %v3333_v12 }
0x1bf4   :  { %v3338_v13 = vmul.f32 %v3336_v10, %v3328_v30  ;;  %v3530_v10 = vld [vmem:[%s10800_s5] sm:$0x3] }
0x1bf5   :  { %v3341_v14 = vmul.f32 0.044715, %v3339_v11  ;;  %v3548_v11 = vrot.slane %v3530_v10, %v9407_v17 }
0x1bf6   :  { %v3340_v15 = vmul.f32 0.044715, %v3338_v13 }
0x1bf7   :  { %v3343_v63 = vadd.f32 %v3341_v14, %v3333_v12 }
0x1bf8   :  { %v3342_v16 = vadd.f32 %v3340_v15, %v3328_v30 }
0x1bf9   :  { %v3345_v61 = vmul.f32 0.7978846, %v3343_v63  ;;  %v3553_v63 = vrot.slane %v3530_v10, %v9413_v19 }
0x1bfa   :  { %v3344_v1 = vmul.f32 0.7978846, %v3342_v16  ;;  %v3634_v16 = vld [vmem:[%s10756_s13 + $0x10] sm:$0xff] }
0x1bfb   :  { %9009 = vtanh.f32 %v3345_v61  ;;  %v3635_v61 = vld [vmem:[%s10756_s13 + $0x18] sm:$0xff] }
0x1bfc   :  { %9011 = vtanh.f32 %v3344_v1 }
0x1c05   :  { %v9010_v18 = vpop.eup %9009 }
0x1c06   :  { %v9012_v21 = vpop.eup %9011  ;;  %v3349_v22 = vadd.f32 1.0, %v9010_v18 }
0x1c07   :  { %v3348_v23 = vadd.f32 1.0, %v9012_v21  ;;  %v8539_v21 = vpack.c.bf16 %v3635_v61, %v3634_v16 }
0x1c08   :  { %v3351_v27 = vmul.f32 0.5, %v3349_v22 }
0x1c09   :  { %v3350_v28 = vmul.f32 0.5, %v3348_v23  ;;  %v3636_v23 = vld [vmem:[%s10756_s13 + $0x20] sm:$0xff] }
0x1c0a   :  { %v3353_v31 = vmul.f32 %v3351_v27, %v3333_v12  ;;  %v8535_v12 = vpack.c.bf16 %v3633_v9, %v3632_v8  ;;  %v3637_v27 = vld [vmem:[%s10756_s13 + $0x28] sm:$0xff]  ;;  %v3791_v9 = vld [vmem:[%s10760_s17 + $0x10] sm:$0xff] }
0x1c0b   :  { %v3352_v29 = vmul.f32 %v3350_v28, %v3328_v30  ;;  %v8543_v28 = vpack.c.bf16 %v3637_v27, %v3636_v23 }
0x1c0d   :  { %7911 = vmatprep.mubr.f32.mxu1 %v3352_v29  ;;  %v3638_v29 = vld [vmem:[%s10756_s13 + $0x30] sm:$0xff] }
0x1c0e   :  { %7912 = vmatmul.mubr.f32.vlgmr.msra.gmra.mrb[34].mxu1 %v3353_v31  ;;  %v3639_v31 = vld [vmem:[%s10756_s13 + $0x38] sm:$0xff] }
0x1ce1   :  { %v7913_v37 = vpop.f32.mrb[34].mxu1 }
0x1ce2   :  { %v3447_v42 = vadd.f32 %v7913_v37, %v9931_v60  ;;  %v3437_v6 = vpop.f32.mrb[35].mxu1 }
0x1ce3   :  { %v3446_v44 = vadd.f32 %v3437_v6, %v9933_v39 }
0x1ce4   :  { %v3453_v46 = vadd.f32 %v7125_v36, %v3447_v42 }
0x1ce5   :  { %v3452_v47 = vadd.f32 %v7125_v36, %v3446_v44  ;;  %v8547_v36 = vpack.c.bf16 %v3639_v31, %v3638_v29  ;;  %v3640_v44 = vld [vmem:[%s10757_s14] sm:$0xff] }
0x1ce7   :  { %v8527_v49 = vpack.c.bf16 %v3453_v46, %v3452_v47 }
0x1ce9   :  { %8528 = vmatpush3.bf16.msra.mxu0 %v8527_v49 }
0x1cea   :  { %8529 = vmatprep.subr.bf16.mxu0 %v9126_v3 }
0x1cec   :  { %7919 = vmatmul.mubr.msk.f32.vlgmr.msra.gmra.mrb[24].mxu0 %vm884_vm10, %v3456_v51 }
0x1ced   :  { %7929 = vmatprep.mubr.msk.f32.mxu0 %vm9134_vm13, %v9127_v43  ;;  %8531 = vmatpush3.bf16.msra.mxu0 %v8530_v58  ;;  %v3790_v58 = vld [vmem:[%s10760_s17 + $0x8] sm:$0xff] }
0x1cee   :  { %8532 = vmatprep.subr.bf16.mxu0 %v9126_v3  ;;  %v8551_v59 = vpack.c.bf16 %v3790_v58, %v3789_v5 }
0x1cf1   :  { %8534 = vmatpush3.bf16.msra.mxu0 %v8533_v7  ;;  %v7133_v7 = vld [vmem:[%s10760_s17 + $0x28] sm:$0xff] }
0x1cf2   :  { %8536 = vmatprep.subr.bf16.mxu0 %v8535_v12  ;;  %v8559_v8 = vpack.c.bf16 %v7133_v7, %v7132_v48 }
0x1cf4   :  { %8560 = vmatprep.subr.bf16.mxu1 %v8559_v8 }
0x1cf5   :  { %8562 = vmatpush3.bf16.msra.mxu1 %v8559_v8 }
0x1dbf   :  { %v3526_v60 = vpop.f32.mrb[24].mxu0 }
0x1dc0   :  { %v7920_v55 = vpop.f32.mrb[25].mxu0  ;;  %v3532_v39 = vsel %vm3531_vm15, %v3526_v60, 0.0 }
0x1dc1   :  { %3533 = vadd.xlane.f32.xlu0 %v3532_v39 }
0x1dd7   :  { %3644 = vperm.xlu0 %8859, %v3641_v52  }
0x1e4e   :  { %v3534_v54 = vpop.xlane.xlu0 %3533 }
0x1e4f   :  { %v3535_v57 = vmul.f32 0.03125, %v3534_v54 }
0x1e51   :  { %v3536_v50 = vsub.f32 %v3526_v60, %v3535_v57 }
0x1e53   :  { %v3537_v38 = vmul.f32 %v3536_v50, %v3536_v50 }
0x1e55   :  { %v3538_v0 = vsel %vm3531_vm15, %v3537_v38, 0.0 }
0x1e56   :  { %3539 = vadd.xlane.f32.xlu1 %v3538_v0  ;;  %v3645_v13 = vpop.permute.xlu0 %3644 }
0x1e57   :  { %vm3649_vm1 = vcmp.eq.s32.totalorder %v9357_v41, %v3645_v13  ;;  %v7139_v13 = vld [vmem:[%s10760_s17 + $0x48] sm:$0xff] }
0x1e58   :  { %v3651_v22 = vsel %vm3649_vm1, 1.0, %v9127_v43  ;;  %vm10198_vm1 = vmand %vm3734_vm9, %vm3744_vm11 }
0x1e67   :  { %3647 = vperm.xlu1 %8860, %v3642_v2  }
0x1ee3   :  { %v3540_v56 = vpop.xlane.xlu1 %3539 }
0x1ee4   :  { %v3541_v30 = vmul.f32 0.03125, %v3540_v56 }
0x1ee6   :  { %v3542_v26 = vadd.f32 1e-05, %v3541_v30  ;;  %v7134_v30 = vld [vmem:[%s10760_s17 + $0x30] sm:$0xff] }
0x1ee7   :  { %v3648_v37 = vpop.permute.xlu1 %3647 }
0x1ee8   :  { %9013 = vrsqrt.f32 %v3542_v26  ;;  %vm3650_vm2 = vcmp.eq.s32.totalorder %v9357_v41, %v3648_v37  ;;  %v7135_v26 = vld [vmem:[%s10760_s17 + $0x38] sm:$0xff] }
0x1ee9   :  { %v3652_v42 = vsel %vm3650_vm2, 1.0, %v9127_v43  ;;  %v8563_v10 = vpack.c.bf16 %v7135_v26, %v7134_v30 }
0x1eeb   :  { %8564 = vmatprep.subr.bf16.mxu1 %v8563_v10 }
0x1eec   :  { %8566 = vmatpush3.bf16.msra.mxu1 %v8563_v10 }
0x1ef2   :  { %v9014_v14 = vpop.eup %9013 }
0x1ef3   :  { %v3544_v15 = vmul.f32 %v9014_v14, %v3536_v50 }
0x1ef5   :  { %v3549_v1 = vmul.f32 %v3548_v11, %v3544_v15  ;;  %v7138_v11 = vld [vmem:[%s10760_s17 + $0x40] sm:$0xff] }
0x1ef6   :  { %v8567_v14 = vpack.c.bf16 %v7139_v13, %v7138_v11 }
0x1ef7   :  { %v3554_v18 = vadd.f32 %v3553_v63, %v3549_v1 }
0x1ef9   :  { %7930 = vmatmul.mubr.msk.f32.vlgmr.msra.gmra.mrb[26].mxu0 %vm435_vm4, %v3554_v18 }
0x1efa   :  { %8538 = vmatpush3.bf16.msra.mxu0 %v8535_v12  ;;  %7948 = vmatprep.mubr.msk.f32.mxu0 %vm118_vm0, %v3651_v22  ;;  %v3792_v12 = vld [vmem:[%s10760_s17 + $0x18] sm:$0xff] }
0x1efb   :  { %8540 = vmatprep.subr.bf16.mxu0 %v8539_v21  ;;  %v8555_v56 = vpack.c.bf16 %v3792_v12, %v3791_v9 }
0x1efe   :  { %8542 = vmatpush3.bf16.msra.mxu0 %v8539_v21  ;;  %v10134_v21 = vld [vmem:[%s10763_s20] sm:$0xff] }
0x1eff   :  { %8544 = vmatprep.subr.bf16.mxu0 %v8543_v28  ;;  %v3780_v22 = vrot.slane %v10134_v21, %v9407_v17 }
0x1f02   :  { %8546 = vmatpush3.bf16.msra.mxu0 %v8543_v28  ;;  %v3786_v28 = vrot.slane %v10134_v21, %v9413_v19 }
0x1f03   :  { %8548 = vmatprep.subr.bf16.mxu0 %v8547_v36 }
0x1f06   :  { %8550 = vmatpush3.bf16.msra.mxu0 %v8547_v36 }
0x1f07   :  { %8552 = vmatprep.subr.bf16.mxu0 %v8551_v59 }
0x1f09   :  { %7949 = vmatmul.mubr.msk.f32.vlgmr.msra.gmra.mrb[28].mxu0 %vm118_vm0, %v3652_v42  ;;  %v7140_v42 = vld [vmem:[%s10760_s17 + $0x50] sm:$0xff]  ;;  %vm3738_vm0 = vcmp.lt.s32.totalorder %v9357_v41, 16 }
0x1f0a   :  { %8554 = vmatpush3.bf16.msra.mxu0 %v8551_v59  ;;  %vm3739_vm3 = vmand %vm488_vm7, %vm3738_vm0  ;;  %vm6713_vm7 = vcmask 1040384  }
0x1f0b   :  { %8556 = vmatprep.subr.bf16.mxu0 %v8555_v56  ;;  %vm10194_vm14 = vmand %vm3739_vm3, %vm3745_vm8 }
0x1f0e   :  { %8558 = vmatpush3.bf16.msra.mxu0 %v8555_v56 }
0x1f0f   :  { %8568 = vmatprep.subr.bf16.mxu0 %v8567_v14 }
0x1fcc   :  { %v10084_v6 = vpop.f32.mrb[26].mxu0 }
0x1fcd   :  { %v7931_v25 = vpop.f32.mrb[27].mxu0 }
0x1fce   :  { %v7141_v25 = vld [vmem:[%s10760_s17 + $0x58] sm:$0xff] }
0x1fdc   :  { %v7950_v46 = vpop.f32.mrb[28].mxu0 }
0x1fdd   :  { %v10089_v47 = vadd.f32 %v7950_v46, %v3640_v44  ;;  %v3725_v49 = vpop.f32.mrb[29].mxu0 }
0x1fde   :  { %v10091_v51 = vadd.f32 %v3725_v49, %v3640_v44  ;;  %v8571_v49 = vpack.c.bf16 %v7141_v25, %v7140_v42 }
0x1fdf   :  { %v3754_v60 = vsel %vm435_vm4, %v10089_v47, 0.0 }
0x1fe0   :  { %3755 = vadd.xlane.f32.xlu0 %v3754_v60  ;;  %v3751_v55 = vsel %vm435_vm4, %v10091_v51, 0.0  ;;  %v3886_v60 = vrot.slane %v10134_v21, %v9486_v24 }
0x1fe1   :  { %3752 = vadd.xlane.f32.xlu1 %v3751_v55  ;;  %v3796_v55 = vrot.slane %v10134_v21, %v9481_v20 }
0x206d   :  { %v3756_v39 = vpop.xlane.xlu0 %3755 }
0x206e   :  { %v3758_v52 = vmul.f32 0.03125, %v3756_v39  ;;  %v3753_v53 = vpop.xlane.xlu1 %3752 }
0x206f   :  { %v3757_v54 = vmul.f32 0.03125, %v3753_v53 }
0x2070   :  { %v3760_v57 = vsub.f32 %v10089_v47, %v3758_v52 }
0x2071   :  { %v3759_v50 = vsub.f32 %v10091_v51, %v3757_v54 }
0x2072   :  { %v3762_v2 = vmul.f32 %v3760_v57, %v3760_v57 }
0x2073   :  { %v3761_v38 = vmul.f32 %v3759_v50, %v3759_v50 }
0x2074   :  { %v3766_v4 = vsel %vm435_vm4, %v3762_v2, 0.0 }
0x2075   :  { %v3763_v0 = vsel %vm435_vm4, %v3761_v38, 0.0 }
0x2076   :  { %3764 = vadd.xlane.f32.xlu1 %v3763_v0 }
0x207a   :  { %3767 = vadd.xlane.f32.xlu1 %v3766_v4  ;;  %v3970_v4 = vrot.slane %v10134_v21, %v9492_v32 }
0x2103   :  { %v3765_v15 = vpop.xlane.xlu1 %3764 }
0x2104   :  { %v3769_v63 = vmul.f32 0.03125, %v3765_v15 }
0x2106   :  { %v3771_v16 = vadd.f32 1e-05, %v3769_v63 }
0x2107   :  { %v3768_v61 = vpop.xlane.xlu1 %3767 }
0x2108   :  { %9015 = vrsqrt.f32 %v3771_v16  ;;  %v3770_v1 = vmul.f32 0.03125, %v3768_v61 }
0x210a   :  { %v3772_v18 = vadd.f32 1e-05, %v3770_v1 }
0x210c   :  { %9017 = vrsqrt.f32 %v3772_v18 }
0x2112   :  { %v9016_v23 = vpop.eup %9015 }
0x2113   :  { %v3775_v27 = vmul.f32 %v9016_v23, %v3759_v50 }
0x2115   :  { %v3781_v29 = vmul.f32 %v3780_v22, %v3775_v27 }
0x2116   :  { %v9018_v31 = vpop.eup %9017 }
0x2117   :  { %v3776_v36 = vmul.f32 %v9018_v31, %v3760_v57  ;;  %v3787_v37 = vadd.f32 %v3786_v28, %v3781_v29 }
0x2119   :  { %v3782_v44 = vmul.f32 %v3780_v22, %v3776_v36  ;;  %7959 = vmatprep.mubr.msk.f32.mxu0 %vm435_vm4, %v3787_v37  ;;  %7970 = vmatprep.mubr.msk.f32.mxu1 %vm435_vm4, %v3787_v37 }
0x211b   :  { %v3788_v46 = vadd.f32 %v3786_v28, %v3782_v44 }
0x211d   :  { %7960 = vmatmul.mubr.msk.f32.vlgmr.msra.gmra.mrb[30].mxu0 %vm435_vm4, %v3788_v46  ;;  %7971 = vmatmul.mubr.msk.f32.vlgmr.msra.gmra.mrb[36].mxu1 %vm435_vm4, %v3788_v46 }
0x211e   :  { %8570 = vmatpush3.bf16.msra.mxu0 %v8567_v14  ;;  %7981 = vmatprep.mubr.msk.f32.mxu0 %vm435_vm4, %v3787_v37 }
0x211f   :  { %8572 = vmatprep.subr.bf16.mxu0 %v8571_v49 }
0x2122   :  { %8574 = vmatpush3.bf16.msra.mxu0 %v8571_v49 }
0x2125   :  { %7982 = vmatmul.mubr.msk.f32.vlgmr.msra.gmra.mrb[32].mxu0 %vm435_vm4, %v3788_v46 }
0x21f0   :  { %v7961_v39 = vpop.f32.mrb[30].mxu0  ;;  %v7972_v52 = vpop.f32.mrb[36].mxu1 }
0x21f1   :  { %v3959_v53 = vadd.f32 %v7972_v52, %v3886_v60  ;;  %v3869_v54 = vpop.f32.mrb[31].mxu0  ;;  %v3953_v57 = vpop.f32.mrb[37].mxu1  ;;  %v10172_v5 = vadd.f32 %v7961_v39, %v3796_v55 }
0x21f2   :  { %v10156_v50 = vadd.f32 %v3869_v54, %v3796_v55  ;;  %v3954_v38 = vadd.f32 %v3953_v57, %v3886_v60 }
0x21f4   :  { %4240 = vrot.lane.b32.xlu0 %v10156_v50, %s9129_s6  ;;  %7988 = vmatprep.mubr.msk.f32.mxu1 %vm225_vm6, %v10156_v50  ;;  %v10162_v0 = vpack.i.bf16 %v3959_v53, %v3954_v38  ;;  %v8575_v2 = vpack.c.bf16 %v3959_v53, %v3954_v38 }
0x21f6   :  { %8862 = vrot.lane.b32.xlu1 %v10162_v0, %s9129_s6  ;;  %8577 = vmatprep.subr.msk.bf16.mxu1 %vm9496_vm5, %v8575_v2 }
0x21f7   :  { %8580 = vmatpush3.bf16.xpose.msk.msra.mxu1 %vm9496_vm5, %v8575_v2 }
0x21f8   :  { %v7983_v58 = vpop.f32.mrb[32].mxu0 }
0x21f9   :  { %v4043_v59 = vadd.f32 %v7983_v58, %v3970_v4  ;;  %v4037_v48 = vpop.f32.mrb[33].mxu0 }
0x21fa   :  { %v4038_v7 = vadd.f32 %v4037_v48, %v3970_v4  ;;  %4242 = vrot.lane.b32.xlu1 %v10172_v5, %s9129_s6 }
0x21fc   :  { %v8581_v8 = vpack.c.bf16 %v4043_v59, %v4038_v7  ;;  %v10176_v9 = vpack.i.bf16 %v4043_v59, %v4038_v7 }
0x21fe   :  { %8582 = vmatprep.subr.bf16.mxu0 %v8581_v8  ;;  %7989 = vmatmul.mubr.msk.f32.vlgmr.msra.gmra.mrb[38].mxu1 %vm225_vm6, %v10172_v5 }
0x21ff   :  { %8584 = vmatpush3.bf16.msra.mxu0 %v8581_v8 }
0x2266   :  { %v4241_v12 = vpop.permute.xlu0 %4240 }
0x2267   :  { %8002 = vmatprep.mubr.msk.f32.mxu1 %vm225_vm6, %v4241_v12 }
0x2268   :  { %v8863_v56 = vpop.permute.xlu1 %8862 }
0x2269   :  { %v8865_v30 = vunpack.i.h.bf16 %v8863_v56  ;;  %v8864_v26 = vunpack.i.l.bf16 %v8863_v56 }
0x226b   :  { %v8585_v10 = vpack.c.bf16 %v8865_v30, %v8864_v26 }
0x226c   :  { %v4243_v11 = vpop.permute.xlu1 %4242 }
0x226d   :  { %8587 = vmatprep.subr.msk.bf16.mxu1 %vm9496_vm5, %v8585_v10 }
0x226e   :  { %8590 = vmatpush3.bf16.xpose.msk.msra.mxu1 %vm9496_vm5, %v8585_v10 }
0x2275   :  { %8003 = vmatmul.mubr.msk.f32.vlgmr.msra.gmra.mrb[40].mxu1 %vm225_vm6, %v4243_v11 }
0x22d1   :  { %v7990_v13 = vpop.f32.mrb[38].mxu1 }
0x22d2   :  { %v4134_v15 = vmul.f32 0.35355338, %v7990_v13  ;;  %v4124_v16 = vpop.f32.mrb[39].mxu1 }
0x22d3   :  { %v4133_v61 = vmul.f32 0.35355338, %v4124_v16 }
0x22d4   :  { %v4136_v45 = vsel %vm10194_vm14, %v4134_v15, -1e+30 }
0x22d5   :  { %v4135_v1 = vsel %vm10198_vm1, %v4133_v61, -1e+30  ;;  %v4140_v40 = vsel %vm884_vm10, %v4136_v45, -inf }
0x22d6   :  { %4141 = vmax.xlane.f32.xlu0 %v4140_v40  ;;  %v4137_v18 = vsel %vm884_vm10, %v4135_v1, -inf }
0x22d7   :  { %4138 = vmax.xlane.f32.xlu1 %v4137_v18 }
0x2348   :  { %v8004_v22 = vpop.f32.mrb[40].mxu1 }
0x2349   :  { %v4332_v23 = vmul.f32 0.35355338, %v8004_v22  ;;  %v4322_v27 = vpop.f32.mrb[41].mxu1 }
0x234a   :  { %v4331_v28 = vmul.f32 0.35355338, %v4322_v27 }
0x234b   :  { %v4334_v29 = vsel %vm10194_vm14, %v4332_v23, -1e+30 }
0x234c   :  { %v4338_v31 = vsel %vm884_vm10, %v4334_v29, -inf  ;;  %v4333_v36 = vsel %vm10198_vm1, %v4331_v28, -1e+30 }
0x234d   :  { %4339 = vmax.xlane.f32.xlu1 %v4338_v31  ;;  %v4335_v37 = vsel %vm884_vm10, %v4333_v36, -inf }
0x2351   :  { %4336 = vmax.xlane.f32.xlu1 %v4335_v37 }
0x2362   :  { %8867 = vrot.lane.b32.xlu1 %v10176_v9, %s9129_s6 }
0x2363   :  { %v4142_v42 = vpop.xlane.xlu0 %4141 }
0x2364   :  { %v4144_v25 = vsub.f32 %v4136_v45, %v4142_v42  ;;  %v4139_v46 = vpop.xlane.xlu1 %4138 }
0x2365   :  { %v4143_v49 = vsub.f32 %v4135_v1, %v4139_v46 }
0x2366   :  { %v4147_v44 = vmul.f32 1.442695, %v4144_v25 }
0x2367   :  { %v4145_v39 = vmul.f32 1.442695, %v4143_v49 }
0x2368   :  { %9019 = vpow2.f32 %v4147_v44 }
0x2369   :  { %9021 = vpow2.f32 %v4145_v39 }
0x2372   :  { %v9020_v60 = vpop.eup %9019 }
0x2373   :  { %v4152_v55 = vsel %vm884_vm10, %v9020_v60, 0.0  ;;  %v9022_v52 = vpop.eup %9021 }
0x2374   :  { %4153 = vadd.xlane.f32.xlu0 %v4152_v55  ;;  %v4149_v53 = vsel %vm884_vm10, %v9022_v52, 0.0 }
0x2386   :  { %4150 = vadd.xlane.f32.xlu1 %v4149_v53 }
0x2397   :  { %4446 = vrot.lane.b32.xlu1 %v10156_v50, %s9128_s28 }
0x23da   :  { %v4340_v54 = vpop.xlane.xlu1 %4339 }
0x23db   :  { %v4342_v57 = vsub.f32 %v4334_v29, %v4340_v54 }
0x23dd   :  { %v4345_v38 = vmul.f32 1.442695, %v4342_v57 }
0x23de   :  { %v4337_v2 = vpop.xlane.xlu1 %4336 }
0x23df   :  { %9023 = vpow2.f32 %v4345_v38  ;;  %v4341_v4 = vsub.f32 %v4333_v36, %v4337_v2 }
0x23e1   :  { %v4343_v58 = vmul.f32 1.442695, %v4341_v4 }
0x23e2   :  { %v8868_v59 = vpop.permute.xlu1 %8867 }
0x23e3   :  { %9025 = vpow2.f32 %v4343_v58  ;;  %v8870_v48 = vunpack.i.h.bf16 %v8868_v59  ;;  %v8869_v7 = vunpack.i.l.bf16 %v8868_v59 }
0x23e5   :  { %v8591_v8 = vpack.c.bf16 %v8870_v48, %v8869_v7 }
0x23e7   :  { %8592 = vmatprep.subr.bf16.mxu0 %v8591_v8 }
0x23e9   :  { %v9024_v12 = vpop.eup %9023 }
0x23ea   :  { %v4350_v56 = vsel %vm884_vm10, %v9024_v12, 0.0 }
0x23eb   :  { %4351 = vadd.xlane.f32.xlu0 %v4350_v56 }
0x23ed   :  { %v9026_v30 = vpop.eup %9025 }
0x23ee   :  { %v4347_v26 = vsel %vm884_vm10, %v9026_v30, 0.0 }
0x23ef   :  { %4348 = vadd.xlane.f32.xlu1 %v4347_v26 }
0x2400   :  { %4448 = vrot.lane.b32.xlu1 %v10172_v5, %s9128_s28 }
0x2401   :  { %8872 = vrot.lane.b32.xlu0 %v10162_v0, %s9128_s28  ;;  %v4154_v10 = vpop.xlane.xlu0 %4153 }
0x2402   :  { %9027 = vrcp.f32 %v4154_v10 }
0x240c   :  { %v9028_v13 = vpop.eup %9027 }
0x240d   :  { %v4158_v61 = vmul.f32 %v9028_v13, %v9020_v60 }
0x2413   :  { %v4151_v11 = vpop.xlane.xlu1 %4150 }
0x2414   :  { %9029 = vrcp.f32 %v4151_v11 }
0x2417   :  { %v4447_v45 = vpop.permute.xlu1 %4446 }
0x241e   :  { %v9030_v15 = vpop.eup %9029 }
0x241f   :  { %v4157_v16 = vmul.f32 %v9030_v15, %v9022_v52 }
0x2421   :  { %7995 = vmatprep.mubr.msk.f32.mxu0 %vm884_vm10, %v4157_v16 }
0x2422   :  { %7996 = vmatmul.mubr.msk.f32.vlgmr.msra.gmra.mrb[34].mxu0 %vm884_vm10, %v4158_v61 }
0x2423   :  { %8594 = vmatpush3.bf16.msra.mxu0 %v8591_v8 }
0x2478   :  { %v4352_v1 = vpop.xlane.xlu0 %4351 }
0x2479   :  { %9031 = vrcp.f32 %v4352_v1 }
0x247c   :  { %v8873_v40 = vpop.permute.xlu0 %8872  ;;  %v4349_v18 = vpop.xlane.xlu1 %4348 }
0x247d   :  { %v8875_v22 = vunpack.i.h.bf16 %v8873_v40  ;;  %v8874_v23 = vunpack.i.l.bf16 %v8873_v40  ;;  %9033 = vrcp.f32 %v4349_v18 }
0x247f   :  { %v8595_v27 = vpack.c.bf16 %v8875_v22, %v8874_v23 }
0x2480   :  { %v4449_v37 = vpop.permute.xlu1 %4448 }
0x2481   :  { %8597 = vmatprep.subr.msk.bf16.mxu0 %vm9496_vm5, %v8595_v27 }
0x2483   :  { %v9032_v28 = vpop.eup %9031 }
0x2484   :  { %v4356_v36 = vmul.f32 %v9032_v28, %v9024_v12 }
0x2487   :  { %v9034_v29 = vpop.eup %9033 }
0x2488   :  { %v4355_v31 = vmul.f32 %v9034_v29, %v9026_v30 }
0x248a   :  { %8009 = vmatprep.mubr.msk.f32.mxu0 %vm884_vm10, %v4355_v31 }
0x248b   :  { %8010 = vmatmul.mubr.msk.f32.vlgmr.msra.gmra.mrb[36].mxu0 %vm884_vm10, %v4356_v36 }
0x248c   :  { %8600 = vmatpush3.bf16.xpose.msk.msra.mxu0 %vm9496_vm5, %v8595_v27  ;;  %8016 = vmatprep.mubr.msk.f32.mxu0 %vm225_vm6, %v4447_v45 }
0x2493   :  { %8017 = vmatmul.mubr.msk.f32.vlgmr.msra.gmra.mrb[38].mxu0 %vm225_vm6, %v4449_v37 }
0x24f5   :  { %v10236_v42 = vpop.f32.mrb[34].mxu0 }
0x24f6   :  { %v10238_v25 = vpop.f32.mrb[35].mxu0 }
0x255e   :  { %v10240_v44 = vpop.f32.mrb[36].mxu0 }
0x255f   :  { %v10242_v46 = vpop.f32.mrb[37].mxu0 }
0x2566   :  { %v8018_v49 = vpop.f32.mrb[38].mxu0 }
0x2567   :  { %v4538_v60 = vmul.f32 0.35355338, %v8018_v49  ;;  %v4528_v55 = vpop.f32.mrb[39].mxu0 }
0x2568   :  { %v4537_v39 = vmul.f32 0.35355338, %v4528_v55 }
0x2569   :  { %v4540_v52 = vsel %vm10194_vm14, %v4538_v60, -1e+30 }
0x256a   :  { %v4539_v53 = vsel %vm10198_vm1, %v4537_v39, -1e+30  ;;  %v4544_v54 = vsel %vm884_vm10, %v4540_v52, -inf }
0x256b   :  { %4545 = vmax.xlane.f32.xlu1 %v4544_v54  ;;  %v4541_v57 = vsel %vm884_vm10, %v4539_v53, -inf }
0x256c   :  { %4542 = vmax.xlane.f32.xlu0 %v4541_v57 }
0x257c   :  { %8877 = vrot.lane.b32.xlu1 %v10176_v9, %s9128_s28 }
0x2580   :  { %4650 = vrot.lane.b32.xlu1 %v10156_v50, %s9130_s2 }
0x2584   :  { %4652 = vrot.lane.b32.xlu1 %v10172_v5, %s9130_s2 }
0x25f8   :  { %v4546_v38 = vpop.xlane.xlu1 %4545 }
0x25f9   :  { %v4548_v2 = vsub.f32 %v4540_v52, %v4546_v38  ;;  %v4543_v4 = vpop.xlane.xlu0 %4542 }
0x25fa   :  { %v4547_v58 = vsub.f32 %v4539_v53, %v4543_v4 }
0x25fb   :  { %v4551_v59 = vmul.f32 1.442695, %v4548_v2 }
0x25fc   :  { %v4549_v48 = vmul.f32 1.442695, %v4547_v58  ;;  %v8878_v7 = vpop.permute.xlu1 %8877 }
0x25fd   :  { %9035 = vpow2.f32 %v4551_v59  ;;  %v8880_v8 = vunpack.i.h.bf16 %v8878_v7  ;;  %v8879_v12 = vunpack.i.l.bf16 %v8878_v7 }
0x25fe   :  { %9037 = vpow2.f32 %v4549_v48 }
0x25ff   :  { %v8601_v56 = vpack.c.bf16 %v8880_v8, %v8879_v12 }
0x2600   :  { %v4651_v22 = vpop.permute.xlu1 %4650 }
0x2601   :  { %8602 = vmatprep.subr.bf16.mxu1 %v8601_v56 }
0x2602   :  { %8604 = vmatpush3.bf16.msra.mxu1 %v8601_v56 }
0x2607   :  { %v9036_v30 = vpop.eup %9035 }
0x2608   :  { %v4556_v50 = vsel %vm884_vm10, %v9036_v30, 0.0  ;;  %v9038_v26 = vpop.eup %9037 }
0x2609   :  { %4557 = vadd.xlane.f32.xlu0 %v4556_v50  ;;  %v4553_v5 = vsel %vm884_vm10, %v9038_v26, 0.0 }
0x260d   :  { %4554 = vadd.xlane.f32.xlu0 %v4553_v5  ;;  %v7168_v5 = vld [vmem:[%s10760_s17 + $0x60] sm:$0xff] }
0x2623   :  { %8882 = vrot.lane.b32.xlu0 %v10162_v0, %s9130_s2  ;;  %v4653_v0 = vpop.permute.xlu1 %4652 }
0x2696   :  { %v4558_v10 = vpop.xlane.xlu0 %4557 }
0x2697   :  { %9039 = vrcp.f32 %v4558_v10  ;;  %v7170_v10 = vld [vmem:[%s10760_s17 + $0x70] sm:$0xff] }
0x269a   :  { %v4555_v11 = vpop.xlane.xlu0 %4554 }
0x269b   :  { %9041 = vrcp.f32 %v4555_v11 }
0x269e   :  { %v8883_v13 = vpop.permute.xlu0 %8882 }
0x269f   :  { %v8885_v15 = vunpack.i.h.bf16 %v8883_v13  ;;  %v8884_v16 = vunpack.i.l.bf16 %v8883_v13  ;;  %v7171_v13 = vld [vmem:[%s10760_s17 + $0x78] sm:$0xff] }
0x26a1   :  { %v8605_v61 = vpack.c.bf16 %v8885_v15, %v8884_v16  ;;  %v9040_v45 = vpop.eup %9039  ;;  %v8619_v15 = vpack.c.bf16 %v7171_v13, %v7170_v10 }
0x26a2   :  { %v4562_v18 = vmul.f32 %v9040_v45, %v9036_v30 }
0x26a3   :  { %8607 = vmatprep.subr.msk.bf16.mxu1 %vm9496_vm5, %v8605_v61 }
0x26a5   :  { %v9042_v1 = vpop.eup %9041 }
0x26a6   :  { %v4561_v40 = vmul.f32 %v9042_v1, %v9038_v26 }
0x26a8   :  { %8023 = vmatprep.mubr.msk.f32.mxu1 %vm884_vm10, %v4561_v40 }
0x26a9   :  { %8024 = vmatmul.mubr.msk.f32.vlgmr.msra.gmra.mrb[42].mxu1 %vm884_vm10, %v4562_v18 }
0x26aa   :  { %8610 = vmatpush3.bf16.xpose.msk.msra.mxu1 %vm9496_vm5, %v8605_v61  ;;  %8030 = vmatprep.mubr.msk.f32.mxu1 %vm225_vm6, %v4651_v22 }
0x26b1   :  { %8031 = vmatmul.mubr.msk.f32.vlgmr.msra.gmra.mrb[44].mxu1 %vm225_vm6, %v4653_v0 }
0x277c   :  { %v8025_v23 = vpop.f32.mrb[42].mxu1 }
0x277d   :  { %v4641_v27 = vpop.f32.mrb[43].mxu1 }
0x2784   :  { %v8032_v28 = vpop.f32.mrb[44].mxu1 }
0x2785   :  { %v4742_v29 = vmul.f32 0.35355338, %v8032_v28  ;;  %v4732_v31 = vpop.f32.mrb[45].mxu1 }
0x2786   :  { %v4741_v36 = vmul.f32 0.35355338, %v4732_v31 }
0x2787   :  { %v4744_v37 = vsel %vm10194_vm14, %v4742_v29, -1e+30 }
0x2788   :  { %v4743_v49 = vsel %vm10198_vm1, %v4741_v36, -1e+30  ;;  %v4748_v60 = vsel %vm884_vm10, %v4744_v37, -inf }
0x2789   :  { %4749 = vmax.xlane.f32.xlu1 %v4748_v60  ;;  %v4745_v55 = vsel %vm884_vm10, %v4743_v49, -inf }
0x278a   :  { %4746 = vmax.xlane.f32.xlu0 %v4745_v55 }
0x279a   :  { %8887 = vrot.lane.b32.xlu1 %v10176_v9, %s9130_s2 }
0x279e   :  { %4858 = vrot.lane.b32.xlu1 %v10240_v44, %s9131_s8 }
0x27a2   :  { %4864 = vrot.lane.b32.xlu1 %v4641_v27, %s10797_s4 }
0x2816   :  { %v4750_v39 = vpop.xlane.xlu1 %4749 }
0x2817   :  { %v4752_v52 = vsub.f32 %v4744_v37, %v4750_v39  ;;  %v4747_v53 = vpop.xlane.xlu0 %4746 }
0x2818   :  { %v4751_v54 = vsub.f32 %v4743_v49, %v4747_v53 }
0x2819   :  { %v4755_v57 = vmul.f32 1.442695, %v4752_v52 }
0x281a   :  { %v4753_v38 = vmul.f32 1.442695, %v4751_v54  ;;  %v8888_v2 = vpop.permute.xlu1 %8887 }
0x281b   :  { %v8890_v4 = vunpack.i.h.bf16 %v8888_v2  ;;  %v8889_v58 = vunpack.i.l.bf16 %v8888_v2 }
0x281c   :  { %9043 = vpow2.f32 %v4753_v38 }
0x281d   :  { %v8611_v59 = vpack.c.bf16 %v8890_v4, %v8889_v58  ;;  %9045 = vpow2.f32 %v4755_v57 }
0x281e   :  { %v4859_v1 = vpop.permute.xlu1 %4858 }
0x281f   :  { %8612 = vmatprep.subr.bf16.mxu0 %v8611_v59 }
0x2820   :  { %8614 = vmatpush3.bf16.msra.mxu0 %v8611_v59 }
0x2822   :  { %v4865_v18 = vpop.permute.xlu1 %4864 }
0x2826   :  { %v9044_v9 = vpop.eup %9043 }
0x2827   :  { %v4757_v48 = vsel %vm884_vm10, %v9044_v9, 0.0  ;;  %v9046_v44 = vpop.eup %9045 }
0x2828   :  { %4758 = vadd.xlane.f32.xlu0 %v4757_v48  ;;  %v4760_v7 = vsel %vm884_vm10, %v9046_v44, 0.0  ;;  %v5016_v48 = vld [vmem:[%s10761_s18] sm:$0xff] }
0x282c   :  { %4761 = vadd.xlane.f32.xlu0 %v4760_v7 }
0x2842   :  { %4856 = vrot.lane.b32.xlu0 %v10242_v46, %s9131_s8  ;;  %v7169_v46 = vld [vmem:[%s10760_s17 + $0x68] sm:$0xff] }
0x2843   :  { %v8615_v11 = vpack.c.bf16 %v7169_v46, %v7168_v5 }
0x2845   :  { %8616 = vmatprep.subr.bf16.mxu0 %v8615_v11 }
0x2846   :  { %4866 = vrot.lane.b32.xlu0 %v8025_v23, %s10797_s4  ;;  %v4879_v23 = vsel %vm225_vm6, %v10236_v42, %v4859_v1 }
0x28b5   :  { %v4759_v8 = vpop.xlane.xlu0 %4758 }
0x28b6   :  { %9047 = vrcp.f32 %v4759_v8  ;;  %v5018_v8 = vld [vmem:[%s10761_s18 + $0x10] sm:$0xff] }
0x28b9   :  { %v4762_v12 = vpop.xlane.xlu0 %4761 }
0x28ba   :  { %9049 = vrcp.f32 %v4762_v12  ;;  %v5019_v12 = vld [vmem:[%s10761_s18 + $0x18] sm:$0xff] }
0x28bd   :  { %v4857_v45 = vpop.permute.xlu0 %4856 }
0x28be   :  { %v4878_v22 = vsel %vm225_vm6, %v10238_v25, %v4857_v45  ;;  %v4975_v25 = vrot.slane %v10134_v21, %v9624_v62  ;;  %v5013_v45 = vrot.slane %v10134_v21, %v9658_v35 }
0x28bf   :  { %v4880_v28 = vsel %vm884_vm10, %v4878_v22, %v4865_v18 }
0x28c0   :  { %v9048_v56 = vpop.eup %9047 }
0x28c1   :  { %v4765_v30 = vmul.f32 %v9048_v56, %v9044_v9  ;;  %v4867_v40 = vpop.permute.xlu0 %4866  ;;  %v8627_v56 = vpack.c.bf16 %v5019_v12, %v5018_v8 }
0x28c2   :  { %v4881_v29 = vsel %vm884_vm10, %v4879_v23, %v4867_v40  ;;  %v5126_v23 = vld [vmem:[%s10762_s19 + $0x8] sm:$0xff] }
0x28c3   :  { %8037 = vmatprep.mubr.msk.f32.mxu0 %vm884_vm10, %v4765_v30 }
0x28c4   :  { %v9050_v50 = vpop.eup %9049 }
0x28c5   :  { %v4766_v26 = vmul.f32 %v9050_v50, %v9046_v44  ;;  %v5017_v44 = vld [vmem:[%s10761_s18 + $0x8] sm:$0xff] }
0x28c6   :  { %v8623_v7 = vpack.c.bf16 %v5017_v44, %v5016_v48 }
0x28c7   :  { %8038 = vmatmul.mubr.msk.f32.vlgmr.msra.gmra.mrb[40].mxu0 %vm884_vm10, %v4766_v26 }
0x28c8   :  { %8618 = vmatpush3.bf16.msra.mxu0 %v8615_v11  ;;  %8624 = vmatprep.subr.bf16.mxu1 %v8623_v7  ;;  %v5007_v11 = vrot.slane %v10134_v21, %v9655_v33  ;;  %v5127_v21 = vld [vmem:[%s10762_s19 + $0x10] sm:$0xff] }
0x28c9   :  { %8620 = vmatprep.subr.bf16.mxu0 %v8619_v15  ;;  %8626 = vmatpush3.bf16.msra.mxu1 %v8623_v7 }
0x28ca   :  { %8628 = vmatprep.subr.bf16.mxu1 %v8627_v56 }
0x28cc   :  { %8622 = vmatpush3.bf16.msra.mxu0 %v8619_v15 }
0x28cd   :  { %8630 = vmatpush3.bf16.msra.mxu1 %v8627_v56 }
0x299a   :  { %v8039_v16 = vpop.f32.mrb[40].mxu0 }
0x299b   :  { %4874 = vrot.lane.b32.xlu0 %v8039_v16, %s10798_s25  ;;  %v4845_v61 = vpop.f32.mrb[41].mxu0 }
0x299c   :  { %4872 = vrot.lane.b32.xlu1 %v4845_v61, %s10798_s25 }
0x2a0d   :  { %v4875_v0 = vpop.permute.xlu0 %4874 }
0x2a0e   :  { %v4873_v27 = vpop.permute.xlu1 %4872  ;;  %v4883_v36 = vsel %vm1630_vm12, %v4881_v29, %v4875_v0  ;;  %v5125_v0 = vld [vmem:[%s10762_s19] sm:$0xff] }
0x2a0f   :  { %v4882_v31 = vsel %vm1630_vm12, %v4880_v28, %v4873_v27  ;;  %v8631_v27 = vpack.c.bf16 %v5126_v23, %v5125_v0  ;;  %v5128_v28 = vld [vmem:[%s10762_s19 + $0x18] sm:$0xff]  ;;  %v7177_v0 = vld [vmem:[%s10763_s20 + $0x8] ss:$0 sm:$0xff] }
0x2a10   :  { %8048 = vmatprep.mubr.msk.f32.mxu0 %vm435_vm4, %v4882_v31  ;;  %v8635_v29 = vpack.c.bf16 %v5128_v28, %v5127_v21  ;;  %v5129_v31 = vld [vmem:[%s10762_s19 + $0x20] sm:$0xff] }
0x2a11   :  { %8049 = vmatmul.mubr.msk.f32.vlgmr.msra.gmra.mrb[42].mxu0 %vm435_vm4, %v4883_v36  ;;  %8632 = vmatprep.subr.bf16.mxu0 %v8631_v27  ;;  %v5130_v36 = vld [vmem:[%s10762_s19 + $0x28] sm:$0xff] }
0x2a12   :  { %8634 = vmatpush3.bf16.msra.mxu0 %v8631_v27 }
0x2a13   :  { %8636 = vmatprep.subr.bf16.mxu0 %v8635_v29 }
0x2a16   :  { %8638 = vmatpush3.bf16.msra.mxu0 %v8635_v29 }
0x2ae4   :  { %v8050_v37 = vpop.f32.mrb[42].mxu0 }
0x2ae5   :  { %v4971_v49 = vadd.f32 %v8050_v37, %v10089_v47  ;;  %v4961_v42 = vpop.f32.mrb[43].mxu0  ;;  %v5131_v37 = vld [vmem:[%s10762_s19 + $0x30] sm:$0xff] }
0x2ae6   :  { %v4970_v60 = vadd.f32 %v4961_v42, %v10091_v51 }
0x2ae7   :  { %v10314_v55 = vadd.f32 %v4975_v25, %v4971_v49  ;;  %v5132_v49 = vld [vmem:[%s10762_s19 + $0x38] sm:$0xff] }
0x2ae8   :  { %v10316_v39 = vadd.f32 %v4975_v25, %v4970_v60  ;;  %v8639_v25 = vpack.c.bf16 %v5130_v36, %v5129_v31  ;;  %v8643_v42 = vpack.c.bf16 %v5132_v49, %v5131_v37  ;;  %v5133_v60 = vld [vmem:[%s10762_s19 + $0x40] sm:$0xff] }
0x2ae9   :  { %v4981_v52 = vsel %vm435_vm4, %v10314_v55, 0.0 }
0x2aea   :  { %4982 = vadd.xlane.f32.xlu0 %v4981_v52  ;;  %v4978_v53 = vsel %vm435_vm4, %v10316_v39, 0.0  ;;  %8640 = vmatprep.subr.bf16.mxu0 %v8639_v25  ;;  %v5134_v52 = vld [vmem:[%s10762_s19 + $0x48] sm:$0xff] }
0x2aeb   :  { %4979 = vadd.xlane.f32.xlu1 %v4978_v53  ;;  %8642 = vmatpush3.bf16.msra.mxu0 %v8639_v25  ;;  %v5135_v53 = vld [vmem:[%s10762_s19 + $0x50] sm:$0xff] }
0x2aec   :  { %8644 = vmatprep.subr.bf16.mxu0 %v8643_v42 }
0x2aef   :  { %8646 = vmatpush3.bf16.msra.mxu0 %v8643_v42 }
0x2b77   :  { %v4983_v54 = vpop.xlane.xlu0 %4982 }
0x2b78   :  { %v4985_v57 = vmul.f32 0.03125, %v4983_v54  ;;  %v4980_v38 = vpop.xlane.xlu1 %4979  ;;  %v8647_v54 = vpack.c.bf16 %v5134_v52, %v5133_v60 }
0x2b79   :  { %v4984_v2 = vmul.f32 0.03125, %v4980_v38 }
0x2b7a   :  { %v4987_v47 = vsub.f32 %v10314_v55, %v4985_v57  ;;  %v5136_v57 = vld [vmem:[%s10762_s19 + $0x58] sm:$0xff]  ;;  %8648 = vmatprep.subr.bf16.mxu0 %v8647_v54 }
0x2b7b   :  { %v4986_v51 = vsub.f32 %v10316_v39, %v4984_v2  ;;  %v8651_v38 = vpack.c.bf16 %v5136_v57, %v5135_v53  ;;  %v5137_v2 = vld [vmem:[%s10762_s19 + $0x60] sm:$0xff]  ;;  %8650 = vmatpush3.bf16.msra.mxu0 %v8647_v54 }
0x2b7c   :  { %v4989_v4 = vmul.f32 %v4987_v47, %v4987_v47 }
0x2b7d   :  { %v4988_v58 = vmul.f32 %v4986_v51, %v4986_v51  ;;  %8652 = vmatprep.subr.bf16.mxu0 %v8651_v38 }
0x2b7e   :  { %v4993_v59 = vsel %vm435_vm4, %v4989_v4, 0.0  ;;  %v5139_v4 = vld [vmem:[%s10762_s19 + $0x70] sm:$0xff] }
0x2b7f   :  { %4994 = vadd.xlane.f32.xlu1 %v4993_v59  ;;  %v4990_v9 = vsel %vm435_vm4, %v4988_v58, 0.0  ;;  %v5140_v58 = vld [vmem:[%s10762_s19 + $0x78] sm:$0xff]  ;;  %8654 = vmatpush3.bf16.msra.mxu0 %v8651_v38  ;;  %v7181_v38 = vld [vmem:[%s10760_s17 + $0x80] sm:$0xff] }
0x2b80   :  { %4991 = vadd.xlane.f32.xlu0 %v4990_v9  ;;  %v8659_v59 = vpack.c.bf16 %v5140_v58, %v5139_v4  ;;  %v7174_v9 = vld [vmem:[%s10764_s21] ss:$0 sm:$0xff]  ;;  %v7184_v4 = vld [vmem:[%s10760_s17 + $0x98] sm:$0xff] }
0x2c0c   :  { %v4995_v30 = vpop.xlane.xlu1 %4994 }
0x2c0d   :  { %v4997_v50 = vmul.f32 0.03125, %v4995_v30  ;;  %v4992_v26 = vpop.xlane.xlu0 %4991 }
0x2c0e   :  { %v4996_v5 = vmul.f32 0.03125, %v4992_v26 }
0x2c0f   :  { %v4999_v46 = vadd.f32 1e-05, %v4997_v50 }
0x2c10   :  { %v4998_v10 = vadd.f32 1e-05, %v4996_v5 }
0x2c11   :  { %9051 = vrsqrt.f32 %v4999_v46 }
0x2c12   :  { %9053 = vrsqrt.f32 %v4998_v10 }
0x2c1b   :  { %v9052_v13 = vpop.eup %9051 }
0x2c1c   :  { %v9054_v15 = vpop.eup %9053  ;;  %v5003_v16 = vmul.f32 %v9052_v13, %v4987_v47  ;;  %v5138_v47 = vld [vmem:[%s10762_s19 + $0x68] sm:$0xff] }
0x2c1d   :  { %v5002_v61 = vmul.f32 %v9054_v15, %v4986_v51  ;;  %v8655_v51 = vpack.c.bf16 %v5138_v47, %v5137_v2  ;;  %v7182_v2 = vld [vmem:[%s10760_s17 + $0x88] sm:$0xff] }
0x2c1e   :  { %v5009_v1 = vmul.f32 %v5007_v11, %v5003_v16  ;;  %v8663_v47 = vpack.c.bf16 %v7182_v2, %v7181_v38 }
0x2c1f   :  { %v5008_v40 = vmul.f32 %v5007_v11, %v5002_v61  ;;  %8656 = vmatprep.subr.bf16.mxu0 %v8655_v51 }
0x2c20   :  { %v5015_v22 = vadd.f32 %v5013_v45, %v5009_v1  ;;  %8658 = vmatpush3.bf16.msra.mxu0 %v8655_v51  ;;  %8664 = vmatprep.subr.bf16.mxu1 %v8663_v47  ;;  %v7183_v51 = vld [vmem:[%s10760_s17 + $0x90] sm:$0xff] }
0x2c21   :  { %v5014_v18 = vadd.f32 %v5013_v45, %v5008_v40  ;;  %8660 = vmatprep.subr.bf16.mxu0 %v8659_v59  ;;  %v8667_v58 = vpack.c.bf16 %v7184_v4, %v7183_v51 }
0x2c23   :  { %8059 = vmatprep.mubr.msk.f32.mxu1 %vm435_vm4, %v5014_v18 }
0x2c24   :  { %8060 = vmatmul.mubr.msk.f32.vlgmr.msra.gmra.mrb[46].mxu1 %vm435_vm4, %v5015_v22  ;;  %8662 = vmatpush3.bf16.msra.mxu0 %v8659_v59  ;;  %v7187_v59 = vld [vmem:[%s10760_s17 + $0xa0] sm:$0xff] }
0x2c25   :  { %8666 = vmatpush3.bf16.msra.mxu1 %v8663_v47 }
0x2c26   :  { %8668 = vmatprep.subr.bf16.mxu1 %v8667_v58 }
0x2c29   :  { %8670 = vmatpush3.bf16.msra.mxu1 %v8667_v58 }
0x2cf7   :  { %v8061_v48 = vpop.f32.mrb[46].mxu1 }
0x2cf8   :  { %v5104_v44 = vadd.f32 %v8061_v48, %v7174_v9  ;;  %v5098_v7 = vpop.f32.mrb[47].mxu1 }
0x2cf9   :  { %v5099_v8 = vadd.f32 %v7174_v9, %v5098_v7  ;;  %v7188_v9 = vld [vmem:[%s10760_s17 + $0xa8] sm:$0xff] }
0x2cfa   :  { %v5108_v12 = vmul.f32 %v5104_v44, %v5104_v44  ;;  %v8671_v48 = vpack.c.bf16 %v7188_v9, %v7187_v59 }
0x2cfb   :  { %v5107_v56 = vmul.f32 %v5099_v8, %v5099_v8 }
0x2cfc   :  { %v5110_v30 = vmul.f32 %v5108_v12, %v5104_v44  ;;  %8672 = vmatprep.subr.bf16.mxu1 %v8671_v48 }
0x2cfd   :  { %v5109_v50 = vmul.f32 %v5107_v56, %v5099_v8 }
0x2cfe   :  { %v5112_v26 = vmul.f32 0.044715, %v5110_v30 }
0x2cff   :  { %v5111_v5 = vmul.f32 0.044715, %v5109_v50  ;;  %v10433_v50 = vld [vmem:[%s10763_s20 + $0x10] sm:$0xff] }
0x2d00   :  { %v5114_v46 = vadd.f32 %v5112_v26, %v5104_v44  ;;  %v5258_v26 = vrot.slane %v10433_v50, %v9407_v17 }
0x2d01   :  { %v5113_v10 = vadd.f32 %v5111_v5, %v5099_v8 }
0x2d02   :  { %v5116_v11 = vmul.f32 0.7978846, %v5114_v46 }
0x2d03   :  { %v5115_v13 = vmul.f32 0.7978846, %v5113_v10 }
0x2d04   :  { %9055 = vtanh.f32 %v5116_v11 }
0x2d05   :  { %9057 = vtanh.f32 %v5115_v13  ;;  %v5264_v13 = vrot.slane %v10433_v50, %v9413_v19 }
0x2d0e   :  { %v9056_v15 = vpop.eup %9055 }
0x2d0f   :  { %v9058_v16 = vpop.eup %9057  ;;  %v5120_v61 = vadd.f32 1.0, %v9056_v15 }
0x2d10   :  { %v5119_v45 = vadd.f32 1.0, %v9058_v16 }
0x2d11   :  { %v5122_v1 = vmul.f32 0.5, %v5120_v61  ;;  %v7189_v61 = vld [vmem:[%s10760_s17 + $0xb0] sm:$0xff] }
0x2d12   :  { %v5121_v40 = vmul.f32 0.5, %v5119_v45  ;;  %v7190_v45 = vld [vmem:[%s10760_s17 + $0xb8] sm:$0xff] }
0x2d13   :  { %v5124_v22 = vmul.f32 %v5122_v1, %v5104_v44 }
0x2d14   :  { %v5123_v18 = vmul.f32 %v5121_v40, %v5099_v8 }
0x2d16   :  { %8094 = vmatprep.mubr.f32.mxu0 %v5123_v18  ;;  %v8675_v18 = vpack.c.bf16 %v7190_v45, %v7189_v61 }
0x2d17   :  { %8095 = vmatmul.mubr.f32.vlgmr.msra.gmra.mrb[44].mxu0 %v5124_v22  ;;  %v7193_v22 = vld [vmem:[%s10760_s17 + $0xc0] sm:$0xff] }
0x2dea   :  { %v8096_v23 = vpop.f32.mrb[44].mxu0 }
0x2deb   :  { %v5217_v27 = vadd.f32 %v8096_v23, %v10314_v55  ;;  %v5207_v21 = vpop.f32.mrb[45].mxu0 }
0x2dec   :  { %v5216_v28 = vadd.f32 %v5207_v21, %v10316_v39  ;;  %v7196_v21 = vld [vmem:[%s10760_s17 + $0xd8] sm:$0xff] }
0x2ded   :  { %v10400_v29 = vadd.f32 %v7177_v0, %v5217_v27  ;;  %v7195_v27 = vld [vmem:[%s10760_s17 + $0xd0] sm:$0xff] }
0x2dee   :  { %v10402_v31 = vadd.f32 %v7177_v0, %v5216_v28  ;;  %v7194_v0 = vld [vmem:[%s10760_s17 + $0xc8] sm:$0xff]  ;;  %v8683_v28 = vpack.c.bf16 %v7196_v21, %v7195_v27 }
0x2def   :  { %v5232_v36 = vsel %vm435_vm4, %v10400_v29, 0.0  ;;  %v8679_v23 = vpack.c.bf16 %v7194_v0, %v7193_v22 }
0x2df0   :  { %5233 = vadd.xlane.f32.xlu1 %v5232_v36  ;;  %v5229_v25 = vsel %vm435_vm4, %v10402_v31, 0.0  ;;  %v5275_v36 = vrot.slane %v10433_v50, %v9481_v20 }
0x2df1   :  { %5230 = vadd.xlane.f32.xlu0 %v5229_v25 }
0x2e7d   :  { %v5234_v37 = vpop.xlane.xlu1 %5233 }
0x2e7e   :  { %v5236_v49 = vmul.f32 0.03125, %v5234_v37  ;;  %v5231_v42 = vpop.xlane.xlu0 %5230 }
0x2e7f   :  { %v5235_v60 = vmul.f32 0.03125, %v5231_v42  ;;  %v5365_v42 = vrot.slane %v10433_v50, %v9486_v24 }
0x2e80   :  { %v5238_v55 = vsub.f32 %v10400_v29, %v5236_v49 }
0x2e81   :  { %v5237_v39 = vsub.f32 %v10402_v31, %v5235_v60 }
0x2e82   :  { %v5240_v52 = vmul.f32 %v5238_v55, %v5238_v55 }
0x2e83   :  { %v5239_v53 = vmul.f32 %v5237_v39, %v5237_v39 }
0x2e84   :  { %v5244_v54 = vsel %vm435_vm4, %v5240_v52, 0.0 }
0x2e85   :  { %5245 = vadd.xlane.f32.xlu1 %v5244_v54  ;;  %v5241_v57 = vsel %vm435_vm4, %v5239_v53, 0.0 }
0x2e86   :  { %5242 = vadd.xlane.f32.xlu0 %v5241_v57  ;;  %v5449_v57 = vrot.slane %v10433_v50, %v9492_v32 }
0x2f12   :  { %v5246_v44 = vpop.xlane.xlu1 %5245 }
0x2f13   :  { %v5248_v7 = vmul.f32 0.03125, %v5246_v44  ;;  %v5243_v8 = vpop.xlane.xlu0 %5242 }
0x2f14   :  { %v5247_v12 = vmul.f32 0.03125, %v5243_v8 }
0x2f15   :  { %v5250_v56 = vadd.f32 1e-05, %v5248_v7 }
0x2f16   :  { %v5249_v30 = vadd.f32 1e-05, %v5247_v12 }
0x2f17   :  { %9059 = vrsqrt.f32 %v5250_v56 }
0x2f18   :  { %9061 = vrsqrt.f32 %v5249_v30 }
0x2f21   :  { %v9060_v5 = vpop.eup %9059 }
0x2f22   :  { %v9062_v46 = vpop.eup %9061  ;;  %v5254_v10 = vmul.f32 %v9060_v5, %v5238_v55 }
0x2f23   :  { %v5253_v11 = vmul.f32 %v9062_v46, %v5237_v39 }
0x2f24   :  { %v5260_v15 = vmul.f32 %v5258_v26, %v5254_v10 }
0x2f25   :  { %v5259_v16 = vmul.f32 %v5258_v26, %v5253_v11 }
0x2f26   :  { %v5266_v40 = vadd.f32 %v5264_v13, %v5260_v15 }
0x2f27   :  { %v5265_v1 = vadd.f32 %v5264_v13, %v5259_v16 }
0x2f29   :  { %8105 = vmatprep.mubr.msk.f32.mxu1 %vm435_vm4, %v5265_v1 }
0x2f2a   :  { %8106 = vmatmul.mubr.msk.f32.vlgmr.msra.gmra.mrb[48].mxu1 %vm435_vm4, %v5266_v40 }
0x2f2b   :  { %8674 = vmatpush3.bf16.msra.mxu1 %v8671_v48  ;;  %8116 = vmatprep.mubr.msk.f32.mxu1 %vm435_vm4, %v5265_v1 }
0x2f2c   :  { %8676 = vmatprep.subr.bf16.mxu1 %v8675_v18 }
0x2f2f   :  { %8678 = vmatpush3.bf16.msra.mxu1 %v8675_v18 }
0x2f30   :  { %8680 = vmatprep.subr.bf16.mxu1 %v8679_v23 }
0x2f32   :  { %8117 = vmatmul.mubr.msk.f32.vlgmr.msra.gmra.mrb[50].mxu1 %vm435_vm4, %v5266_v40 }
0x2f33   :  { %8682 = vmatpush3.bf16.msra.mxu1 %v8679_v23  ;;  %8127 = vmatprep.mubr.msk.f32.mxu1 %vm435_vm4, %v5265_v1 }
0x2f34   :  { %8684 = vmatprep.subr.bf16.mxu1 %v8683_v28 }
0x2f37   :  { %8686 = vmatpush3.bf16.msra.mxu1 %v8683_v28 }
0x2f3a   :  { %8128 = vmatmul.mubr.msk.f32.vlgmr.msra.gmra.mrb[52].mxu1 %vm435_vm4, %v5266_v40 }
0x2ffd   :  { %v8107_v25 = vpop.f32.mrb[48].mxu1 }
0x2ffe   :  { %v5348_v37 = vpop.f32.mrb[49].mxu1  ;;  %v10473_v60 = vadd.f32 %v8107_v25, %v5275_v36 }
0x2fff   :  { %v10465_v49 = vadd.f32 %v5348_v37, %v5275_v36 }
0x3001   :  { %5719 = vrot.lane.b32.xlu1 %v10465_v49, %s9129_s6  ;;  %8134 = vmatprep.mubr.msk.f32.mxu1 %vm225_vm6, %v10465_v49 }
0x3005   :  { %v8118_v55 = vpop.f32.mrb[50].mxu1  ;;  %5721 = vrot.lane.b32.xlu1 %v10473_v60, %s9129_s6 }
0x3006   :  { %v5438_v20 = vadd.f32 %v8118_v55, %v5365_v42  ;;  %v5432_v39 = vpop.f32.mrb[51].mxu1 }
0x3007   :  { %v5433_v52 = vadd.f32 %v5432_v39, %v5365_v42 }
0x3009   :  { %v10477_v53 = vpack.i.bf16 %v5438_v20, %v5433_v52  ;;  %v8687_v54 = vpack.c.bf16 %v5438_v20, %v5433_v52 }
0x300b   :  { %8892 = vrot.lane.b32.xlu0 %v10477_v53, %s9129_s6  ;;  %8689 = vmatprep.subr.msk.bf16.mxu1 %vm9496_vm5, %v8687_v54 }
0x300c   :  { %8692 = vmatpush3.bf16.xpose.msk.msra.mxu1 %vm9496_vm5, %v8687_v54 }
0x300d   :  { %v8129_v24 = vpop.f32.mrb[52].mxu1 }
0x300e   :  { %v5522_v38 = vadd.f32 %v8129_v24, %v5449_v57  ;;  %v5516_v2 = vpop.f32.mrb[53].mxu1 }
0x300f   :  { %v5517_v47 = vadd.f32 %v5516_v2, %v5449_v57 }
0x3011   :  { %v8693_v51 = vpack.c.bf16 %v5522_v38, %v5517_v47  ;;  %v10487_v4 = vpack.i.bf16 %v5522_v38, %v5517_v47 }
0x3013   :  { %8135 = vmatmul.mubr.msk.f32.vlgmr.msra.gmra.mrb[54].mxu1 %vm225_vm6, %v10473_v60  ;;  %8694 = vmatprep.subr.bf16.mxu0 %v8693_v51 }
0x3014   :  { %8696 = vmatpush3.bf16.msra.mxu0 %v8693_v51 }
0x3073   :  { %v5720_v32 = vpop.permute.xlu1 %5719 }
0x3074   :  { %8148 = vmatprep.mubr.msk.f32.mxu1 %vm225_vm6, %v5720_v32 }
0x3077   :  { %v5722_v44 = vpop.permute.xlu1 %5721 }
0x307d   :  { %v8893_v58 = vpop.permute.xlu0 %8892 }
0x307e   :  { %v8895_v59 = vunpack.i.h.bf16 %v8893_v58  ;;  %v8894_v9 = vunpack.i.l.bf16 %v8893_v58 }
0x3080   :  { %v8697_v48 = vpack.c.bf16 %v8895_v59, %v8894_v9 }
0x3082   :  { %8699 = vmatprep.subr.msk.bf16.mxu1 %vm9496_vm5, %v8697_v48 }
0x3083   :  { %8702 = vmatpush3.bf16.xpose.msk.msra.mxu1 %vm9496_vm5, %v8697_v48 }
0x308a   :  { %8149 = vmatmul.mubr.msk.f32.vlgmr.msra.gmra.mrb[56].mxu1 %vm225_vm6, %v5722_v44 }
0x30e6   :  { %v8136_v7 = vpop.f32.mrb[54].mxu1 }
0x30e7   :  { %v5613_v8 = vmul.f32 0.35355338, %v8136_v7  ;;  %v5603_v12 = vpop.f32.mrb[55].mxu1 }
0x30e8   :  { %v5612_v56 = vmul.f32 0.35355338, %v5603_v12 }
0x30e9   :  { %v5615_v30 = vsel %vm10194_vm14, %v5613_v8, -1e+30 }
0x30ea   :  { %v5614_v26 = vsel %vm10198_vm1, %v5612_v56, -1e+30  ;;  %v5619_v5 = vsel %vm884_vm10, %v5615_v30, -inf }
0x30eb   :  { %5620 = vmax.xlane.f32.xlu1 %v5619_v5  ;;  %v5616_v46 = vsel %vm884_vm10, %v5614_v26, -inf }
0x30ec   :  { %5617 = vmax.xlane.f32.xlu0 %v5616_v46 }
0x30fc   :  { %8897 = vrot.lane.b32.xlu1 %v10487_v4, %s9129_s6 }
0x315d   :  { %v8150_v10 = vpop.f32.mrb[56].mxu1 }
0x315e   :  { %v5801_v11 = vpop.f32.mrb[57].mxu1  ;;  %v5811_v13 = vmul.f32 0.35355338, %v8150_v10 }
0x315f   :  { %v5810_v15 = vmul.f32 0.35355338, %v5801_v11 }
0x3160   :  { %v5813_v45 = vsel %vm10194_vm14, %v5811_v13, -1e+30 }
0x3161   :  { %v5812_v16 = vsel %vm10198_vm1, %v5810_v15, -1e+30  ;;  %v5817_v1 = vsel %vm884_vm10, %v5813_v45, -inf }
0x3162   :  { %v5814_v61 = vsel %vm884_vm10, %v5812_v16, -inf }
0x3163   :  { %5815 = vmax.xlane.f32.xlu0 %v5814_v61 }
0x3167   :  { %5818 = vmax.xlane.f32.xlu0 %v5817_v1 }
0x3178   :  { %v5621_v40 = vpop.xlane.xlu1 %5620 }
0x3179   :  { %v5623_v18 = vsub.f32 %v5615_v30, %v5621_v40  ;;  %v5618_v22 = vpop.xlane.xlu0 %5617 }
0x317a   :  { %v5622_v0 = vsub.f32 %v5614_v26, %v5618_v22 }
0x317b   :  { %v5626_v23 = vmul.f32 1.442695, %v5623_v18 }
0x317c   :  { %v5624_v27 = vmul.f32 1.442695, %v5622_v0  ;;  %v8898_v21 = vpop.permute.xlu1 %8897 }
0x317d   :  { %9063 = vpow2.f32 %v5626_v23  ;;  %v8900_v28 = vunpack.i.h.bf16 %v8898_v21  ;;  %v8899_v36 = vunpack.i.l.bf16 %v8898_v21 }
0x317e   :  { %9065 = vpow2.f32 %v5624_v27 }
0x317f   :  { %v8703_v25 = vpack.c.bf16 %v8900_v28, %v8899_v36 }
0x3181   :  { %8704 = vmatprep.subr.bf16.mxu0 %v8703_v25 }
0x3187   :  { %v9064_v37 = vpop.eup %9063 }
0x3188   :  { %v9066_v42 = vpop.eup %9065  ;;  %v5631_v55 = vsel %vm884_vm10, %v9064_v37, 0.0 }
0x3189   :  { %5632 = vadd.xlane.f32.xlu0 %v5631_v55  ;;  %v5628_v20 = vsel %vm884_vm10, %v9066_v42, 0.0 }
0x318a   :  { %5629 = vadd.xlane.f32.xlu1 %v5628_v20 }
0x319b   :  { %5925 = vrot.lane.b32.xlu1 %v10465_v49, %s9128_s28 }
0x31f0   :  { %v5816_v39 = vpop.xlane.xlu0 %5815 }
0x31f1   :  { %v5820_v52 = vsub.f32 %v5812_v16, %v5816_v39 }
0x31f3   :  { %v5822_v54 = vmul.f32 1.442695, %v5820_v52 }
0x31f4   :  { %v5819_v57 = vpop.xlane.xlu0 %5818 }
0x31f5   :  { %9067 = vpow2.f32 %v5822_v54  ;;  %v5821_v24 = vsub.f32 %v5813_v45, %v5819_v57 }
0x31f7   :  { %v5824_v38 = vmul.f32 1.442695, %v5821_v24 }
0x31f9   :  { %9069 = vpow2.f32 %v5824_v38 }
0x31ff   :  { %v9068_v2 = vpop.eup %9067 }
0x3200   :  { %v5826_v47 = vsel %vm884_vm10, %v9068_v2, 0.0 }
0x3201   :  { %5827 = vadd.xlane.f32.xlu1 %v5826_v47 }
0x3203   :  { %v9070_v51 = vpop.eup %9069 }
0x3204   :  { %v5829_v32 = vsel %vm884_vm10, %v9070_v51, 0.0 }
0x3205   :  { %5830 = vadd.xlane.f32.xlu0 %v5829_v32 }
0x3212   :  { %5927 = vrot.lane.b32.xlu1 %v10473_v60, %s9128_s28 }
0x3216   :  { %v5633_v58 = vpop.xlane.xlu0 %5632 }
0x3217   :  { %9071 = vrcp.f32 %v5633_v58  ;;  %v5630_v59 = vpop.xlane.xlu1 %5629 }
0x3218   :  { %9073 = vrcp.f32 %v5630_v59 }
0x321b   :  { %8902 = vrot.lane.b32.xlu0 %v10477_v53, %s9128_s28  ;;  %v5926_v8 = vpop.permute.xlu1 %5925 }
0x3221   :  { %v9072_v9 = vpop.eup %9071 }
0x3222   :  { %v9074_v48 = vpop.eup %9073  ;;  %v5637_v7 = vmul.f32 %v9072_v9, %v9064_v37 }
0x3223   :  { %v5636_v44 = vmul.f32 %v9074_v48, %v9066_v42 }
0x3225   :  { %8141 = vmatprep.mubr.msk.f32.mxu0 %vm884_vm10, %v5636_v44 }
0x3226   :  { %8142 = vmatmul.mubr.msk.f32.vlgmr.msra.gmra.mrb[46].mxu0 %vm884_vm10, %v5637_v7 }
0x3227   :  { %8706 = vmatpush3.bf16.msra.mxu0 %v8703_v25 }
0x328e   :  { %v5828_v12 = vpop.xlane.xlu1 %5827 }
0x328f   :  { %9075 = vrcp.f32 %v5828_v12 }
0x3292   :  { %v5831_v56 = vpop.xlane.xlu0 %5830  ;;  %v5928_v16 = vpop.permute.xlu1 %5927 }
0x3293   :  { %9077 = vrcp.f32 %v5831_v56 }
0x3296   :  { %v8903_v30 = vpop.permute.xlu0 %8902 }
0x3297   :  { %v8905_v26 = vunpack.i.h.bf16 %v8903_v30  ;;  %v8904_v5 = vunpack.i.l.bf16 %v8903_v30 }
0x3299   :  { %v9076_v46 = vpop.eup %9075  ;;  %v8707_v10 = vpack.c.bf16 %v8905_v26, %v8904_v5 }
0x329a   :  { %v5834_v11 = vmul.f32 %v9076_v46, %v9068_v2 }
0x329b   :  { %8709 = vmatprep.subr.msk.bf16.mxu0 %vm9496_vm5, %v8707_v10 }
0x329c   :  { %8155 = vmatprep.mubr.msk.f32.mxu0 %vm884_vm10, %v5834_v11 }
0x329d   :  { %v9078_v13 = vpop.eup %9077 }
0x329e   :  { %v5835_v15 = vmul.f32 %v9078_v13, %v9070_v51 }
0x32a0   :  { %8156 = vmatmul.mubr.msk.f32.vlgmr.msra.gmra.mrb[48].mxu0 %vm884_vm10, %v5835_v15 }
0x32a1   :  { %8712 = vmatpush3.bf16.xpose.msk.msra.mxu0 %vm9496_vm5, %v8707_v10  ;;  %8162 = vmatprep.mubr.msk.f32.mxu0 %vm225_vm6, %v5926_v8 }
0x32a8   :  { %8163 = vmatmul.mubr.msk.f32.vlgmr.msra.gmra.mrb[50].mxu0 %vm225_vm6, %v5928_v16 }
0x32f9   :  { %v10531_v61 = vpop.f32.mrb[46].mxu0 }
0x32fa   :  { %v10533_v45 = vpop.f32.mrb[47].mxu0 }
0x3373   :  { %v10535_v1 = vpop.f32.mrb[48].mxu0 }
0x3374   :  { %v10537_v40 = vpop.f32.mrb[49].mxu0 }
0x337b   :  { %v8164_v18 = vpop.f32.mrb[50].mxu0 }
0x337c   :  { %v6017_v22 = vmul.f32 0.35355338, %v8164_v18  ;;  %v6007_v0 = vpop.f32.mrb[51].mxu0 }
0x337d   :  { %v6016_v23 = vmul.f32 0.35355338, %v6007_v0 }
0x337e   :  { %v6019_v27 = vsel %vm10194_vm14, %v6017_v22, -1e+30 }
0x337f   :  { %v6018_v21 = vsel %vm10198_vm1, %v6016_v23, -1e+30  ;;  %v6023_v28 = vsel %vm884_vm10, %v6019_v27, -inf }
0x3380   :  { %6024 = vmax.xlane.f32.xlu1 %v6023_v28  ;;  %v6020_v36 = vsel %vm884_vm10, %v6018_v21, -inf }
0x3381   :  { %6021 = vmax.xlane.f32.xlu0 %v6020_v36 }
0x3391   :  { %8907 = vrot.lane.b32.xlu1 %v10487_v4, %s9128_s28 }
0x3395   :  { %6129 = vrot.lane.b32.xlu1 %v10465_v49, %s9130_s2 }
0x3399   :  { %6131 = vrot.lane.b32.xlu1 %v10473_v60, %s9130_s2 }
0x340d   :  { %v6025_v25 = vpop.xlane.xlu1 %6024 }
0x340e   :  { %v6027_v37 = vsub.f32 %v6019_v27, %v6025_v25  ;;  %v6022_v42 = vpop.xlane.xlu0 %6021 }
0x340f   :  { %v6026_v55 = vsub.f32 %v6018_v21, %v6022_v42 }
0x3410   :  { %v6030_v20 = vmul.f32 1.442695, %v6027_v37 }
0x3411   :  { %v6028_v39 = vmul.f32 1.442695, %v6026_v55  ;;  %v8908_v52 = vpop.permute.xlu1 %8907 }
0x3412   :  { %9079 = vpow2.f32 %v6030_v20  ;;  %v8910_v54 = vunpack.i.h.bf16 %v8908_v52  ;;  %v8909_v57 = vunpack.i.l.bf16 %v8908_v52 }
0x3413   :  { %9081 = vpow2.f32 %v6028_v39 }
0x3414   :  { %v8713_v24 = vpack.c.bf16 %v8910_v54, %v8909_v57  ;;  %v7223_v54 = vld [vmem:[%s10760_s17 + $0xe0] sm:$0xff]  ;;  %v7225_v57 = vld [vmem:[%s10760_s17 + $0xf0] sm:$0xff] }
0x3415   :  { %v6130_v12 = vpop.permute.xlu1 %6129 }
0x3416   :  { %8714 = vmatprep.subr.bf16.mxu1 %v8713_v24 }
0x3417   :  { %8716 = vmatpush3.bf16.msra.mxu1 %v8713_v24 }
0x341c   :  { %v9080_v38 = vpop.eup %9079 }
0x341d   :  { %v6035_v49 = vsel %vm884_vm10, %v9080_v38, 0.0  ;;  %v9082_v2 = vpop.eup %9081 }
0x341e   :  { %6036 = vadd.xlane.f32.xlu0 %v6035_v49  ;;  %v6032_v60 = vsel %vm884_vm10, %v9082_v2, 0.0 }
0x3422   :  { %6033 = vadd.xlane.f32.xlu0 %v6032_v60 }
0x3438   :  { %8912 = vrot.lane.b32.xlu0 %v10477_v53, %s9130_s2  ;;  %v6132_v53 = vpop.permute.xlu1 %6131 }
0x34ab   :  { %v6037_v47 = vpop.xlane.xlu0 %6036 }
0x34ac   :  { %9083 = vrcp.f32 %v6037_v47 }
0x34af   :  { %v6034_v51 = vpop.xlane.xlu0 %6033 }
0x34b0   :  { %9085 = vrcp.f32 %v6034_v51 }
0x34b3   :  { %v8913_v32 = vpop.permute.xlu0 %8912 }
0x34b4   :  { %v8915_v58 = vunpack.i.h.bf16 %v8913_v32  ;;  %v8914_v59 = vunpack.i.l.bf16 %v8913_v32 }
0x34b6   :  { %v8717_v9 = vpack.c.bf16 %v8915_v58, %v8914_v59  ;;  %v9084_v48 = vpop.eup %9083 }
0x34b7   :  { %v6041_v8 = vmul.f32 %v9084_v48, %v9080_v38  ;;  %v7226_v38 = vld [vmem:[%s10760_s17 + $0xf8] sm:$0xff] }
0x34b8   :  { %8719 = vmatprep.subr.msk.bf16.mxu1 %vm9496_vm5, %v8717_v9  ;;  %v8731_v49 = vpack.c.bf16 %v7226_v38, %v7225_v57 }
0x34ba   :  { %v9086_v44 = vpop.eup %9085 }
0x34bb   :  { %v6040_v7 = vmul.f32 %v9086_v44, %v9082_v2 }
0x34bd   :  { %8169 = vmatprep.mubr.msk.f32.mxu1 %vm884_vm10, %v6040_v7 }
0x34be   :  { %8170 = vmatmul.mubr.msk.f32.vlgmr.msra.gmra.mrb[58].mxu1 %vm884_vm10, %v6041_v8 }
0x34bf   :  { %8722 = vmatpush3.bf16.xpose.msk.msra.mxu1 %vm9496_vm5, %v8717_v9  ;;  %8176 = vmatprep.mubr.msk.f32.mxu1 %vm225_vm6, %v6130_v12 }
0x34c6   :  { %8177 = vmatmul.mubr.msk.f32.vlgmr.msra.gmra.mrb[60].mxu1 %vm225_vm6, %v6132_v53 }
0x3591   :  { %v8171_v56 = vpop.f32.mrb[58].mxu1 }
0x3592   :  { %v6120_v30 = vpop.f32.mrb[59].mxu1 }
0x3599   :  { %v8178_v26 = vpop.f32.mrb[60].mxu1 }
0x359a   :  { %v6221_v5 = vmul.f32 0.35355338, %v8178_v26  ;;  %v6211_v46 = vpop.f32.mrb[61].mxu1 }
0x359b   :  { %v6220_v10 = vmul.f32 0.35355338, %v6211_v46 }
0x359c   :  { %v6223_v11 = vsel %vm10194_vm14, %v6221_v5, -1e+30 }
0x359d   :  { %v6222_v13 = vsel %vm10198_vm1, %v6220_v10, -1e+30  ;;  %v6227_v34 = vsel %vm884_vm10, %v6223_v11, -inf }
0x359e   :  { %6228 = vmax.xlane.f32.xlu1 %v6227_v34  ;;  %v6224_v15 = vsel %vm884_vm10, %v6222_v13, -inf }
0x359f   :  { %6225 = vmax.xlane.f32.xlu0 %v6224_v15 }
0x35af   :  { %8917 = vrot.lane.b32.xlu1 %v10487_v4, %s9130_s2 }
0x35b3   :  { %6337 = vrot.lane.b32.xlu1 %v10535_v1, %s9131_s8 }
0x35b7   :  { %6343 = vrot.lane.b32.xlu1 %v6120_v30, %s10797_s4 }
0x362b   :  { %v6229_v16 = vpop.xlane.xlu1 %6228 }
0x362c   :  { %v6231_v14 = vsub.f32 %v6223_v11, %v6229_v16  ;;  %v6226_v18 = vpop.xlane.xlu0 %6225 }
0x362d   :  { %v6230_v22 = vsub.f32 %v6222_v13, %v6226_v18 }
0x362e   :  { %v6234_v63 = vmul.f32 1.442695, %v6231_v14 }
0x362f   :  { %v6232_v0 = vmul.f32 1.442695, %v6230_v22  ;;  %v8918_v23 = vpop.permute.xlu1 %8917 }
0x3630   :  { %v8920_v27 = vunpack.i.h.bf16 %v8918_v23  ;;  %v8919_v21 = vunpack.i.l.bf16 %v8918_v23 }
0x3631   :  { %9087 = vpow2.f32 %v6232_v0  ;;  %v7230_v0 = vld [vmem:[%s10761_s18 + $0x28] sm:$0xff] }
0x3632   :  { %v8723_v28 = vpack.c.bf16 %v8920_v27, %v8919_v21  ;;  %9089 = vpow2.f32 %v6234_v63  ;;  %v7229_v63 = vld [vmem:[%s10761_s18 + $0x20] sm:$0xff]  ;;  %v7231_v27 = vld [vmem:[%s10761_s18 + $0x30] sm:$0xff]  ;;  %v7232_v21 = vld [vmem:[%s10761_s18 + $0x38] sm:$0xff] }
0x3633   :  { %v6338_v51 = vpop.permute.xlu1 %6337  ;;  %v8735_v23 = vpack.c.bf16 %v7230_v0, %v7229_v63 }
0x3634   :  { %8724 = vmatprep.subr.bf16.mxu0 %v8723_v28  ;;  %v6358_v48 = vsel %vm225_vm6, %v10531_v61, %v6338_v51  ;;  %v7240_v51 = vld [vmem:[%s10762_s19 + $0xa0] sm:$0xff] }
0x3635   :  { %8726 = vmatpush3.bf16.msra.mxu0 %v8723_v28  ;;  %8736 = vmatprep.subr.bf16.mxu1 %v8735_v23  ;;  %v8739_v28 = vpack.c.bf16 %v7232_v21, %v7231_v27 }
0x3636   :  { %8738 = vmatpush3.bf16.msra.mxu1 %v8735_v23 }
0x3637   :  { %v6344_v58 = vpop.permute.xlu1 %6343  ;;  %8740 = vmatprep.subr.bf16.mxu1 %v8739_v28 }
0x363a   :  { %8742 = vmatpush3.bf16.msra.mxu1 %v8739_v28 }
0x363b   :  { %v9088_v4 = vpop.eup %9087  ;;  %8775 = vmatprep.subr.bf16.mxu1 %v9126_v3 }
0x363c   :  { %v6236_v36 = vsel %vm884_vm10, %v9088_v4, 0.0  ;;  %v9090_v1 = vpop.eup %9089 }
0x363d   :  { %6237 = vadd.xlane.f32.xlu0 %v6236_v36  ;;  %v6239_v25 = vsel %vm884_vm10, %v9090_v1, 0.0 }
0x3641   :  { %6240 = vadd.xlane.f32.xlu0 %v6239_v25 }
0x3657   :  { %6335 = vrot.lane.b32.xlu0 %v10537_v40, %s9131_s8  ;;  %v7224_v40 = vld [vmem:[%s10760_s17 + $0xe8] sm:$0xff] }
0x3658   :  { %v8727_v24 = vpack.c.bf16 %v7224_v40, %v7223_v54  ;;  %v6492_v40 = vrot.slane %v10433_v50, %v9658_v35 }
0x365a   :  { %8728 = vmatprep.subr.bf16.mxu0 %v8727_v24 }
0x365b   :  { %6345 = vrot.lane.b32.xlu0 %v8171_v56, %s10797_s4 }
0x36ca   :  { %v6238_v37 = vpop.xlane.xlu0 %6237 }
0x36cb   :  { %9091 = vrcp.f32 %v6238_v37 }
0x36ce   :  { %v6241_v42 = vpop.xlane.xlu0 %6240 }
0x36cf   :  { %9093 = vrcp.f32 %v6241_v42 }
0x36d2   :  { %v6336_v47 = vpop.permute.xlu0 %6335 }
0x36d3   :  { %v6357_v59 = vsel %vm225_vm6, %v10533_v45, %v6336_v47  ;;  %v6454_v45 = vrot.slane %v10433_v50, %v9624_v62 }
0x36d4   :  { %v6359_v7 = vsel %vm884_vm10, %v6357_v59, %v6344_v58  ;;  %v7242_v59 = vld [vmem:[%s10762_s19 + $0xb0] sm:$0xff] }
0x36d5   :  { %v9092_v55 = vpop.eup %9091 }
0x36d6   :  { %v6244_v20 = vmul.f32 %v9092_v55, %v9088_v4  ;;  %v6346_v32 = vpop.permute.xlu0 %6345  ;;  %v6486_v55 = vrot.slane %v10433_v50, %v9655_v33  ;;  %v7236_v33 = vld [vmem:[%s10762_s19 + $0x80] sm:$0xff]  ;;  %v7238_v50 = vld [vmem:[%s10762_s19 + $0x90] sm:$0xff] }
0x36d7   :  { %v6360_v8 = vsel %vm884_vm10, %v6358_v48, %v6346_v32  ;;  %v7241_v32 = vld [vmem:[%s10762_s19 + $0xa8] sm:$0xff] }
0x36d8   :  { %8183 = vmatprep.mubr.msk.f32.mxu0 %vm884_vm10, %v6244_v20  ;;  %v8751_v58 = vpack.c.bf16 %v7241_v32, %v7240_v51 }
0x36d9   :  { %v9094_v39 = vpop.eup %9093 }
0x36da   :  { %v6245_v52 = vmul.f32 %v9094_v39, %v9090_v1 }
0x36dc   :  { %8184 = vmatmul.mubr.msk.f32.vlgmr.msra.gmra.mrb[52].mxu0 %vm884_vm10, %v6245_v52 }
0x36dd   :  { %8730 = vmatpush3.bf16.msra.mxu0 %v8727_v24 }
0x36de   :  { %8732 = vmatprep.subr.bf16.mxu0 %v8731_v49 }
0x36e1   :  { %8734 = vmatpush3.bf16.msra.mxu0 %v8731_v49 }
0x37af   :  { %v8185_v2 = vpop.f32.mrb[52].mxu0 }
0x37b0   :  { %6353 = vrot.lane.b32.xlu0 %v8185_v2, %s10798_s25  ;;  %v6324_v60 = vpop.f32.mrb[53].mxu0  ;;  %v7237_v2 = vld [vmem:[%s10762_s19 + $0x88] sm:$0xff] }
0x37b1   :  { %6351 = vrot.lane.b32.xlu1 %v6324_v60, %s10798_s25  ;;  %v8743_v35 = vpack.c.bf16 %v7237_v2, %v7236_v33  ;;  %v7239_v60 = vld [vmem:[%s10762_s19 + $0x98] sm:$0xff] }
0x37b2   :  { %v8747_v47 = vpack.c.bf16 %v7239_v60, %v7238_v50 }
0x37b3   :  { %8744 = vmatprep.subr.bf16.mxu0 %v8743_v35 }
0x3822   :  { %v6354_v9 = vpop.permute.xlu0 %6353 }
0x3823   :  { %v6352_v44 = vpop.permute.xlu1 %6351  ;;  %v6362_v53 = vsel %vm1630_vm12, %v6360_v8, %v6354_v9  ;;  %v7243_v9 = vld [vmem:[%s10762_s19 + $0xb8] sm:$0xff]  ;;  %v7246_v8 = vld [vmem:[%s10762_s19 + $0xd0] sm:$0xff] }
0x3824   :  { %v6361_v12 = vsel %vm1630_vm12, %v6359_v7, %v6352_v44  ;;  %v8755_v48 = vpack.c.bf16 %v7243_v9, %v7242_v59  ;;  %v7244_v44 = vld [vmem:[%s10762_s19 + $0xc0] sm:$0xff]  ;;  %v7245_v7 = vld [vmem:[%s10762_s19 + $0xc8] sm:$0xff]  ;;  %vm6890_vm12 = vcmask 123904  }
0x3825   :  { %8194 = vmatprep.mubr.msk.f32.mxu0 %vm435_vm4, %v6361_v12  ;;  %v8759_v12 = vpack.c.bf16 %v7245_v7, %v7244_v44  ;;  %v6813_v44 = vld [vmem:[%s10759_s16 + $0x8] sm:$0xff] }
0x3826   :  { %8195 = vmatmul.mubr.msk.f32.vlgmr.msra.gmra.mrb[54].mxu0 %vm435_vm4, %v6362_v53  ;;  %v7247_v53 = vld [vmem:[%s10762_s19 + $0xd8] sm:$0xff] }
0x3827   :  { %8746 = vmatpush3.bf16.msra.mxu0 %v8743_v35 }
0x3828   :  { %8748 = vmatprep.subr.bf16.mxu0 %v8747_v47 }
0x382b   :  { %8750 = vmatpush3.bf16.msra.mxu0 %v8747_v47 }
0x382c   :  { %8752 = vmatprep.subr.bf16.mxu0 %v8751_v58 }
0x382f   :  { %8754 = vmatpush3.bf16.msra.mxu0 %v8751_v58  ;;  %v6889_v58 = vmul.f32 %v10084_v6, %v10084_v6 }
0x3830   :  { %8756 = vmatprep.subr.bf16.mxu0 %v8755_v48 }
0x3831   :  { %v6891_v9 = vsel %vm6890_vm12, %v6889_v58, 0.0 }
0x3833   :  { %8758 = vmatpush3.bf16.msra.mxu0 %v8755_v48  ;;  %v6812_v48 = vld [vmem:[%s10759_s16] sm:$0xff] }
0x3834   :  { %8760 = vmatprep.subr.bf16.mxu0 %v8759_v12  ;;  %v8779_v7 = vpack.c.bf16 %v6813_v44, %v6812_v48 }
0x3837   :  { %8762 = vmatpush3.bf16.msra.mxu0 %v8759_v12  ;;  %v6815_v12 = vld [vmem:[%s10759_s16 + $0x18] sm:$0xff] }
0x38f9   :  { %v8196_v56 = vpop.f32.mrb[54].mxu0 }
0x38fa   :  { %v6450_v30 = vadd.f32 %v8196_v56, %v10400_v29  ;;  %v6440_v61 = vpop.f32.mrb[55].mxu0  ;;  %v7248_v56 = vld [vmem:[%s10762_s19 + $0xe0] sm:$0xff] }
0x38fb   :  { %v6449_v26 = vadd.f32 %v6440_v61, %v10402_v31 }
0x38fc   :  { %v10609_v5 = vadd.f32 %v6454_v45, %v6450_v30  ;;  %v7249_v30 = vld [vmem:[%s10762_s19 + $0xe8] sm:$0xff] }
0x38fd   :  { %v10611_v46 = vadd.f32 %v6454_v45, %v6449_v26  ;;  %v8763_v45 = vpack.c.bf16 %v7247_v53, %v7246_v8  ;;  %v8767_v61 = vpack.c.bf16 %v7249_v30, %v7248_v56  ;;  %v7250_v26 = vld [vmem:[%s10762_s19 + $0xf0] sm:$0xff] }
0x38fe   :  { %v6460_v10 = vsel %vm435_vm4, %v10609_v5, 0.0  ;;  %v6814_v8 = vld [vmem:[%s10759_s16 + $0x10] sm:$0xff] }
0x38ff   :  { %6461 = vadd.xlane.f32.xlu0 %v6460_v10  ;;  %v6457_v11 = vsel %vm435_vm4, %v10611_v46, 0.0  ;;  %8764 = vmatprep.subr.bf16.mxu0 %v8763_v45  ;;  %v7251_v10 = vld [vmem:[%s10762_s19 + $0xf8] sm:$0xff]  ;;  %s6705_s19 = sld [smem:[#allocation3]]  ;;  %v8782_v53 = vpack.c.bf16 %v6815_v12, %v6814_v8 }
0x3900   :  { %6458 = vadd.xlane.f32.xlu1 %v6457_v11  ;;  %8766 = vmatpush3.bf16.msra.mxu0 %v8763_v45  ;;  %v8771_v11 = vpack.c.bf16 %v7251_v10, %v7250_v26 }
0x3901   :  { %8768 = vmatprep.subr.bf16.mxu0 %v8767_v61 }
0x3904   :  { %8770 = vmatpush3.bf16.msra.mxu0 %v8767_v61 }
0x3905   :  { %8772 = vmatprep.subr.bf16.mxu0 %v8771_v11 }
0x3908   :  { %8774 = vmatpush3.bf16.msra.mxu0 %v8771_v11 }
0x398c   :  { %v6462_v13 = vpop.xlane.xlu0 %6461 }
0x398d   :  { %v6464_v62 = vmul.f32 0.03125, %v6462_v13  ;;  %v6459_v34 = vpop.xlane.xlu1 %6458  ;;  %v7233_v13 = vld [vmem:[%s10764_s21 + $0x1] ss:$0 sm:$0xff]  ;;  %s7253_s21 = sld [smem:[#allocation3 + $0x1]] }
0x398e   :  { %v6463_v15 = vmul.f32 0.03125, %v6459_v34 }
0x398f   :  { %v6466_v29 = vsub.f32 %v10609_v5, %v6464_v62 }
0x3990   :  { %v6465_v31 = vsub.f32 %v10611_v46, %v6463_v15 }
0x3991   :  { %v6468_v16 = vmul.f32 %v6466_v29, %v6466_v29 }
0x3992   :  { %v6467_v14 = vmul.f32 %v6465_v31, %v6465_v31 }
0x3993   :  { %v6472_v18 = vsel %vm435_vm4, %v6468_v16, 0.0 }
0x3994   :  { %6473 = vadd.xlane.f32.xlu1 %v6472_v18  ;;  %v6469_v22 = vsel %vm435_vm4, %v6467_v14, 0.0 }
0x3995   :  { %6470 = vadd.xlane.f32.xlu0 %v6469_v22 }
0x3a21   :  { %v6474_v4 = vpop.xlane.xlu1 %6473 }
0x3a22   :  { %v6476_v36 = vmul.f32 0.03125, %v6474_v4  ;;  %v6471_v1 = vpop.xlane.xlu0 %6470 }
0x3a23   :  { %v6475_v25 = vmul.f32 0.03125, %v6471_v1 }
0x3a24   :  { %v6478_v37 = vadd.f32 1e-05, %v6476_v36 }
0x3a25   :  { %v6477_v42 = vadd.f32 1e-05, %v6475_v25 }
0x3a26   :  { %9095 = vrsqrt.f32 %v6478_v37 }
0x3a27   :  { %9097 = vrsqrt.f32 %v6477_v42 }
0x3a30   :  { %v9096_v20 = vpop.eup %9095 }
0x3a31   :  { %v9098_v39 = vpop.eup %9097  ;;  %v6482_v52 = vmul.f32 %v9096_v20, %v6466_v29  ;;  %v6706_v20 = vstv %s6705_s19 }
0x3a32   :  { %v6481_v54 = vmul.f32 %v9098_v39, %v6465_v31  ;;  %v6710_v39 = vstv %s7253_s21  ;;  %vm6707_vm6 = vcmp.eq.s32.totalorder %v9357_v41, %v6706_v20 }
0x3a33   :  { %v6488_v57 = vmul.f32 %v6486_v55, %v6482_v52  ;;  %v7252_v52 = vld [vmem:[%s10763_s20 + $0x18] ss:$0 sm:$0xff]  ;;  %vm6711_vm5 = vcmp.eq.s32.totalorder %v9357_v41, %v6710_v39  ;;  %v6708_v33 = vsel %vm6707_vm6, 1.0, %v9127_v43 }
0x3a34   :  { %v6487_v24 = vmul.f32 %v6486_v55, %v6481_v54  ;;  %v6712_v2 = vsel %vm6711_vm5, 1.0, %v9127_v43 }
0x3a35   :  { %v6494_v49 = vadd.f32 %v6492_v40, %v6488_v57  ;;  %v6714_v50 = vsel %vm6713_vm7, %v6708_v33, %v6712_v2 }
0x3a36   :  { %v6493_v38 = vadd.f32 %v6492_v40, %v6487_v24 }
0x3a38   :  { %8205 = vmatprep.mubr.msk.f32.mxu1 %vm435_vm4, %v6493_v38 }
0x3a39   :  { %8206 = vmatmul.mubr.msk.f32.vlgmr.msra.gmra.mrb[62].mxu1 %vm435_vm4, %v6494_v49 }
0x3a3a   :  { %8247 = vmatprep.mubr.msk.f32.mxu1 %vm9134_vm13, %v9127_v43 }
0x3b0c   :  { %v8207_v62 = vpop.f32.mrb[62].mxu1 }
0x3b0d   :  { %v6584_v34 = vadd.f32 %v8207_v62, %v7233_v13  ;;  %v6578_v15 = vpop.f32.mrb[63].mxu1 }
0x3b0e   :  { %v6579_v29 = vadd.f32 %v7233_v13, %v6578_v15 }
0x3b0f   :  { %v6588_v31 = vmul.f32 %v6584_v34, %v6584_v34 }
0x3b10   :  { %v6587_v16 = vmul.f32 %v6579_v29, %v6579_v29 }
0x3b11   :  { %v6590_v14 = vmul.f32 %v6588_v31, %v6584_v34 }
0x3b12   :  { %v6589_v18 = vmul.f32 %v6587_v16, %v6579_v29 }
0x3b13   :  { %v6592_v22 = vmul.f32 0.044715, %v6590_v14 }
0x3b14   :  { %v6591_v63 = vmul.f32 0.044715, %v6589_v18 }
0x3b15   :  { %v6594_v0 = vadd.f32 %v6592_v22, %v6584_v34 }
0x3b16   :  { %v6593_v23 = vadd.f32 %v6591_v63, %v6579_v29 }
0x3b17   :  { %v6596_v27 = vmul.f32 0.7978846, %v6594_v0 }
0x3b18   :  { %v6595_v21 = vmul.f32 0.7978846, %v6593_v23 }
0x3b19   :  { %9099 = vtanh.f32 %v6596_v27 }
0x3b1a   :  { %9101 = vtanh.f32 %v6595_v21 }
0x3b23   :  { %v9100_v28 = vpop.eup %9099 }
0x3b24   :  { %v9102_v4 = vpop.eup %9101  ;;  %v6600_v36 = vadd.f32 1.0, %v9100_v28 }
0x3b25   :  { %v6599_v1 = vadd.f32 1.0, %v9102_v4 }
0x3b26   :  { %v6602_v25 = vmul.f32 0.5, %v6600_v36 }
0x3b27   :  { %v6601_v37 = vmul.f32 0.5, %v6599_v1 }
0x3b28   :  { %v6604_v55 = vmul.f32 %v6602_v25, %v6584_v34 }
0x3b29   :  { %v6603_v42 = vmul.f32 %v6601_v37, %v6579_v29 }
0x3b2b   :  { %8240 = vmatprep.mubr.f32.mxu0 %v6603_v42 }
0x3b2c   :  { %8241 = vmatmul.mubr.f32.vlgmr.msra.gmra.mrb[56].mxu0 %v6604_v55 }
0x3bff   :  { %v8242_v54 = vpop.f32.mrb[56].mxu0 }
0x3c00   :  { %v6698_v40 = vadd.f32 %v8242_v54, %v10609_v5  ;;  %v6688_v57 = vpop.f32.mrb[57].mxu0 }
0x3c01   :  { %v6697_v24 = vadd.f32 %v6688_v57, %v10611_v46 }
0x3c02   :  { %v6704_v38 = vadd.f32 %v7252_v52, %v6698_v40 }
0x3c03   :  { %v6703_v49 = vadd.f32 %v7252_v52, %v6697_v24 }
0x3c05   :  { %v8776_v35 = vpack.c.bf16 %v6704_v38, %v6703_v49 }
0x3c07   :  { %8777 = vmatpush3.bf16.msra.mxu1 %v8776_v35 }
0x3c08   :  { %8778 = vmatprep.subr.bf16.mxu1 %v9126_v3 }
0x3c0a   :  { %8248 = vmatmul.mubr.msk.f32.vlgmr.msra.gmra.mrb[64].mxu1 %vm884_vm10, %v6714_v50 }
0x3c0b   :  { %8258 = vmatprep.mubr.msk.f32.mxu1 %vm9134_vm13, %v9127_v43  ;;  %8780 = vmatpush3.bf16.msra.mxu1 %v8779_v7 }
0x3c0c   :  { %8781 = vmatprep.subr.bf16.mxu1 %v9126_v3  ;;  %v6788_v3 = vld [vmem:[%s10758_s15] sm:$0x3] }
0x3c0d   :  { %v6805_v61 = vrot.slane %v6788_v3, %v9407_v17  ;;  %v6810_v11 = vrot.slane %v6788_v3, %v9413_v19 }
0x3c0f   :  { %8783 = vmatpush3.bf16.msra.mxu1 %v8782_v53 }
0x3c10   :  { %8261 = vmatprep.subr.mxu1 %v9127_v43 }
0x3cdd   :  { %v6784_v5 = vpop.f32.mrb[64].mxu1 }
0x3cde   :  { %v8249_v46 = vpop.f32.mrb[65].mxu1  ;;  %v6789_v41 = vsel %vm3531_vm15, %v6784_v5, 0.0 }
0x3cdf   :  { %6790 = vadd.xlane.f32.xlu0 %v6789_v41 }
0x3d6c   :  { %v6791_v60 = vpop.xlane.xlu0 %6790 }
0x3d6d   :  { %v6792_v47 = vmul.f32 0.03125, %v6791_v60 }
0x3d6f   :  { %v6793_v51 = vsub.f32 %v6784_v5, %v6792_v47 }
0x3d71   :  { %v6794_v32 = vmul.f32 %v6793_v51, %v6793_v51 }
0x3d73   :  { %v6795_v59 = vsel %vm3531_vm15, %v6794_v32, 0.0 }
0x3d74   :  { %6796 = vadd.xlane.f32.xlu1 %v6795_v59 }
0x3d78   :  { %6892 = vadd.xlane.f32.xlu1 %v6891_v9 }
0x3e01   :  { %v6797_v45 = vpop.xlane.xlu1 %6796 }
0x3e02   :  { %v6798_v56 = vmul.f32 0.03125, %v6797_v45 }
0x3e04   :  { %v6799_v30 = vadd.f32 1e-05, %v6798_v56 }
0x3e05   :  { %v6893_v16 = vpop.xlane.xlu1 %6892 }
0x3e06   :  { %9103 = vrsqrt.f32 %v6799_v30 }
0x3e10   :  { %v9104_v26 = vpop.eup %9103 }
0x3e11   :  { %v6801_v10 = vmul.f32 %v9104_v26, %v6793_v51 }
0x3e13   :  { %v6806_v13 = vmul.f32 %v6805_v61, %v6801_v10 }
0x3e15   :  { %v6811_v62 = vadd.f32 %v6810_v11, %v6806_v13 }
0x3e17   :  { %8259 = vmatmul.mubr.msk.f32.vlgmr.msra.gmra.mrb[66].mxu1 %vm435_vm4, %v6811_v62  ;;  %vm6984_vm4 = vcmask 9216  }
0x3e18   :  { %8263 = vmatprep.mubr.msk.f32.mxu1 %vm9134_vm13, %v9127_v43  ;;  %v6903_v43 = vstv %s10766_s23 }
0x3e19   :  { %v6904_v63 = vmul.f32 1.442695, %v6903_v43 }
0x3eea   :  { %v6885_v34 = vpop.f32.mrb[66].mxu1 }
0x3eeb   :  { %v6896_v15 = vmul.f32 %v6885_v34, %v6885_v34  ;;  %v8260_v29 = vpop.f32.mrb[67].mxu1 }
0x3eed   :  { %v6897_v31 = vsel %vm6890_vm12, %v6896_v15, 0.0 }
0x3eee   :  { %6898 = vadd.xlane.f32.xlu0 %v6897_v31 }
0x3f7b   :  { %v6899_v14 = vpop.xlane.xlu0 %6898 }
0x3f7c   :  { %9105 = vrsqrt.f32 %v6899_v14 }
0x3f7d   :  { %9107 = vrsqrt.f32 %v6893_v16 }
0x3f7e   :  { %9109 = vpow2.f32 %v6904_v63 }
0x3f86   :  { %v9106_v17 = vpop.eup %9105 }
0x3f87   :  { %v9108_v18 = vpop.eup %9107  ;;  %v6901_v19 = vmul.f32 %v9106_v17, %v6885_v34 }
0x3f88   :  { %v6895_v22 = vmul.f32 %v9108_v18, %v10084_v6  ;;  %v9110_v0 = vpop.eup %9109 }
0x3f89   :  { %8262 = vmatpush3.xpose.msk.msra.mxu1 %vm884_vm10, %v6901_v19  ;;  %v6906_v23 = vmin.f32 %v9110_v0, 100.0 }
0x3f8c   :  { %8264 = vmatmul.mubr.msk.f32.vlgmr.msra.gmra.mrb[68].mxu1 %vm884_vm10, %v6895_v22 }
0x405f   :  { %v6979_v27 = vpop.f32.mrb[68].mxu1 }
0x4060   :  { %v6983_v21 = vmul.f32 %v6979_v27, %v6906_v23  ;;  %v8265_v28 = vpop.f32.mrb[69].mxu1 }
0x4062   :  { %6985 = vst.msk [vmem:[%s10767_s24] sm:$0x3] %vm6984_vm4, %v6983_v21 }
0x4063   :  { %6990 = vsyncpa [#allocation4], 1 }

</bundles_post_ra>
